<compile_context>
chip_gen: v7x
topology: tpu7x:2x2x1
jax: 0.10.0
libtpu: 0.0.40
codegen_flags: <defaults>
</compile_context>

<pallas_src>
import functools
import math

import jax
import jax.numpy as jnp
from jax.experimental import pallas as pl
from jax.experimental.pallas import tpu as pltpu

# ---- model hyper-parameters (from ResidualMLPModel.__init__) ----
NUM_LAYERS = 5
D_MODEL = 124
HIDDEN_DIM = 124
TEMB_DIM = 124
TIME_SCALE = 1000.0
D_IN = 2
OUT_DIM = 2
LN_EPS = 1e-5
MAX_POSITIONS = 10000.0

# ---- lane-aligned (padded) dims used inside the kernel ----
D_PAD = 128                         # d_model / hidden_dim 124 -> 128
T4_PAD = 512                        # 4 * temb_dim 496 -> 512
HALF_PAD = 64                       # timestep-embedding half_dim 62 -> 64
FILM_COLS = NUM_LAYERS * 2 * D_PAD  # 1280: all layers' [scale|shift], fused
IN_PACK = 8                         # packed [x0, x1, t, 0...] input lanes
OUT_MXU = 128                       # output-layer matmul width (lane-dense MXU pass)
OUT_STORE = 8                       # lanes written back to HBM (>= OUT_DIM)


def _round_up(v, m):
    return ((v + m - 1) // m) * m


def _pad_to(a, shape, dtype):
    a = a.astype(dtype)
    pads = [(0, s - d) for s, d in zip(shape, a.shape)]
    return jnp.pad(a, pads)


# ----------------------------------------------------------------------------
# Kernel
# ----------------------------------------------------------------------------
def residual_mlp_kernel(
    xin_ref, freq_ref,
    w_in0_ref, w_in1_ref, b_in_ref,
    wt1_sin_ref, wt1_cos_ref, bt1_ref,
    wt2_ref, bt2_ref,
    w_film_ref, b_film_ref,
    w1_ref, b1_ref, w2_ref, b2_ref,
    lnw_ref, lnb_ref,
    w_out_ref, b_out_ref,
    out_ref,
):
    f32 = jnp.float32
    bf16 = jnp.bfloat16

    xin = xin_ref[...]                         # [tb, IN_PACK] f32 (packed x0,x1,t)
    x0 = xin[:, 0:1]
    x1 = xin[:, 1:2]
    t = xin[:, 2:3]

    # --- transformer timestep embedding (sin/cos) fused with the first
    #     temb_net linear: concat([sin, cos]) @ W == sin @ W_top + cos @ W_bot.
    arg = (t * TIME_SCALE) * freq_ref[...]     # [tb, HALF_PAD] f32
    sin_e = jnp.sin(arg).astype(bf16)
    cos_e = jnp.cos(arg).astype(bf16)
    h_t = (jnp.dot(sin_e, wt1_sin_ref[...], preferred_element_type=f32)
           + jnp.dot(cos_e, wt1_cos_ref[...], preferred_element_type=f32)
           + bt1_ref[...])
    h_t = jnp.maximum(h_t, 0.0)                                    # ReLU (f32)
    temb = (jnp.dot(h_t.astype(bf16), wt2_ref[...], preferred_element_type=f32)
            + bt2_ref[...]).astype(bf16)       # [tb, T4_PAD] bf16; f32 temb dies here

    # --- FiLM conditioning for ALL layers in one K=512, N=1280 matmul
    #     (near-full MXU occupancy); per-layer scale/shift are static
    #     128-lane slices taken inside the loop.  temb is dead afterwards.
    film = (jnp.dot(temb, w_film_ref[...], preferred_element_type=f32)
            + b_film_ref[...])                 # [tb, FILM_COLS] f32

    # --- input layer: K=2 matmul done on the VPU (two broadcast FMAs, f32) ---
    h = x0 * w_in0_ref[...] + x1 * w_in1_ref[...] + b_in_ref[...]  # [tb, D_PAD] f32

    inv_n = 1.0 / float(D_MODEL)               # LN over the 124 real lanes
    for n in range(NUM_LAYERS):
        a = (jnp.dot(h.astype(bf16), w1_ref[n], preferred_element_type=f32)
             + b1_ref[n:n + 1, :])
        a = jnp.maximum(a, 0.0)
        r = (jnp.dot(a.astype(bf16), w2_ref[n], preferred_element_type=f32)
             + b2_ref[n:n + 1, :])
        z = h + r                              # padded lanes stay exactly 0
        # fused LayerNorm reductions (biased variance, as in torch):
        s1 = jnp.sum(z, axis=-1, keepdims=True)
        s2 = jnp.sum(z * z, axis=-1, keepdims=True)
        mu = s1 * inv_n
        var = s2 * inv_n - mu * mu
        zn = (z - mu) * jax.lax.rsqrt(var + LN_EPS)
        hn = zn * lnw_ref[n:n + 1, :] + lnb_ref[n:n + 1, :]  # re-zeroes padded lanes
        c = n * 2 * D_PAD
        scale = film[:, c:c + D_PAD]           # static 128-lane slice (vreg boundary)
        shift = film[:, c + D_PAD:c + 2 * D_PAD]
        h = scale * hn + shift

    # --- output layer: lane-dense MXU pass, narrow (masked) HBM writeback ---
    res = (jnp.dot(h.astype(bf16), w_out_ref[...], preferred_element_type=f32)
           + b_out_ref[...])                   # [tb, OUT_MXU] f32
    out_ref[...] = res[:, :OUT_STORE]


# ----------------------------------------------------------------------------
# Parameters
# ----------------------------------------------------------------------------
def make_params(key):
    """Deterministic PyTorch-style (uniform fan-in) init. Weights stored [in, out], f32."""
    def lin(k, din, dout):
        kw, kb = jax.random.split(k)
        bound = 1.0 / math.sqrt(din)
        w = jax.random.uniform(kw, (din, dout), jnp.float32, -bound, bound)
        b = jax.random.uniform(kb, (dout,), jnp.float32, -bound, bound)
        return w, b

    keys = jax.random.split(key, 5 + 4 * NUM_LAYERS + NUM_LAYERS)
    ki = iter(keys)

    p = {}
    p["w_in"], p["b_in"] = lin(next(ki), D_IN, D_MODEL)
    p["wt1"], p["bt1"] = lin(next(ki), TEMB_DIM, HIDDEN_DIM)
    p["wt2"], p["bt2"] = lin(next(ki), HIDDEN_DIM, 4 * TEMB_DIM)
    p["w_out"], p["b_out"] = lin(next(ki), D_MODEL, OUT_DIM)

    w1s, b1s, w2s, b2s, wts, bts, lws, lbs = [], [], [], [], [], [], [], []
    for _ in range(NUM_LAYERS):
        w, b = lin(next(ki), D_MODEL, HIDDEN_DIM); w1s.append(w); b1s.append(b)
        w, b = lin(next(ki), HIDDEN_DIM, D_MODEL); w2s.append(w); b2s.append(b)
        w, b = lin(next(ki), 4 * TEMB_DIM, 2 * D_MODEL); wts.append(w); bts.append(b)
        lws.append(jnp.ones((D_MODEL,), jnp.float32))
        lbs.append(jnp.zeros((D_MODEL,), jnp.float32))
        next(ki)  # keep key consumption stable if layer count changes
    p["w1"] = jnp.stack(w1s); p["b1"] = jnp.stack(b1s)
    p["w2"] = jnp.stack(w2s); p["b2"] = jnp.stack(b2s)
    p["wtl"] = jnp.stack(wts); p["btl"] = jnp.stack(bts)
    p["lnw"] = jnp.stack(lws); p["lnb"] = jnp.stack(lbs)
    return p


def prepare_kernel_params(p):
    """One-time packing: pad feature dims to lane multiples, split concat-style
    weights into halves, fuse all FiLM layer weights into one matrix, cast
    matmul weights to bf16 (element-wise params stay f32).  Call ONCE at init
    and pass the result to residual_mlp_forward (keeps the ~1.8 MiB of padding/
    casting XLA ops off the per-call path)."""
    f32, bf16 = jnp.float32, jnp.bfloat16
    half = TEMB_DIM // 2

    # Shape guards for the padded-lane invariant (lanes >= D_MODEL must be 0).
    assert p["w_in"].shape == (D_IN, D_MODEL)
    assert p["lnw"].shape == (NUM_LAYERS, D_MODEL)
    assert p["lnb"].shape == (NUM_LAYERS, D_MODEL)
    assert p["wtl"].shape == (NUM_LAYERS, 4 * TEMB_DIM, 2 * D_MODEL)

    kp = {}
    freqs = jnp.exp(jnp.arange(half, dtype=f32)
                    * -(math.log(MAX_POSITIONS) / (half - 1)))
    kp["freqs"] = _pad_to(freqs[None, :], (1, HALF_PAD), f32)   # padded lanes hit zero weights

    kp["w_in0"] = _pad_to(p["w_in"][0:1, :], (1, D_PAD), f32)
    kp["w_in1"] = _pad_to(p["w_in"][1:2, :], (1, D_PAD), f32)
    kp["b_in"] = _pad_to(p["b_in"][None, :], (1, D_PAD), f32)
    kp["wt1_sin"] = _pad_to(p["wt1"][:half, :], (HALF_PAD, D_PAD), bf16)
    kp["wt1_cos"] = _pad_to(p["wt1"][half:, :], (HALF_PAD, D_PAD), bf16)
    kp["bt1"] = _pad_to(p["bt1"][None, :], (1, D_PAD), f32)
    kp["wt2"] = _pad_to(p["wt2"], (D_PAD, T4_PAD), bf16)
    kp["bt2"] = _pad_to(p["bt2"][None, :], (1, T4_PAD), f32)

    # Fused FiLM weight: per layer a [scale | shift] pair of 128-lane blocks.
    wf, bf_ = [], []
    for n in range(NUM_LAYERS):
        wf.append(_pad_to(p["wtl"][n][:, :D_MODEL], (T4_PAD, D_PAD), bf16))
        wf.append(_pad_to(p["wtl"][n][:, D_MODEL:], (T4_PAD, D_PAD), bf16))
        bf_.append(_pad_to(p["btl"][n][None, :D_MODEL], (1, D_PAD), f32))
        bf_.append(_pad_to(p["btl"][n][None, D_MODEL:], (1, D_PAD), f32))
    kp["w_film"] = jnp.concatenate(wf, axis=1)    # [T4_PAD, FILM_COLS] bf16
    kp["b_film"] = jnp.concatenate(bf_, axis=1)   # [1, FILM_COLS] f32

    kp["w1"] = _pad_to(p["w1"], (NUM_LAYERS, D_PAD, D_PAD), bf16)
    kp["b1"] = _pad_to(p["b1"], (NUM_LAYERS, D_PAD), f32)
    kp["w2"] = _pad_to(p["w2"], (NUM_LAYERS, D_PAD, D_PAD), bf16)
    kp["b2"] = _pad_to(p["b2"], (NUM_LAYERS, D_PAD), f32)
    kp["lnw"] = _pad_to(p["lnw"], (NUM_LAYERS, D_PAD), f32)
    kp["lnb"] = _pad_to(p["lnb"], (NUM_LAYERS, D_PAD), f32)
    kp["w_out"] = _pad_to(p["w_out"], (D_PAD, OUT_MXU), bf16)
    kp["b_out"] = _pad_to(p["b_out"][None, :], (1, OUT_MXU), f32)
    return kp


# ----------------------------------------------------------------------------
# Wrapper
# ----------------------------------------------------------------------------
def _choose_tiles(B, tile_b):
    """Pick (tile rows, padded batch, grid steps).  Limits batch-padding waste
    to < 8 rows per step and guarantees >= 2 grid steps for moderate batches so
    the "parallel" grid axis can shard across v7x's two TensorCores."""
    cdiv = lambda a, b: -(-a // b)
    n_steps = max(1, cdiv(B, tile_b))
    if B >= 16:
        n_steps = max(n_steps, 2)
    tb = _round_up(cdiv(B, n_steps), 8)
    return tb, tb * n_steps, n_steps


@functools.partial(jax.jit, static_argnames=("tile_b",))
def residual_mlp_forward(x, times, kernel_params, tile_b=1024):
    """Fused Pallas forward; returns the output_type='x0' dict.
    `kernel_params` is the output of prepare_kernel_params (packed once)."""
    kp = kernel_params
    B = x.shape[0]
    tb, Bp, n_steps = _choose_tiles(B, tile_b)

    # Pack x0, x1, t into one narrow f32 input (1 DMA / step instead of 3).
    xin = jnp.concatenate(
        [x.astype(jnp.float32), times.astype(jnp.float32)[:, None]], axis=1)
    xin = jnp.pad(xin, ((0, Bp - B), (0, IN_PACK - (D_IN + 1))))

    def resident(shape):
        nd = len(shape)
        return pl.BlockSpec(shape, lambda i: (0,) * nd)   # weights stay resident

    in_specs = [
        pl.BlockSpec((tb, IN_PACK), lambda i: (i, 0)),    # packed x0/x1/t
        resident((1, HALF_PAD)),                          # freqs
        resident((1, D_PAD)), resident((1, D_PAD)), resident((1, D_PAD)),
        resident((HALF_PAD, D_PAD)), resident((HALF_PAD, D_PAD)), resident((1, D_PAD)),
        resident((D_PAD, T4_PAD)), resident((1, T4_PAD)),
        resident((T4_PAD, FILM_COLS)), resident((1, FILM_COLS)),
        resident((NUM_LAYERS, D_PAD, D_PAD)), resident((NUM_LAYERS, D_PAD)),
        resident((NUM_LAYERS, D_PAD, D_PAD)), resident((NUM_LAYERS, D_PAD)),
        resident((NUM_LAYERS, D_PAD)), resident((NUM_LAYERS, D_PAD)),
        resident((D_PAD, OUT_MXU)), resident((1, OUT_MXU)),
    ]
    out_spec = pl.BlockSpec((tb, OUT_STORE), lambda i: (i, 0))

    macs_per_row = (
        HIDDEN_DIM * TEMB_DIM + HIDDEN_DIM * 4 * TEMB_DIM + D_IN * D_MODEL
        + NUM_LAYERS * (D_MODEL * HIDDEN_DIM + HIDDEN_DIM * D_MODEL
                        + 4 * TEMB_DIM * 2 * D_MODEL)
        + D_MODEL * OUT_DIM)
    weight_bytes = sum(int(v.size) * v.dtype.itemsize for v in kp.values())
    cost = pl.CostEstimate(
        flops=int(2 * Bp * macs_per_row),
        transcendentals=int(Bp * (TEMB_DIM + NUM_LAYERS)),
        bytes_accessed=int(weight_bytes + Bp * IN_PACK * 4 + Bp * OUT_STORE * 4))

    out_padded = pl.pallas_call(
        residual_mlp_kernel,
        grid=(n_steps,),
        in_specs=in_specs,
        out_specs=out_spec,
        out_shape=jax.ShapeDtypeStruct((Bp, OUT_STORE), jnp.float32),
        compiler_params=pltpu.CompilerParams(
            dimension_semantics=("parallel",),
            vmem_limit_bytes=48 * 1024 * 1024),
        cost_estimate=cost,
    )(
        xin, kp["freqs"],
        kp["w_in0"], kp["w_in1"], kp["b_in"],
        kp["wt1_sin"], kp["wt1_cos"], kp["bt1"],
        kp["wt2"], kp["bt2"],
        kp["w_film"], kp["b_film"],
        kp["w1"], kp["b1"], kp["w2"], kp["b2"],
        kp["lnw"], kp["lnb"],
        kp["w_out"], kp["b_out"],
    )

    out = out_padded[:B, :OUT_DIM]
    # output_type == 'x0'
    return {"x0": out, "x_0_t": out, "output": out}


# ----------------------------------------------------------------------------
# References
# ----------------------------------------------------------------------------
def reference_forward_f32(x, times, params):
    """Pure-JAX f32 reference mirroring the PyTorch module exactly."""
    half_dim = TEMB_DIM // 2
    freqs = jnp.exp(jnp.arange(half_dim, dtype=jnp.float32)
                    * -(math.log(MAX_POSITIONS) / (half_dim - 1)))
    arg = (times.astype(jnp.float32) * TIME_SCALE)[:, None] * freqs[None, :]
    emb = jnp.concatenate([jnp.sin(arg), jnp.cos(arg)], axis=1)
    h_t = jnp.maximum(emb @ params["wt1"] + params["bt1"], 0.0)
    temb = h_t @ params["wt2"] + params["bt2"]
    h = x.astype(jnp.float32) @ params["w_in"] + params["b_in"]
    for n in range(NUM_LAYERS):
        a = jnp.maximum(h @ params["w1"][n] + params["b1"][n], 0.0)
        z = h + (a @ params["w2"][n] + params["b2"][n])
        mu = jnp.mean(z, axis=-1, keepdims=True)
        var = jnp.mean((z - mu) ** 2, axis=-1, keepdims=True)
        zn = (z - mu) / jnp.sqrt(var + LN_EPS)
        hn = zn * params["lnw"][n] + params["lnb"][n]
        film = temb @ params["wtl"][n] + params["btl"][n]
        h = film[:, :D_MODEL] * hn + film[:, D_MODEL:]
    return h @ params["w_out"] + params["b_out"]


def reference_forward_bf16(x, times, params):
    """Mirror of the kernel's numerics: bf16 matmul inputs, f32 accumulation,
    f32 element-wise math, fused LN reductions."""
    f32, bf16 = jnp.float32, jnp.bfloat16
    dot = lambda a, w: jnp.dot(a.astype(bf16), w.astype(bf16), preferred_element_type=f32)
    half_dim = TEMB_DIM // 2
    freqs = jnp.exp(jnp.arange(half_dim, dtype=f32)
                    * -(math.log(MAX_POSITIONS) / (half_dim - 1)))
    arg = (times.astype(f32) * TIME_SCALE)[:, None] * freqs[None, :]
    emb = jnp.concatenate([jnp.sin(arg), jnp.cos(arg)], axis=1)
    h_t = jnp.maximum(dot(emb, params["wt1"]) + params["bt1"], 0.0)
    temb = dot(h_t, params["wt2"]) + params["bt2"]
    h = x.astype(f32) @ params["w_in"] + params["b_in"]
    inv_n = 1.0 / float(D_MODEL)
    for n in range(NUM_LAYERS):
        a = jnp.maximum(dot(h, params["w1"][n]) + params["b1"][n], 0.0)
        z = h + (dot(a, params["w2"][n]) + params["b2"][n])
        mu = jnp.sum(z, axis=-1, keepdims=True) * inv_n
        var = jnp.sum(z * z, axis=-1, keepdims=True) * inv_n - mu * mu
        zn = (z - mu) * jax.lax.rsqrt(var + LN_EPS)
        hn = zn * params["lnw"][n] + params["lnb"][n]
        film = dot(temb, params["wtl"][n]) + params["btl"][n]
        h = film[:, :D_MODEL] * hn + film[:, D_MODEL:]
    return dot(h, params["w_out"]) + params["b_out"]


# ----------------------------------------------------------------------------
# Demo / self-test
# ----------------------------------------------------------------------------
if __name__ == "__main__":
    key = jax.random.PRNGKey(0)
    kparam, kx, kt = jax.random.split(key, 3)

    params = make_params(kparam)
    kp = prepare_kernel_params(params)      # packed ONCE, reused across calls

    # Small-batch check (single grid step).
    B = 8
    x = jax.random.normal(kx, (B, D_IN), jnp.float32)
    times = jax.random.uniform(kt, (B,), jnp.float32)   # scaled by 1000 inside

    out = jax.block_until_ready(residual_mlp_forward(x, times, kp)["output"])
    ref_mirror = jax.block_until_ready(reference_forward_bf16(x, times, params))
    ref_f32 = jax.block_until_ready(reference_forward_f32(x, times, params))

    assert out.shape == (B, OUT_DIM)
    assert jnp.allclose(out, ref_mirror, atol=2e-3, rtol=2e-3), (
        f"mirror mismatch: max abs err {jnp.max(jnp.abs(out - ref_mirror))}")
    assert jnp.allclose(out, ref_f32, atol=2e-1, rtol=2e-1), (
        f"f32 sanity mismatch: max abs err {jnp.max(jnp.abs(out - ref_f32))}")

    # Multi-step grid + batch-padding check (odd batch, small tiles).
    B2 = 300
    kx2, kt2 = jax.random.split(jax.random.PRNGKey(1))
    x2 = jax.random.normal(kx2, (B2, D_IN), jnp.float32)
    t2 = jax.random.uniform(kt2, (B2,), jnp.float32)
    out2 = jax.block_until_ready(residual_mlp_forward(x2, t2, kp, tile_b=128)["output"])
    ref2 = jax.block_until_ready(reference_forward_bf16(x2, t2, params))
    assert out2.shape == (B2, OUT_DIM)
    assert jnp.allclose(out2, ref2, atol=2e-3, rtol=2e-3), (
        f"gridded mismatch: max abs err {jnp.max(jnp.abs(out2 - ref2))}")

    print("KERNEL_OK")
</pallas_src>

<mosaic_0001>
module attributes {stable_mosaic.version = 11 : i64} {
  func.func @residual_mlp_kernel(%arg0: i32, %arg1: memref<8x8xf32, #tpu.memory_space<vmem>>, %arg2: memref<1x64xf32, #tpu.memory_space<vmem>>, %arg3: memref<1x128xf32, #tpu.memory_space<vmem>>, %arg4: memref<1x128xf32, #tpu.memory_space<vmem>>, %arg5: memref<1x128xf32, #tpu.memory_space<vmem>>, %arg6: memref<64x128xbf16, #tpu.memory_space<vmem>>, %arg7: memref<64x128xbf16, #tpu.memory_space<vmem>>, %arg8: memref<1x128xf32, #tpu.memory_space<vmem>>, %arg9: memref<128x512xbf16, #tpu.memory_space<vmem>>, %arg10: memref<1x512xf32, #tpu.memory_space<vmem>>, %arg11: memref<512x1280xbf16, #tpu.memory_space<vmem>>, %arg12: memref<1x1280xf32, #tpu.memory_space<vmem>>, %arg13: memref<5x128x128xbf16, #tpu.memory_space<vmem>>, %arg14: memref<5x128xf32, #tpu.memory_space<vmem>>, %arg15: memref<5x128x128xbf16, #tpu.memory_space<vmem>>, %arg16: memref<5x128xf32, #tpu.memory_space<vmem>>, %arg17: memref<5x128xf32, #tpu.memory_space<vmem>>, %arg18: memref<5x128xf32, #tpu.memory_space<vmem>>, %arg19: memref<128x128xbf16, #tpu.memory_space<vmem>>, %arg20: memref<1x128xf32, #tpu.memory_space<vmem>>, %arg21: memref<8x8xf32, #tpu.memory_space<vmem>>) attributes {dimension_semantics = [#tpu.dimension_semantics<parallel>], iteration_bounds = array<i64: 1>, scalar_prefetch = 0 : i64, scratch_operands = 0 : i64, tpu.core_type = #tpu.core_type<tc>, window_params = [{transform_indices = @transform_0, window_bounds = array<i64: 8, 8>}, {pipeline_mode = #tpu.pipeline_mode<synchronous>, transform_indices = @transform_1, window_bounds = array<i64: 1, 64>}, {pipeline_mode = #tpu.pipeline_mode<synchronous>, transform_indices = @transform_2, window_bounds = array<i64: 1, 128>}, {pipeline_mode = #tpu.pipeline_mode<synchronous>, transform_indices = @transform_3, window_bounds = array<i64: 1, 128>}, {pipeline_mode = #tpu.pipeline_mode<synchronous>, transform_indices = @transform_4, window_bounds = array<i64: 1, 128>}, {pipeline_mode = #tpu.pipeline_mode<synchronous>, transform_indices = @transform_5, window_bounds = array<i64: 64, 128>}, {pipeline_mode = #tpu.pipeline_mode<synchronous>, transform_indices = @transform_6, window_bounds = array<i64: 64, 128>}, {pipeline_mode = #tpu.pipeline_mode<synchronous>, transform_indices = @transform_7, window_bounds = array<i64: 1, 128>}, {pipeline_mode = #tpu.pipeline_mode<synchronous>, transform_indices = @transform_8, window_bounds = array<i64: 128, 512>}, {pipeline_mode = #tpu.pipeline_mode<synchronous>, transform_indices = @transform_9, window_bounds = array<i64: 1, 512>}, {pipeline_mode = #tpu.pipeline_mode<synchronous>, transform_indices = @transform_10, window_bounds = array<i64: 512, 1280>}, {pipeline_mode = #tpu.pipeline_mode<synchronous>, transform_indices = @transform_11, window_bounds = array<i64: 1, 1280>}, {pipeline_mode = #tpu.pipeline_mode<synchronous>, transform_indices = @transform_12, window_bounds = array<i64: 5, 128, 128>}, {pipeline_mode = #tpu.pipeline_mode<synchronous>, transform_indices = @transform_13, window_bounds = array<i64: 5, 128>}, {pipeline_mode = #tpu.pipeline_mode<synchronous>, transform_indices = @transform_14, window_bounds = array<i64: 5, 128, 128>}, {pipeline_mode = #tpu.pipeline_mode<synchronous>, transform_indices = @transform_15, window_bounds = array<i64: 5, 128>}, {pipeline_mode = #tpu.pipeline_mode<synchronous>, transform_indices = @transform_16, window_bounds = array<i64: 5, 128>}, {pipeline_mode = #tpu.pipeline_mode<synchronous>, transform_indices = @transform_17, window_bounds = array<i64: 5, 128>}, {pipeline_mode = #tpu.pipeline_mode<synchronous>, transform_indices = @transform_18, window_bounds = array<i64: 128, 128>}, {pipeline_mode = #tpu.pipeline_mode<synchronous>, transform_indices = @transform_19, window_bounds = array<i64: 1, 128>}, {transform_indices = @transform_20, window_bounds = array<i64: 8, 8>}]} {
    %c0 = arith.constant 0 : index
    %c0_0 = arith.constant 0 : index
    %0 = vector.load %arg1[%c0, %c0_0] : memref<8x8xf32, #tpu.memory_space<vmem>>, vector<8x8xf32>
    %1 = vector.extract_strided_slice %0 {offsets = [0, 0], sizes = [8, 1], strides = [1, 1]} : vector<8x8xf32> to vector<8x1xf32>
    %2 = vector.extract_strided_slice %0 {offsets = [0, 1], sizes = [8, 1], strides = [1, 1]} : vector<8x8xf32> to vector<8x1xf32>
    %3 = vector.extract_strided_slice %0 {offsets = [0, 2], sizes = [8, 1], strides = [1, 1]} : vector<8x8xf32> to vector<8x1xf32>
    %cst = arith.constant 1.000000e+03 : f32
    %4 = vector.broadcast %cst : f32 to vector<8x1xf32>
    %5 = arith.mulf %3, %4 : vector<8x1xf32>
    %c0_1 = arith.constant 0 : index
    %c0_2 = arith.constant 0 : index
    %6 = vector.load %arg2[%c0_1, %c0_2] : memref<1x64xf32, #tpu.memory_space<vmem>>, vector<1x64xf32>
    %7 = vector.broadcast %5 : vector<8x1xf32> to vector<8x64xf32>
    %8 = vector.broadcast %6 : vector<1x64xf32> to vector<8x64xf32>
    %9 = arith.mulf %7, %8 : vector<8x64xf32>
    %10 = math.sin %9 : vector<8x64xf32>
    %11 = arith.truncf %10 : vector<8x64xf32> to vector<8x64xbf16>
    %12 = math.cos %9 : vector<8x64xf32>
    %13 = arith.truncf %12 : vector<8x64xf32> to vector<8x64xbf16>
    %c0_3 = arith.constant 0 : index
    %c0_4 = arith.constant 0 : index
    %14 = vector.load %arg6[%c0_3, %c0_4] : memref<64x128xbf16, #tpu.memory_space<vmem>>, vector<64x128xbf16>
    %cst_5 = arith.constant dense<0.000000e+00> : vector<8x128xf32>
    %15 = tpu.matmul %11, %14, %cst_5 {dimension_numbers = #tpu.dot_dimension_numbers<[1], [0], [0], [1], [0, 0, 1, 1], [], []>} : vector<8x64xbf16>, vector<64x128xbf16>, vector<8x128xf32> -> vector<8x128xf32>
    %c0_6 = arith.constant 0 : index
    %c0_7 = arith.constant 0 : index
    %16 = vector.load %arg7[%c0_6, %c0_7] : memref<64x128xbf16, #tpu.memory_space<vmem>>, vector<64x128xbf16>
    %cst_8 = arith.constant dense<0.000000e+00> : vector<8x128xf32>
    %17 = tpu.matmul %13, %16, %cst_8 {dimension_numbers = #tpu.dot_dimension_numbers<[1], [0], [0], [1], [0, 0, 1, 1], [], []>} : vector<8x64xbf16>, vector<64x128xbf16>, vector<8x128xf32> -> vector<8x128xf32>
    %18 = arith.addf %15, %17 : vector<8x128xf32>
    %c0_9 = arith.constant 0 : index
    %c0_10 = arith.constant 0 : index
    %19 = vector.load %arg8[%c0_9, %c0_10] : memref<1x128xf32, #tpu.memory_space<vmem>>, vector<1x128xf32>
    %20 = vector.broadcast %19 : vector<1x128xf32> to vector<8x128xf32>
    %21 = arith.addf %18, %20 : vector<8x128xf32>
    %cst_11 = arith.constant 0.000000e+00 : f32
    %22 = vector.broadcast %cst_11 : f32 to vector<8x128xf32>
    %23 = arith.maximumf %21, %22 : vector<8x128xf32>
    %24 = arith.truncf %23 : vector<8x128xf32> to vector<8x128xbf16>
    %c0_12 = arith.constant 0 : index
    %c0_13 = arith.constant 0 : index
    %25 = vector.load %arg9[%c0_12, %c0_13] : memref<128x512xbf16, #tpu.memory_space<vmem>>, vector<128x512xbf16>
    %cst_14 = arith.constant dense<0.000000e+00> : vector<8x512xf32>
    %26 = tpu.matmul %24, %25, %cst_14 {dimension_numbers = #tpu.dot_dimension_numbers<[1], [0], [0], [1], [0, 0, 1, 1], [], []>} : vector<8x128xbf16>, vector<128x512xbf16>, vector<8x512xf32> -> vector<8x512xf32>
    %c0_15 = arith.constant 0 : index
    %c0_16 = arith.constant 0 : index
    %27 = vector.load %arg10[%c0_15, %c0_16] : memref<1x512xf32, #tpu.memory_space<vmem>>, vector<1x512xf32>
    %28 = vector.broadcast %27 : vector<1x512xf32> to vector<8x512xf32>
    %29 = arith.addf %26, %28 : vector<8x512xf32>
    %30 = arith.truncf %29 : vector<8x512xf32> to vector<8x512xbf16>
    %c0_17 = arith.constant 0 : index
    %c0_18 = arith.constant 0 : index
    %31 = vector.load %arg11[%c0_17, %c0_18] : memref<512x1280xbf16, #tpu.memory_space<vmem>>, vector<512x1280xbf16>
    %cst_19 = arith.constant dense<0.000000e+00> : vector<8x1280xf32>
    %32 = tpu.matmul %30, %31, %cst_19 {dimension_numbers = #tpu.dot_dimension_numbers<[1], [0], [0], [1], [0, 0, 1, 1], [], []>} : vector<8x512xbf16>, vector<512x1280xbf16>, vector<8x1280xf32> -> vector<8x1280xf32>
    %c0_20 = arith.constant 0 : index
    %c0_21 = arith.constant 0 : index
    %33 = vector.load %arg12[%c0_20, %c0_21] : memref<1x1280xf32, #tpu.memory_space<vmem>>, vector<1x1280xf32>
    %34 = vector.broadcast %33 : vector<1x1280xf32> to vector<8x1280xf32>
    %35 = arith.addf %32, %34 : vector<8x1280xf32>
    %c0_22 = arith.constant 0 : index
    %c0_23 = arith.constant 0 : index
    %36 = vector.load %arg3[%c0_22, %c0_23] : memref<1x128xf32, #tpu.memory_space<vmem>>, vector<1x128xf32>
    %37 = vector.broadcast %1 : vector<8x1xf32> to vector<8x128xf32>
    %38 = vector.broadcast %36 : vector<1x128xf32> to vector<8x128xf32>
    %39 = arith.mulf %37, %38 : vector<8x128xf32>
    %c0_24 = arith.constant 0 : index
    %c0_25 = arith.constant 0 : index
    %40 = vector.load %arg4[%c0_24, %c0_25] : memref<1x128xf32, #tpu.memory_space<vmem>>, vector<1x128xf32>
    %41 = vector.broadcast %2 : vector<8x1xf32> to vector<8x128xf32>
    %42 = vector.broadcast %40 : vector<1x128xf32> to vector<8x128xf32>
    %43 = arith.mulf %41, %42 : vector<8x128xf32>
    %44 = arith.addf %39, %43 : vector<8x128xf32>
    %c0_26 = arith.constant 0 : index
    %c0_27 = arith.constant 0 : index
    %45 = vector.load %arg5[%c0_26, %c0_27] : memref<1x128xf32, #tpu.memory_space<vmem>>, vector<1x128xf32>
    %46 = vector.broadcast %45 : vector<1x128xf32> to vector<8x128xf32>
    %47 = arith.addf %44, %46 : vector<8x128xf32>
    %48 = arith.truncf %47 : vector<8x128xf32> to vector<8x128xbf16>
    %c0_28 = arith.constant 0 : index
    %c0_29 = arith.constant 0 : index
    %c0_30 = arith.constant 0 : index
    %49 = vector.load %arg13[%c0_28, %c0_29, %c0_30] : memref<5x128x128xbf16, #tpu.memory_space<vmem>>, vector<1x128x128xbf16>
    %50 = vector.shape_cast %49 : vector<1x128x128xbf16> to vector<128x128xbf16>
    %cst_31 = arith.constant dense<0.000000e+00> : vector<8x128xf32>
    %51 = tpu.matmul %48, %50, %cst_31 {dimension_numbers = #tpu.dot_dimension_numbers<[1], [0], [0], [1], [0, 0, 1, 1], [], []>} : vector<8x128xbf16>, vector<128x128xbf16>, vector<8x128xf32> -> vector<8x128xf32>
    %c0_32 = arith.constant 0 : index
    %c0_33 = arith.constant 0 : index
    %52 = vector.load %arg14[%c0_32, %c0_33] : memref<5x128xf32, #tpu.memory_space<vmem>>, vector<1x128xf32>
    %53 = vector.broadcast %52 : vector<1x128xf32> to vector<8x128xf32>
    %54 = arith.addf %51, %53 : vector<8x128xf32>
    %cst_34 = arith.constant 0.000000e+00 : f32
    %55 = vector.broadcast %cst_34 : f32 to vector<8x128xf32>
    %56 = arith.maximumf %54, %55 : vector<8x128xf32>
    %57 = arith.truncf %56 : vector<8x128xf32> to vector<8x128xbf16>
    %c0_35 = arith.constant 0 : index
    %c0_36 = arith.constant 0 : index
    %c0_37 = arith.constant 0 : index
    %58 = vector.load %arg15[%c0_35, %c0_36, %c0_37] : memref<5x128x128xbf16, #tpu.memory_space<vmem>>, vector<1x128x128xbf16>
    %59 = vector.shape_cast %58 : vector<1x128x128xbf16> to vector<128x128xbf16>
    %cst_38 = arith.constant dense<0.000000e+00> : vector<8x128xf32>
    %60 = tpu.matmul %57, %59, %cst_38 {dimension_numbers = #tpu.dot_dimension_numbers<[1], [0], [0], [1], [0, 0, 1, 1], [], []>} : vector<8x128xbf16>, vector<128x128xbf16>, vector<8x128xf32> -> vector<8x128xf32>
    %c0_39 = arith.constant 0 : index
    %c0_40 = arith.constant 0 : index
    %61 = vector.load %arg16[%c0_39, %c0_40] : memref<5x128xf32, #tpu.memory_space<vmem>>, vector<1x128xf32>
    %62 = vector.broadcast %61 : vector<1x128xf32> to vector<8x128xf32>
    %63 = arith.addf %60, %62 : vector<8x128xf32>
    %64 = arith.addf %47, %63 : vector<8x128xf32>
    %cst_41 = arith.constant dense<0.000000e+00> : vector<8xf32>
    %65 = vector.multi_reduction <add>, %64, %cst_41 [1] : vector<8x128xf32> to vector<8xf32>
    %66 = vector.shape_cast %65 : vector<8xf32> to vector<8x1xf32>
    %67 = arith.mulf %64, %64 : vector<8x128xf32>
    %cst_42 = arith.constant dense<0.000000e+00> : vector<8xf32>
    %68 = vector.multi_reduction <add>, %67, %cst_42 [1] : vector<8x128xf32> to vector<8xf32>
    %69 = vector.shape_cast %68 : vector<8xf32> to vector<8x1xf32>
    %cst_43 = arith.constant 0.00806451589 : f32
    %70 = vector.broadcast %cst_43 : f32 to vector<8x1xf32>
    %71 = arith.mulf %66, %70 : vector<8x1xf32>
    %cst_44 = arith.constant 0.00806451589 : f32
    %72 = vector.broadcast %cst_44 : f32 to vector<8x1xf32>
    %73 = arith.mulf %69, %72 : vector<8x1xf32>
    %74 = arith.mulf %71, %71 : vector<8x1xf32>
    %75 = arith.subf %73, %74 : vector<8x1xf32>
    %76 = vector.broadcast %71 : vector<8x1xf32> to vector<8x128xf32>
    %77 = arith.subf %64, %76 : vector<8x128xf32>
    %cst_45 = arith.constant 9.99999974E-6 : f32
    %78 = vector.broadcast %cst_45 : f32 to vector<8x1xf32>
    %79 = arith.addf %75, %78 : vector<8x1xf32>
    %80 = math.rsqrt %79 : vector<8x1xf32>
    %81 = vector.broadcast %80 : vector<8x1xf32> to vector<8x128xf32>
    %82 = arith.mulf %77, %81 : vector<8x128xf32>
    %c0_46 = arith.constant 0 : index
    %c0_47 = arith.constant 0 : index
    %83 = vector.load %arg17[%c0_46, %c0_47] : memref<5x128xf32, #tpu.memory_space<vmem>>, vector<1x128xf32>
    %84 = vector.broadcast %83 : vector<1x128xf32> to vector<8x128xf32>
    %85 = arith.mulf %82, %84 : vector<8x128xf32>
    %c0_48 = arith.constant 0 : index
    %c0_49 = arith.constant 0 : index
    %86 = vector.load %arg18[%c0_48, %c0_49] : memref<5x128xf32, #tpu.memory_space<vmem>>, vector<1x128xf32>
    %87 = vector.broadcast %86 : vector<1x128xf32> to vector<8x128xf32>
    %88 = arith.addf %85, %87 : vector<8x128xf32>
    %89 = vector.extract_strided_slice %35 {offsets = [0, 0], sizes = [8, 128], strides = [1, 1]} : vector<8x1280xf32> to vector<8x128xf32>
    %90 = vector.extract_strided_slice %35 {offsets = [0, 128], sizes = [8, 128], strides = [1, 1]} : vector<8x1280xf32> to vector<8x128xf32>
    %91 = arith.mulf %89, %88 : vector<8x128xf32>
    %92 = arith.addf %91, %90 : vector<8x128xf32>
    %93 = arith.truncf %92 : vector<8x128xf32> to vector<8x128xbf16>
    %c1 = arith.constant 1 : index
    %c0_50 = arith.constant 0 : index
    %c0_51 = arith.constant 0 : index
    %94 = vector.load %arg13[%c1, %c0_50, %c0_51] : memref<5x128x128xbf16, #tpu.memory_space<vmem>>, vector<1x128x128xbf16>
    %95 = vector.shape_cast %94 : vector<1x128x128xbf16> to vector<128x128xbf16>
    %cst_52 = arith.constant dense<0.000000e+00> : vector<8x128xf32>
    %96 = tpu.matmul %93, %95, %cst_52 {dimension_numbers = #tpu.dot_dimension_numbers<[1], [0], [0], [1], [0, 0, 1, 1], [], []>} : vector<8x128xbf16>, vector<128x128xbf16>, vector<8x128xf32> -> vector<8x128xf32>
    %c1_53 = arith.constant 1 : index
    %c0_54 = arith.constant 0 : index
    %97 = vector.load %arg14[%c1_53, %c0_54] : memref<5x128xf32, #tpu.memory_space<vmem>>, vector<1x128xf32>
    %98 = vector.broadcast %97 : vector<1x128xf32> to vector<8x128xf32>
    %99 = arith.addf %96, %98 : vector<8x128xf32>
    %cst_55 = arith.constant 0.000000e+00 : f32
    %100 = vector.broadcast %cst_55 : f32 to vector<8x128xf32>
    %101 = arith.maximumf %99, %100 : vector<8x128xf32>
    %102 = arith.truncf %101 : vector<8x128xf32> to vector<8x128xbf16>
    %c1_56 = arith.constant 1 : index
    %c0_57 = arith.constant 0 : index
    %c0_58 = arith.constant 0 : index
    %103 = vector.load %arg15[%c1_56, %c0_57, %c0_58] : memref<5x128x128xbf16, #tpu.memory_space<vmem>>, vector<1x128x128xbf16>
    %104 = vector.shape_cast %103 : vector<1x128x128xbf16> to vector<128x128xbf16>
    %cst_59 = arith.constant dense<0.000000e+00> : vector<8x128xf32>
    %105 = tpu.matmul %102, %104, %cst_59 {dimension_numbers = #tpu.dot_dimension_numbers<[1], [0], [0], [1], [0, 0, 1, 1], [], []>} : vector<8x128xbf16>, vector<128x128xbf16>, vector<8x128xf32> -> vector<8x128xf32>
    %c1_60 = arith.constant 1 : index
    %c0_61 = arith.constant 0 : index
    %106 = vector.load %arg16[%c1_60, %c0_61] : memref<5x128xf32, #tpu.memory_space<vmem>>, vector<1x128xf32>
    %107 = vector.broadcast %106 : vector<1x128xf32> to vector<8x128xf32>
    %108 = arith.addf %105, %107 : vector<8x128xf32>
    %109 = arith.addf %92, %108 : vector<8x128xf32>
    %cst_62 = arith.constant dense<0.000000e+00> : vector<8xf32>
    %110 = vector.multi_reduction <add>, %109, %cst_62 [1] : vector<8x128xf32> to vector<8xf32>
    %111 = vector.shape_cast %110 : vector<8xf32> to vector<8x1xf32>
    %112 = arith.mulf %109, %109 : vector<8x128xf32>
    %cst_63 = arith.constant dense<0.000000e+00> : vector<8xf32>
    %113 = vector.multi_reduction <add>, %112, %cst_63 [1] : vector<8x128xf32> to vector<8xf32>
    %114 = vector.shape_cast %113 : vector<8xf32> to vector<8x1xf32>
    %cst_64 = arith.constant 0.00806451589 : f32
    %115 = vector.broadcast %cst_64 : f32 to vector<8x1xf32>
    %116 = arith.mulf %111, %115 : vector<8x1xf32>
    %cst_65 = arith.constant 0.00806451589 : f32
    %117 = vector.broadcast %cst_65 : f32 to vector<8x1xf32>
    %118 = arith.mulf %114, %117 : vector<8x1xf32>
    %119 = arith.mulf %116, %116 : vector<8x1xf32>
    %120 = arith.subf %118, %119 : vector<8x1xf32>
    %121 = vector.broadcast %116 : vector<8x1xf32> to vector<8x128xf32>
    %122 = arith.subf %109, %121 : vector<8x128xf32>
    %cst_66 = arith.constant 9.99999974E-6 : f32
    %123 = vector.broadcast %cst_66 : f32 to vector<8x1xf32>
    %124 = arith.addf %120, %123 : vector<8x1xf32>
    %125 = math.rsqrt %124 : vector<8x1xf32>
    %126 = vector.broadcast %125 : vector<8x1xf32> to vector<8x128xf32>
    %127 = arith.mulf %122, %126 : vector<8x128xf32>
    %c1_67 = arith.constant 1 : index
    %c0_68 = arith.constant 0 : index
    %128 = vector.load %arg17[%c1_67, %c0_68] : memref<5x128xf32, #tpu.memory_space<vmem>>, vector<1x128xf32>
    %129 = vector.broadcast %128 : vector<1x128xf32> to vector<8x128xf32>
    %130 = arith.mulf %127, %129 : vector<8x128xf32>
    %c1_69 = arith.constant 1 : index
    %c0_70 = arith.constant 0 : index
    %131 = vector.load %arg18[%c1_69, %c0_70] : memref<5x128xf32, #tpu.memory_space<vmem>>, vector<1x128xf32>
    %132 = vector.broadcast %131 : vector<1x128xf32> to vector<8x128xf32>
    %133 = arith.addf %130, %132 : vector<8x128xf32>
    %134 = vector.extract_strided_slice %35 {offsets = [0, 256], sizes = [8, 128], strides = [1, 1]} : vector<8x1280xf32> to vector<8x128xf32>
    %135 = vector.extract_strided_slice %35 {offsets = [0, 384], sizes = [8, 128], strides = [1, 1]} : vector<8x1280xf32> to vector<8x128xf32>
    %136 = arith.mulf %134, %133 : vector<8x128xf32>
    %137 = arith.addf %136, %135 : vector<8x128xf32>
    %138 = arith.truncf %137 : vector<8x128xf32> to vector<8x128xbf16>
    %c2 = arith.constant 2 : index
    %c0_71 = arith.constant 0 : index
    %c0_72 = arith.constant 0 : index
    %139 = vector.load %arg13[%c2, %c0_71, %c0_72] : memref<5x128x128xbf16, #tpu.memory_space<vmem>>, vector<1x128x128xbf16>
    %140 = vector.shape_cast %139 : vector<1x128x128xbf16> to vector<128x128xbf16>
    %cst_73 = arith.constant dense<0.000000e+00> : vector<8x128xf32>
    %141 = tpu.matmul %138, %140, %cst_73 {dimension_numbers = #tpu.dot_dimension_numbers<[1], [0], [0], [1], [0, 0, 1, 1], [], []>} : vector<8x128xbf16>, vector<128x128xbf16>, vector<8x128xf32> -> vector<8x128xf32>
    %c2_74 = arith.constant 2 : index
    %c0_75 = arith.constant 0 : index
    %142 = vector.load %arg14[%c2_74, %c0_75] : memref<5x128xf32, #tpu.memory_space<vmem>>, vector<1x128xf32>
    %143 = vector.broadcast %142 : vector<1x128xf32> to vector<8x128xf32>
    %144 = arith.addf %141, %143 : vector<8x128xf32>
    %cst_76 = arith.constant 0.000000e+00 : f32
    %145 = vector.broadcast %cst_76 : f32 to vector<8x128xf32>
    %146 = arith.maximumf %144, %145 : vector<8x128xf32>
    %147 = arith.truncf %146 : vector<8x128xf32> to vector<8x128xbf16>
    %c2_77 = arith.constant 2 : index
    %c0_78 = arith.constant 0 : index
    %c0_79 = arith.constant 0 : index
    %148 = vector.load %arg15[%c2_77, %c0_78, %c0_79] : memref<5x128x128xbf16, #tpu.memory_space<vmem>>, vector<1x128x128xbf16>
    %149 = vector.shape_cast %148 : vector<1x128x128xbf16> to vector<128x128xbf16>
    %cst_80 = arith.constant dense<0.000000e+00> : vector<8x128xf32>
    %150 = tpu.matmul %147, %149, %cst_80 {dimension_numbers = #tpu.dot_dimension_numbers<[1], [0], [0], [1], [0, 0, 1, 1], [], []>} : vector<8x128xbf16>, vector<128x128xbf16>, vector<8x128xf32> -> vector<8x128xf32>
    %c2_81 = arith.constant 2 : index
    %c0_82 = arith.constant 0 : index
    %151 = vector.load %arg16[%c2_81, %c0_82] : memref<5x128xf32, #tpu.memory_space<vmem>>, vector<1x128xf32>
    %152 = vector.broadcast %151 : vector<1x128xf32> to vector<8x128xf32>
    %153 = arith.addf %150, %152 : vector<8x128xf32>
    %154 = arith.addf %137, %153 : vector<8x128xf32>
    %cst_83 = arith.constant dense<0.000000e+00> : vector<8xf32>
    %155 = vector.multi_reduction <add>, %154, %cst_83 [1] : vector<8x128xf32> to vector<8xf32>
    %156 = vector.shape_cast %155 : vector<8xf32> to vector<8x1xf32>
    %157 = arith.mulf %154, %154 : vector<8x128xf32>
    %cst_84 = arith.constant dense<0.000000e+00> : vector<8xf32>
    %158 = vector.multi_reduction <add>, %157, %cst_84 [1] : vector<8x128xf32> to vector<8xf32>
    %159 = vector.shape_cast %158 : vector<8xf32> to vector<8x1xf32>
    %cst_85 = arith.constant 0.00806451589 : f32
    %160 = vector.broadcast %cst_85 : f32 to vector<8x1xf32>
    %161 = arith.mulf %156, %160 : vector<8x1xf32>
    %cst_86 = arith.constant 0.00806451589 : f32
    %162 = vector.broadcast %cst_86 : f32 to vector<8x1xf32>
    %163 = arith.mulf %159, %162 : vector<8x1xf32>
    %164 = arith.mulf %161, %161 : vector<8x1xf32>
    %165 = arith.subf %163, %164 : vector<8x1xf32>
    %166 = vector.broadcast %161 : vector<8x1xf32> to vector<8x128xf32>
    %167 = arith.subf %154, %166 : vector<8x128xf32>
    %cst_87 = arith.constant 9.99999974E-6 : f32
    %168 = vector.broadcast %cst_87 : f32 to vector<8x1xf32>
    %169 = arith.addf %165, %168 : vector<8x1xf32>
    %170 = math.rsqrt %169 : vector<8x1xf32>
    %171 = vector.broadcast %170 : vector<8x1xf32> to vector<8x128xf32>
    %172 = arith.mulf %167, %171 : vector<8x128xf32>
    %c2_88 = arith.constant 2 : index
    %c0_89 = arith.constant 0 : index
    %173 = vector.load %arg17[%c2_88, %c0_89] : memref<5x128xf32, #tpu.memory_space<vmem>>, vector<1x128xf32>
    %174 = vector.broadcast %173 : vector<1x128xf32> to vector<8x128xf32>
    %175 = arith.mulf %172, %174 : vector<8x128xf32>
    %c2_90 = arith.constant 2 : index
    %c0_91 = arith.constant 0 : index
    %176 = vector.load %arg18[%c2_90, %c0_91] : memref<5x128xf32, #tpu.memory_space<vmem>>, vector<1x128xf32>
    %177 = vector.broadcast %176 : vector<1x128xf32> to vector<8x128xf32>
    %178 = arith.addf %175, %177 : vector<8x128xf32>
    %179 = vector.extract_strided_slice %35 {offsets = [0, 512], sizes = [8, 128], strides = [1, 1]} : vector<8x1280xf32> to vector<8x128xf32>
    %180 = vector.extract_strided_slice %35 {offsets = [0, 640], sizes = [8, 128], strides = [1, 1]} : vector<8x1280xf32> to vector<8x128xf32>
    %181 = arith.mulf %179, %178 : vector<8x128xf32>
    %182 = arith.addf %181, %180 : vector<8x128xf32>
    %183 = arith.truncf %182 : vector<8x128xf32> to vector<8x128xbf16>
    %c3 = arith.constant 3 : index
    %c0_92 = arith.constant 0 : index
    %c0_93 = arith.constant 0 : index
    %184 = vector.load %arg13[%c3, %c0_92, %c0_93] : memref<5x128x128xbf16, #tpu.memory_space<vmem>>, vector<1x128x128xbf16>
    %185 = vector.shape_cast %184 : vector<1x128x128xbf16> to vector<128x128xbf16>
    %cst_94 = arith.constant dense<0.000000e+00> : vector<8x128xf32>
    %186 = tpu.matmul %183, %185, %cst_94 {dimension_numbers = #tpu.dot_dimension_numbers<[1], [0], [0], [1], [0, 0, 1, 1], [], []>} : vector<8x128xbf16>, vector<128x128xbf16>, vector<8x128xf32> -> vector<8x128xf32>
    %c3_95 = arith.constant 3 : index
    %c0_96 = arith.constant 0 : index
    %187 = vector.load %arg14[%c3_95, %c0_96] : memref<5x128xf32, #tpu.memory_space<vmem>>, vector<1x128xf32>
    %188 = vector.broadcast %187 : vector<1x128xf32> to vector<8x128xf32>
    %189 = arith.addf %186, %188 : vector<8x128xf32>
    %cst_97 = arith.constant 0.000000e+00 : f32
    %190 = vector.broadcast %cst_97 : f32 to vector<8x128xf32>
    %191 = arith.maximumf %189, %190 : vector<8x128xf32>
    %192 = arith.truncf %191 : vector<8x128xf32> to vector<8x128xbf16>
    %c3_98 = arith.constant 3 : index
    %c0_99 = arith.constant 0 : index
    %c0_100 = arith.constant 0 : index
    %193 = vector.load %arg15[%c3_98, %c0_99, %c0_100] : memref<5x128x128xbf16, #tpu.memory_space<vmem>>, vector<1x128x128xbf16>
    %194 = vector.shape_cast %193 : vector<1x128x128xbf16> to vector<128x128xbf16>
    %cst_101 = arith.constant dense<0.000000e+00> : vector<8x128xf32>
    %195 = tpu.matmul %192, %194, %cst_101 {dimension_numbers = #tpu.dot_dimension_numbers<[1], [0], [0], [1], [0, 0, 1, 1], [], []>} : vector<8x128xbf16>, vector<128x128xbf16>, vector<8x128xf32> -> vector<8x128xf32>
    %c3_102 = arith.constant 3 : index
    %c0_103 = arith.constant 0 : index
    %196 = vector.load %arg16[%c3_102, %c0_103] : memref<5x128xf32, #tpu.memory_space<vmem>>, vector<1x128xf32>
    %197 = vector.broadcast %196 : vector<1x128xf32> to vector<8x128xf32>
    %198 = arith.addf %195, %197 : vector<8x128xf32>
    %199 = arith.addf %182, %198 : vector<8x128xf32>
    %cst_104 = arith.constant dense<0.000000e+00> : vector<8xf32>
    %200 = vector.multi_reduction <add>, %199, %cst_104 [1] : vector<8x128xf32> to vector<8xf32>
    %201 = vector.shape_cast %200 : vector<8xf32> to vector<8x1xf32>
    %202 = arith.mulf %199, %199 : vector<8x128xf32>
    %cst_105 = arith.constant dense<0.000000e+00> : vector<8xf32>
    %203 = vector.multi_reduction <add>, %202, %cst_105 [1] : vector<8x128xf32> to vector<8xf32>
    %204 = vector.shape_cast %203 : vector<8xf32> to vector<8x1xf32>
    %cst_106 = arith.constant 0.00806451589 : f32
    %205 = vector.broadcast %cst_106 : f32 to vector<8x1xf32>
    %206 = arith.mulf %201, %205 : vector<8x1xf32>
    %cst_107 = arith.constant 0.00806451589 : f32
    %207 = vector.broadcast %cst_107 : f32 to vector<8x1xf32>
    %208 = arith.mulf %204, %207 : vector<8x1xf32>
    %209 = arith.mulf %206, %206 : vector<8x1xf32>
    %210 = arith.subf %208, %209 : vector<8x1xf32>
    %211 = vector.broadcast %206 : vector<8x1xf32> to vector<8x128xf32>
    %212 = arith.subf %199, %211 : vector<8x128xf32>
    %cst_108 = arith.constant 9.99999974E-6 : f32
    %213 = vector.broadcast %cst_108 : f32 to vector<8x1xf32>
    %214 = arith.addf %210, %213 : vector<8x1xf32>
    %215 = math.rsqrt %214 : vector<8x1xf32>
    %216 = vector.broadcast %215 : vector<8x1xf32> to vector<8x128xf32>
    %217 = arith.mulf %212, %216 : vector<8x128xf32>
    %c3_109 = arith.constant 3 : index
    %c0_110 = arith.constant 0 : index
    %218 = vector.load %arg17[%c3_109, %c0_110] : memref<5x128xf32, #tpu.memory_space<vmem>>, vector<1x128xf32>
    %219 = vector.broadcast %218 : vector<1x128xf32> to vector<8x128xf32>
    %220 = arith.mulf %217, %219 : vector<8x128xf32>
    %c3_111 = arith.constant 3 : index
    %c0_112 = arith.constant 0 : index
    %221 = vector.load %arg18[%c3_111, %c0_112] : memref<5x128xf32, #tpu.memory_space<vmem>>, vector<1x128xf32>
    %222 = vector.broadcast %221 : vector<1x128xf32> to vector<8x128xf32>
    %223 = arith.addf %220, %222 : vector<8x128xf32>
    %224 = vector.extract_strided_slice %35 {offsets = [0, 768], sizes = [8, 128], strides = [1, 1]} : vector<8x1280xf32> to vector<8x128xf32>
    %225 = vector.extract_strided_slice %35 {offsets = [0, 896], sizes = [8, 128], strides = [1, 1]} : vector<8x1280xf32> to vector<8x128xf32>
    %226 = arith.mulf %224, %223 : vector<8x128xf32>
    %227 = arith.addf %226, %225 : vector<8x128xf32>
    %228 = arith.truncf %227 : vector<8x128xf32> to vector<8x128xbf16>
    %c4 = arith.constant 4 : index
    %c0_113 = arith.constant 0 : index
    %c0_114 = arith.constant 0 : index
    %229 = vector.load %arg13[%c4, %c0_113, %c0_114] : memref<5x128x128xbf16, #tpu.memory_space<vmem>>, vector<1x128x128xbf16>
    %230 = vector.shape_cast %229 : vector<1x128x128xbf16> to vector<128x128xbf16>
    %cst_115 = arith.constant dense<0.000000e+00> : vector<8x128xf32>
    %231 = tpu.matmul %228, %230, %cst_115 {dimension_numbers = #tpu.dot_dimension_numbers<[1], [0], [0], [1], [0, 0, 1, 1], [], []>} : vector<8x128xbf16>, vector<128x128xbf16>, vector<8x128xf32> -> vector<8x128xf32>
    %c4_116 = arith.constant 4 : index
    %c0_117 = arith.constant 0 : index
    %232 = vector.load %arg14[%c4_116, %c0_117] : memref<5x128xf32, #tpu.memory_space<vmem>>, vector<1x128xf32>
    %233 = vector.broadcast %232 : vector<1x128xf32> to vector<8x128xf32>
    %234 = arith.addf %231, %233 : vector<8x128xf32>
    %cst_118 = arith.constant 0.000000e+00 : f32
    %235 = vector.broadcast %cst_118 : f32 to vector<8x128xf32>
    %236 = arith.maximumf %234, %235 : vector<8x128xf32>
    %237 = arith.truncf %236 : vector<8x128xf32> to vector<8x128xbf16>
    %c4_119 = arith.constant 4 : index
    %c0_120 = arith.constant 0 : index
    %c0_121 = arith.constant 0 : index
    %238 = vector.load %arg15[%c4_119, %c0_120, %c0_121] : memref<5x128x128xbf16, #tpu.memory_space<vmem>>, vector<1x128x128xbf16>
    %239 = vector.shape_cast %238 : vector<1x128x128xbf16> to vector<128x128xbf16>
    %cst_122 = arith.constant dense<0.000000e+00> : vector<8x128xf32>
    %240 = tpu.matmul %237, %239, %cst_122 {dimension_numbers = #tpu.dot_dimension_numbers<[1], [0], [0], [1], [0, 0, 1, 1], [], []>} : vector<8x128xbf16>, vector<128x128xbf16>, vector<8x128xf32> -> vector<8x128xf32>
    %c4_123 = arith.constant 4 : index
    %c0_124 = arith.constant 0 : index
    %241 = vector.load %arg16[%c4_123, %c0_124] : memref<5x128xf32, #tpu.memory_space<vmem>>, vector<1x128xf32>
    %242 = vector.broadcast %241 : vector<1x128xf32> to vector<8x128xf32>
    %243 = arith.addf %240, %242 : vector<8x128xf32>
    %244 = arith.addf %227, %243 : vector<8x128xf32>
    %cst_125 = arith.constant dense<0.000000e+00> : vector<8xf32>
    %245 = vector.multi_reduction <add>, %244, %cst_125 [1] : vector<8x128xf32> to vector<8xf32>
    %246 = vector.shape_cast %245 : vector<8xf32> to vector<8x1xf32>
    %247 = arith.mulf %244, %244 : vector<8x128xf32>
    %cst_126 = arith.constant dense<0.000000e+00> : vector<8xf32>
    %248 = vector.multi_reduction <add>, %247, %cst_126 [1] : vector<8x128xf32> to vector<8xf32>
    %249 = vector.shape_cast %248 : vector<8xf32> to vector<8x1xf32>
    %cst_127 = arith.constant 0.00806451589 : f32
    %250 = vector.broadcast %cst_127 : f32 to vector<8x1xf32>
    %251 = arith.mulf %246, %250 : vector<8x1xf32>
    %cst_128 = arith.constant 0.00806451589 : f32
    %252 = vector.broadcast %cst_128 : f32 to vector<8x1xf32>
    %253 = arith.mulf %249, %252 : vector<8x1xf32>
    %254 = arith.mulf %251, %251 : vector<8x1xf32>
    %255 = arith.subf %253, %254 : vector<8x1xf32>
    %256 = vector.broadcast %251 : vector<8x1xf32> to vector<8x128xf32>
    %257 = arith.subf %244, %256 : vector<8x128xf32>
    %cst_129 = arith.constant 9.99999974E-6 : f32
    %258 = vector.broadcast %cst_129 : f32 to vector<8x1xf32>
    %259 = arith.addf %255, %258 : vector<8x1xf32>
    %260 = math.rsqrt %259 : vector<8x1xf32>
    %261 = vector.broadcast %260 : vector<8x1xf32> to vector<8x128xf32>
    %262 = arith.mulf %257, %261 : vector<8x128xf32>
    %c4_130 = arith.constant 4 : index
    %c0_131 = arith.constant 0 : index
    %263 = vector.load %arg17[%c4_130, %c0_131] : memref<5x128xf32, #tpu.memory_space<vmem>>, vector<1x128xf32>
    %264 = vector.broadcast %263 : vector<1x128xf32> to vector<8x128xf32>
    %265 = arith.mulf %262, %264 : vector<8x128xf32>
    %c4_132 = arith.constant 4 : index
    %c0_133 = arith.constant 0 : index
    %266 = vector.load %arg18[%c4_132, %c0_133] : memref<5x128xf32, #tpu.memory_space<vmem>>, vector<1x128xf32>
    %267 = vector.broadcast %266 : vector<1x128xf32> to vector<8x128xf32>
    %268 = arith.addf %265, %267 : vector<8x128xf32>
    %269 = vector.extract_strided_slice %35 {offsets = [0, 1024], sizes = [8, 128], strides = [1, 1]} : vector<8x1280xf32> to vector<8x128xf32>
    %270 = vector.extract_strided_slice %35 {offsets = [0, 1152], sizes = [8, 128], strides = [1, 1]} : vector<8x1280xf32> to vector<8x128xf32>
    %271 = arith.mulf %269, %268 : vector<8x128xf32>
    %272 = arith.addf %271, %270 : vector<8x128xf32>
    %273 = arith.truncf %272 : vector<8x128xf32> to vector<8x128xbf16>
    %c0_134 = arith.constant 0 : index
    %c0_135 = arith.constant 0 : index
    %274 = vector.load %arg19[%c0_134, %c0_135] : memref<128x128xbf16, #tpu.memory_space<vmem>>, vector<128x128xbf16>
    %cst_136 = arith.constant dense<0.000000e+00> : vector<8x128xf32>
    %275 = tpu.matmul %273, %274, %cst_136 {dimension_numbers = #tpu.dot_dimension_numbers<[1], [0], [0], [1], [0, 0, 1, 1], [], []>} : vector<8x128xbf16>, vector<128x128xbf16>, vector<8x128xf32> -> vector<8x128xf32>
    %c0_137 = arith.constant 0 : index
    %c0_138 = arith.constant 0 : index
    %276 = vector.load %arg20[%c0_137, %c0_138] : memref<1x128xf32, #tpu.memory_space<vmem>>, vector<1x128xf32>
    %277 = vector.broadcast %276 : vector<1x128xf32> to vector<8x128xf32>
    %278 = arith.addf %275, %277 : vector<8x128xf32>
    %279 = vector.extract_strided_slice %278 {offsets = [0, 0], sizes = [8, 8], strides = [1, 1]} : vector<8x128xf32> to vector<8x8xf32>
    %c0_139 = arith.constant 0 : index
    %c0_140 = arith.constant 0 : index
    %280 = vector.load %arg21[%c0_139, %c0_140] : memref<8x8xf32, #tpu.memory_space<vmem>>, vector<8x8xf32>
    tpu.vector_store %arg21[%c0_139, %c0_140], %279 {strides = array<i32>} : memref<8x8xf32, #tpu.memory_space<vmem>>, vector<8x8xf32>,
    return
  }
  func.func @transform_0(%arg0: i32) -> (i32, i32) {
    %c0_i32 = arith.constant 0 : i32
    %c0_i32_0 = arith.constant 0 : i32
    return %arg0, %c0_i32 : i32, i32
  }
  func.func @transform_1(%arg0: i32) -> (i32, i32) {
    %c0_i32 = arith.constant 0 : i32
    %c0_i32_0 = arith.constant 0 : i32
    %c0_i32_1 = arith.constant 0 : i32
    return %c0_i32, %c0_i32_0 : i32, i32
  }
  func.func @transform_2(%arg0: i32) -> (i32, i32) {
    %c0_i32 = arith.constant 0 : i32
    %c0_i32_0 = arith.constant 0 : i32
    %c0_i32_1 = arith.constant 0 : i32
    return %c0_i32, %c0_i32_0 : i32, i32
  }
  func.func @transform_3(%arg0: i32) -> (i32, i32) {
    %c0_i32 = arith.constant 0 : i32
    %c0_i32_0 = arith.constant 0 : i32
    %c0_i32_1 = arith.constant 0 : i32
    return %c0_i32, %c0_i32_0 : i32, i32
  }
  func.func @transform_4(%arg0: i32) -> (i32, i32) {
    %c0_i32 = arith.constant 0 : i32
    %c0_i32_0 = arith.constant 0 : i32
    %c0_i32_1 = arith.constant 0 : i32
    return %c0_i32, %c0_i32_0 : i32, i32
  }
  func.func @transform_5(%arg0: i32) -> (i32, i32) {
    %c0_i32 = arith.constant 0 : i32
    %c0_i32_0 = arith.constant 0 : i32
    %c0_i32_1 = arith.constant 0 : i32
    return %c0_i32, %c0_i32_0 : i32, i32
  }
  func.func @transform_6(%arg0: i32) -> (i32, i32) {
    %c0_i32 = arith.constant 0 : i32
    %c0_i32_0 = arith.constant 0 : i32
    %c0_i32_1 = arith.constant 0 : i32
    return %c0_i32, %c0_i32_0 : i32, i32
  }
  func.func @transform_7(%arg0: i32) -> (i32, i32) {
    %c0_i32 = arith.constant 0 : i32
    %c0_i32_0 = arith.constant 0 : i32
    %c0_i32_1 = arith.constant 0 : i32
    return %c0_i32, %c0_i32_0 : i32, i32
  }
  func.func @transform_8(%arg0: i32) -> (i32, i32) {
    %c0_i32 = arith.constant 0 : i32
    %c0_i32_0 = arith.constant 0 : i32
    %c0_i32_1 = arith.constant 0 : i32
    return %c0_i32, %c0_i32_0 : i32, i32
  }
  func.func @transform_9(%arg0: i32) -> (i32, i32) {
    %c0_i32 = arith.constant 0 : i32
    %c0_i32_0 = arith.constant 0 : i32
    %c0_i32_1 = arith.constant 0 : i32
    return %c0_i32, %c0_i32_0 : i32, i32
  }
  func.func @transform_10(%arg0: i32) -> (i32, i32) {
    %c0_i32 = arith.constant 0 : i32
    %c0_i32_0 = arith.constant 0 : i32
    %c0_i32_1 = arith.constant 0 : i32
    return %c0_i32, %c0_i32_0 : i32, i32
  }
  func.func @transform_11(%arg0: i32) -> (i32, i32) {
    %c0_i32 = arith.constant 0 : i32
    %c0_i32_0 = arith.constant 0 : i32
    %c0_i32_1 = arith.constant 0 : i32
    return %c0_i32, %c0_i32_0 : i32, i32
  }
  func.func @transform_12(%arg0: i32) -> (i32, i32, i32) {
    %c0_i32 = arith.constant 0 : i32
    %c0_i32_0 = arith.constant 0 : i32
    %c0_i32_1 = arith.constant 0 : i32
    %c0_i32_2 = arith.constant 0 : i32
    return %c0_i32, %c0_i32_0, %c0_i32_1 : i32, i32, i32
  }
  func.func @transform_13(%arg0: i32) -> (i32, i32) {
    %c0_i32 = arith.constant 0 : i32
    %c0_i32_0 = arith.constant 0 : i32
    %c0_i32_1 = arith.constant 0 : i32
    return %c0_i32, %c0_i32_0 : i32, i32
  }
  func.func @transform_14(%arg0: i32) -> (i32, i32, i32) {
    %c0_i32 = arith.constant 0 : i32
    %c0_i32_0 = arith.constant 0 : i32
    %c0_i32_1 = arith.constant 0 : i32
    %c0_i32_2 = arith.constant 0 : i32
    return %c0_i32, %c0_i32_0, %c0_i32_1 : i32, i32, i32
  }
  func.func @transform_15(%arg0: i32) -> (i32, i32) {
    %c0_i32 = arith.constant 0 : i32
    %c0_i32_0 = arith.constant 0 : i32
    %c0_i32_1 = arith.constant 0 : i32
    return %c0_i32, %c0_i32_0 : i32, i32
  }
  func.func @transform_16(%arg0: i32) -> (i32, i32) {
    %c0_i32 = arith.constant 0 : i32
    %c0_i32_0 = arith.constant 0 : i32
    %c0_i32_1 = arith.constant 0 : i32
    return %c0_i32, %c0_i32_0 : i32, i32
  }
  func.func @transform_17(%arg0: i32) -> (i32, i32) {
    %c0_i32 = arith.constant 0 : i32
    %c0_i32_0 = arith.constant 0 : i32
    %c0_i32_1 = arith.constant 0 : i32
    return %c0_i32, %c0_i32_0 : i32, i32
  }
  func.func @transform_18(%arg0: i32) -> (i32, i32) {
    %c0_i32 = arith.constant 0 : i32
    %c0_i32_0 = arith.constant 0 : i32
    %c0_i32_1 = arith.constant 0 : i32
    return %c0_i32, %c0_i32_0 : i32, i32
  }
  func.func @transform_19(%arg0: i32) -> (i32, i32) {
    %c0_i32 = arith.constant 0 : i32
    %c0_i32_0 = arith.constant 0 : i32
    %c0_i32_1 = arith.constant 0 : i32
    return %c0_i32, %c0_i32_0 : i32, i32
  }
  func.func @transform_20(%arg0: i32) -> (i32, i32) {
    %c0_i32 = arith.constant 0 : i32
    %c0_i32_0 = arith.constant 0 : i32
    return %arg0, %c0_i32 : i32, i32
  }
}

</mosaic_0001>

<bundles_post_ra>
// kernel: residual_mlp_forward.1
= control target key start
LH: loop header
LB: loop body
LE: loop exit
PB: predicated region body
PF: predicated region fallthrough
CT: control target
= control target key end

     0   :  { %s7404_s0 = inlined_call_operand.vmem [shape: f32[8,8], index: 0, kind: input, shape index: {}]   ;;  %s7405_s1 = inlined_call_operand.hbm [shape: f32[1,64], index: 1, kind: input, shape index: {}]   ;;  %s7406_s2 = inlined_call_operand.hbm [shape: f32[1,128], index: 2, kind: input, shape index: {}]   ;;  %s7407_s3 = inlined_call_operand.hbm [shape: f32[1,128], index: 3, kind: input, shape index: {}]   ;;  %s7408_s4 = inlined_call_operand.hbm [shape: f32[1,128], index: 4, kind: input, shape index: {}]   ;;  %s7409_s5 = inlined_call_operand.hbm [shape: bf16[64,128], index: 5, kind: input, shape index: {}]   ;;  %s7410_s6 = inlined_call_operand.hbm [shape: bf16[64,128], index: 6, kind: input, shape index: {}]   ;;  %s7411_s7 = inlined_call_operand.hbm [shape: f32[1,128], index: 7, kind: input, shape index: {}]   ;;  %s7412_s8 = inlined_call_operand.hbm [shape: bf16[128,512], index: 8, kind: input, shape index: {}]   ;;  %s7413_s9 = inlined_call_operand.hbm [shape: f32[1,512], index: 9, kind: input, shape index: {}]   ;;  %s7414_s10 = inlined_call_operand.hbm [shape: bf16[512,1280], index: 10, kind: input, shape index: {}]   ;;  %s7415_s11 = inlined_call_operand.hbm [shape: f32[1,1280], index: 11, kind: input, shape index: {}]   ;;  %s7416_s12 = inlined_call_operand.hbm [shape: bf16[5,128,128], index: 12, kind: input, shape index: {}]   ;;  %s7417_s13 = inlined_call_operand.hbm [shape: f32[5,128], index: 13, kind: input, shape index: {}]   ;;  %s7418_s14 = inlined_call_operand.hbm [shape: bf16[5,128,128], index: 14, kind: input, shape index: {}]   ;;  %s7419_s15 = inlined_call_operand.hbm [shape: f32[5,128], index: 15, kind: input, shape index: {}]   ;;  %s7420_s16 = inlined_call_operand.hbm [shape: f32[5,128], index: 16, kind: input, shape index: {}]   ;;  %s7421_s17 = inlined_call_operand.hbm [shape: f32[5,128], index: 17, kind: input, shape index: {}]   ;;  %s7422_s18 = inlined_call_operand.hbm [shape: bf16[128,128], index: 18, kind: input, shape index: {}]   ;;  %s7423_s19 = inlined_call_operand.hbm [shape: f32[1,128], index: 19, kind: input, shape index: {}]   ;;  %s7424_s20 = inlined_call_operand.vmem [shape: f32[8,8], index: 20, kind: output, shape index: {}]  }
   0x1   :  { %7432 = sst [smem:[#allocation41_spill]] %s7404_s0 }
   0x2   :  { %7433 = sst [smem:[#allocation42_spill]] %s7405_s1 }
   0x3   :  { %7434 = sst [smem:[#allocation43_spill]] %s7406_s2 }
   0x4   :  { %7435 = sst [smem:[#allocation44_spill]] %s7407_s3 }
   0x5   :  { %7436 = sst [smem:[#allocation45_spill]] %s7408_s4 }
   0x6   :  { %25 = vsyncpa [#allocation3], 0 }
   0x7   :  { %26 = vsyncpa [#allocation5], 0 }
   0x8   :  { %27 = vsyncpa [#allocation8], 0 }
   0x9   :  { %28 = vsyncpa [#allocation11], 0 }
   0xa   :  { %29 = vsyncpa [#allocation14], 0 }
   0xb   :  { %30 = vsyncpa [#allocation17], 0 }
   0xc   :  { %31 = vsyncpa [#allocation20], 0 }
   0xd   :  { %32 = vsyncpa [#allocation23], 0 }
   0xe   :  { %33 = vsyncpa [#allocation26], 0 }
   0xf   :  { %34 = vsyncpa [#allocation29], 0  ;;  %s6741_s1 = smov [#allocation4]   ;;  %s6742_s23 = smov [#allocation7]  }
  0x10   :  { %s53_s22 = sshll.u32 %s6741_s1, 4  ;;  %s73_s24 = sshll.u32 %s6742_s23, 4  ;;  %s54_s22 = int_to_ptr.vmem [resolvable:$true] %s53_s22  ;;  %s74_s24 = int_to_ptr.vmem [resolvable:$true] %s73_s24 }
  0x11   :  { %s7437_s3 = sld [smem:[#allocation43_spill]] }
  0x17   :  { %s6303_s26 = scalar_lea.hbm %s7437_s3, 16 }
  0x18   :  { %p6304_p0 = scmp.ne.s32.totalorder %s7437_s3, %s6303_s26  ;;  %p6307_p1 = scmp.lt.u32.totalorder %s6303_s26, %s7437_s3 }
  0x1a   :  { %p6309_p2 = pnand %p6307_p1, %p6304_p0 }
  0x1c   :  { %6312 = shalt.err (!%p6309_p2)
}
  0x1d   :  { %s6313_s30 = scalar_lea.vmem %s54_s22, 16  ;;  %s6317_s0 = scalar_lea.vmem %s54_s22, 32 }
  0x1e   :  { %p6314_p3 = scmp.ne.s32.totalorder %s54_s22, %s6313_s30  ;;  %p6318_p4 = scmp.lt.s32.totalorder %s54_s22, %s54_s22 }
  0x1f   :  { %p6319_p5 = scmp.lt.s32.totalorder %s6317_s0, %s6313_s30 }
  0x21   :  { %p6320_p6 = por %p6319_p5, %p6318_p4 }
  0x23   :  { %p6321_p7 = pnand %p6320_p6, %p6314_p3 }
  0x25   :  { %6324 = shalt.err (!%p6321_p7)
}
  0x26   :  { %56 = dma.hbm_to_vmem [thread:$0]  %s7437_s3, 16, %s54_s22, [#allocation5]  }
  0x27   :  { %s7438_s25 = sld [smem:[#allocation45_spill]] }
  0x2d   :  { %s6325_s27 = scalar_lea.hbm %s7438_s25, 16 }
  0x2e   :  { %p6326_p8 = scmp.ne.s32.totalorder %s7438_s25, %s6325_s27  ;;  %p6329_p9 = scmp.lt.u32.totalorder %s6325_s27, %s7438_s25 }
  0x30   :  { %p6331_p10 = pnand %p6329_p9, %p6326_p8 }
  0x32   :  { %6334 = shalt.err (!%p6331_p10)
}
  0x33   :  { %s6335_s30 = scalar_lea.vmem %s74_s24, 16  ;;  %s6339_s0 = scalar_lea.vmem %s74_s24, 32 }
  0x34   :  { %p6336_p11 = scmp.ne.s32.totalorder %s74_s24, %s6335_s30  ;;  %p6340_p12 = scmp.lt.s32.totalorder %s74_s24, %s74_s24 }
  0x35   :  { %p6341_p13 = scmp.lt.s32.totalorder %s6339_s0, %s6335_s30 }
  0x37   :  { %p6342_p0 = por %p6341_p13, %p6340_p12 }
  0x39   :  { %p6343_p1 = pnand %p6342_p0, %p6336_p11 }
  0x3b   :  { %6346 = shalt.err (!%p6343_p1)
}
  0x3c   :  { %76 = dma.hbm_to_vmem [thread:$0]  %s7438_s25, 16, %s74_s24, [#allocation8]  }
  0x3d   :  { %s6743_s21 = smov [#allocation10]   ;;  %s6744_s23 = smov [#allocation13]  }
  0x3e   :  { %s94_s1 = sshll.u32 %s6743_s21, 4  ;;  %s116_s2 = sshll.u32 %s6744_s23, 4  ;;  %s95_s1 = int_to_ptr.vmem [resolvable:$true] %s94_s1  ;;  %s6906_s2 = int_to_ptr.vmem [resolvable:$true] %s116_s2 }
  0x3f   :  { %s6347_s26 = scalar_lea.hbm %s7410_s6, 512 }
  0x40   :  { %p6348_p2 = scmp.ne.s32.totalorder %s7410_s6, %s6347_s26  ;;  %p6351_p3 = scmp.lt.u32.totalorder %s6347_s26, %s7410_s6 }
  0x42   :  { %p6353_p4 = pnand %p6351_p3, %p6348_p2 }
  0x44   :  { %6356 = shalt.err (!%p6353_p4)
}
  0x45   :  { %s6357_s24 = scalar_lea.vmem %s95_s1, 512  ;;  %p6362_p6 = scmp.lt.s32.totalorder %s95_s1, %s95_s1 }
  0x46   :  { %p6358_p5 = scmp.ne.s32.totalorder %s95_s1, %s6357_s24  ;;  %p6363_p7 = scmp.lt.s32.totalorder %s6357_s24, %s6357_s24 }
  0x48   :  { %p6364_p8 = por %p6363_p7, %p6362_p6 }
  0x4a   :  { %p6365_p9 = pnand %p6364_p8, %p6358_p5 }
  0x4c   :  { %6368 = shalt.err (!%p6365_p9)
}
  0x4d   :  { %s7430_s25 = smov 64   ;;  %s6746_s22 = smov 4  }
  0x4e   :  { %100 = dma.hbm_to_vmem [thread:$0]  %s7410_s6, 512, %s95_s1, [#allocation11], %s7430_s25, %s7430_s25, %s6746_s22  }
  0x4f   :  { %s6369_s28 = scalar_lea.hbm %s7412_s8, 4096 }
  0x50   :  { %p6370_p10 = scmp.ne.s32.totalorder %s7412_s8, %s6369_s28  ;;  %p6373_p11 = scmp.lt.u32.totalorder %s6369_s28, %s7412_s8 }
  0x52   :  { %p6375_p12 = pnand %p6373_p11, %p6370_p10 }
  0x54   :  { %6378 = shalt.err (!%p6375_p12)
}
  0x55   :  { %s6379_s0 = scalar_lea.vmem %s6906_s2, 4096  ;;  %p6384_p0 = scmp.lt.s32.totalorder %s6906_s2, %s6906_s2 }
  0x56   :  { %p6380_p13 = scmp.ne.s32.totalorder %s6906_s2, %s6379_s0  ;;  %p6385_p1 = scmp.lt.s32.totalorder %s6379_s0, %s6379_s0 }
  0x58   :  { %p6386_p2 = por %p6385_p1, %p6384_p0 }
  0x5a   :  { %p6387_p3 = pnand %p6386_p2, %p6380_p13 }
  0x5c   :  { %6390 = shalt.err (!%p6387_p3)
}
  0x5d   :  { %s6747_s6 = smov 256   ;;  %s6748_s1 = smov 16  }
  0x5e   :  { %122 = dma.hbm_to_vmem [thread:$0]  %s7412_s8, 4096, %s6906_s2, [#allocation14], %s6747_s6, %s6747_s6, %s6748_s1  }
  0x5f   :  { %s6749_s21 = smov [#allocation16]   ;;  %s6391_s26 = scalar_lea.hbm %s7414_s10, 40960 }
  0x60   :  { %s138_s23 = sshll.u32 %s6749_s21, 4  ;;  %p6392_p4 = scmp.ne.s32.totalorder %s7414_s10, %s6391_s26  ;;  %s139_s23 = int_to_ptr.vmem [resolvable:$true] %s138_s23 }
  0x61   :  { %p6395_p5 = scmp.lt.u32.totalorder %s6391_s26, %s7414_s10 }
  0x63   :  { %p6397_p6 = pnand %p6395_p5, %p6392_p4 }
  0x65   :  { %6400 = shalt.err (!%p6397_p6)
}
  0x66   :  { %s6401_s25 = scalar_lea.vmem %s139_s23, 40960  ;;  %p6406_p8 = scmp.lt.s32.totalorder %s139_s23, %s139_s23 }
  0x67   :  { %p6402_p7 = scmp.ne.s32.totalorder %s139_s23, %s6401_s25  ;;  %p6407_p9 = scmp.lt.s32.totalorder %s6401_s25, %s6401_s25 }
  0x69   :  { %p6408_p10 = por %p6407_p9, %p6406_p8 }
  0x6b   :  { %p6409_p11 = pnand %p6408_p10, %p6402_p7 }
  0x6d   :  { %6412 = shalt.err (!%p6409_p11)
}
  0x6e   :  { %s6750_s8 = smov 640   ;;  %s6751_s2 = smov 40  }
  0x6f   :  { %144 = dma.hbm_to_vmem [thread:$0]  %s7414_s10, 40960, %s139_s23, [#allocation17], %s6750_s8, %s6750_s8, %s6751_s2  }
  0x70   :  { %s6752_s24 = smov [#allocation19]   ;;  %s6753_s21 = smov [#allocation22]  }
  0x71   :  { %s160_s3 = sshll.u32 %s6752_s24, 4  ;;  %s182_s27 = sshll.u32 %s6753_s21, 4  ;;  %s161_s3 = int_to_ptr.vmem [resolvable:$true] %s160_s3  ;;  %s183_s27 = int_to_ptr.vmem [resolvable:$true] %s182_s27 }
  0x72   :  { %s6413_s4 = scalar_lea.hbm %s7416_s12, 5120 }
  0x73   :  { %p6414_p12 = scmp.ne.s32.totalorder %s7416_s12, %s6413_s4  ;;  %p6417_p13 = scmp.lt.u32.totalorder %s6413_s4, %s7416_s12 }
  0x75   :  { %p6419_p0 = pnand %p6417_p13, %p6414_p12 }
  0x77   :  { %6422 = shalt.err (!%p6419_p0)
}
  0x78   :  { %s6423_s10 = scalar_lea.vmem %s161_s3, 5120  ;;  %p6428_p2 = scmp.lt.s32.totalorder %s161_s3, %s161_s3 }
  0x79   :  { %p6424_p1 = scmp.ne.s32.totalorder %s161_s3, %s6423_s10  ;;  %p6429_p3 = scmp.lt.s32.totalorder %s6423_s10, %s6423_s10 }
  0x7b   :  { %p6430_p4 = por %p6429_p3, %p6428_p2 }
  0x7d   :  { %p6431_p5 = pnand %p6430_p4, %p6424_p1 }
  0x7f   :  { %6434 = shalt.err (!%p6431_p5)
}
  0x80   :  { %s7439_s23 = smov 64   ;;  %s6435_s24 = scalar_lea.hbm %s7418_s14, 5120 }
  0x81   :  { %166 = dma.hbm_to_vmem [thread:$0]  %s7416_s12, 5120, %s161_s3, [#allocation20], %s7439_s23, %s7439_s23, %s6746_s22  }
  0x82   :  { %p6436_p6 = scmp.ne.s32.totalorder %s7418_s14, %s6435_s24  ;;  %p6439_p7 = scmp.lt.u32.totalorder %s6435_s24, %s7418_s14 }
  0x84   :  { %p6441_p8 = pnand %p6439_p7, %p6436_p6 }
  0x86   :  { %6444 = shalt.err (!%p6441_p8)
}
  0x87   :  { %s6445_s29 = scalar_lea.vmem %s183_s27, 5120  ;;  %p6450_p10 = scmp.lt.s32.totalorder %s183_s27, %s183_s27 }
  0x88   :  { %p6446_p9 = scmp.ne.s32.totalorder %s183_s27, %s6445_s29  ;;  %p6451_p11 = scmp.lt.s32.totalorder %s6445_s29, %s6445_s29 }
  0x8a   :  { %p6452_p12 = por %p6451_p11, %p6450_p10 }
  0x8c   :  { %p6453_p13 = pnand %p6452_p12, %p6446_p9 }
  0x8e   :  { %6456 = shalt.err (!%p6453_p13)
}
  0x8f   :  { %188 = dma.hbm_to_vmem [thread:$0]  %s7418_s14, 5120, %s183_s27, [#allocation23], %s7439_s23, %s7439_s23, %s6746_s22  }
  0x90   :  { %s6754_s25 = smov [#allocation25]   ;;  %s6755_s0 = smov [#allocation28]  }
  0x91   :  { %s205_s30 = sshll.u32 %s6754_s25, 4  ;;  %s224_s10 = sshll.u32 %s6755_s0, 4  ;;  %s206_s30 = int_to_ptr.vmem [resolvable:$true] %s205_s30  ;;  %s225_s10 = int_to_ptr.vmem [resolvable:$true] %s224_s10 }
  0x92   :  { %s6457_s6 = scalar_lea.hbm %s7420_s16, 128 }
  0x93   :  { %p6458_p0 = scmp.ne.s32.totalorder %s7420_s16, %s6457_s6  ;;  %p6461_p1 = scmp.lt.u32.totalorder %s6457_s6, %s7420_s16 }
  0x95   :  { %p6463_p2 = pnand %p6461_p1, %p6458_p0 }
  0x97   :  { %6466 = shalt.err (!%p6463_p2)
}
  0x98   :  { %s6467_s14 = scalar_lea.vmem %s206_s30, 128  ;;  %p6472_p4 = scmp.lt.s32.totalorder %s206_s30, %s206_s30 }
  0x99   :  { %p6468_p3 = scmp.ne.s32.totalorder %s206_s30, %s6467_s14  ;;  %p6473_p5 = scmp.lt.s32.totalorder %s6467_s14, %s6467_s14 }
  0x9b   :  { %p6474_p6 = por %p6473_p5, %p6472_p4 }
  0x9d   :  { %p6475_p7 = pnand %p6474_p6, %p6468_p3 }
  0x9f   :  { %6478 = shalt.err (!%p6475_p7)
}
  0xa0   :  { %208 = dma.hbm_to_vmem [thread:$0]  %s7420_s16, 128, %s206_s30, [#allocation26]  }
  0xa1   :  { %s6479_s12 = scalar_lea.hbm %s7422_s18, 1024 }
  0xa2   :  { %p6480_p8 = scmp.ne.s32.totalorder %s7422_s18, %s6479_s12  ;;  %p6483_p9 = scmp.lt.u32.totalorder %s6479_s12, %s7422_s18 }
  0xa4   :  { %p6485_p10 = pnand %p6483_p9, %p6480_p8 }
  0xa6   :  { %6488 = shalt.err (!%p6485_p10)
}
  0xa7   :  { %s6489_s2 = scalar_lea.vmem %s225_s10, 1024  ;;  %p6494_p12 = scmp.lt.s32.totalorder %s225_s10, %s225_s10 }
  0xa8   :  { %p6490_p11 = scmp.ne.s32.totalorder %s225_s10, %s6489_s2  ;;  %p6495_p13 = scmp.lt.s32.totalorder %s6489_s2, %s6489_s2 }
  0xaa   :  { %p6496_p0 = por %p6495_p13, %p6494_p12 }
  0xac   :  { %p6497_p1 = pnand %p6496_p0, %p6490_p11 }
  0xae   :  { %6500 = shalt.err (!%p6497_p1)
}
  0xaf   :  { %230 = dma.hbm_to_vmem [thread:$0]  %s7422_s18, 1024, %s225_s10, [#allocation29], %s7439_s23, %s7439_s23, %s6746_s22  }
  0xb0   :  { %s6756_s6 = smov [#allocation2]   ;;  %s6757_s24 = smov [#allocation6]  }
  0xb1   :  { %s43_s1 = sshll.u32 %s6756_s6, 4  ;;  %s63_s21 = sshll.u32 %s6757_s24, 4  ;;  %s44_s1 = int_to_ptr.vmem [resolvable:$true] %s43_s1  ;;  %s64_s21 = int_to_ptr.vmem [resolvable:$true] %s63_s21 }
  0xb2   :  { %s7440_s27 = sld [smem:[#allocation42_spill]] }
  0xb8   :  { %s6501_s26 = scalar_lea.hbm %s7440_s27, 16 }
  0xb9   :  { %p6502_p2 = scmp.ne.s32.totalorder %s7440_s27, %s6501_s26  ;;  %p6505_p3 = scmp.lt.u32.totalorder %s6501_s26, %s7440_s27 }
  0xbb   :  { %p6507_p4 = pnand %p6505_p3, %p6502_p2 }
  0xbd   :  { %6510 = shalt.err (!%p6507_p4)
}
  0xbe   :  { %s6511_s18 = scalar_lea.vmem %s44_s1, 16  ;;  %s6515_s10 = scalar_lea.vmem %s44_s1, 32 }
  0xbf   :  { %p6512_p5 = scmp.ne.s32.totalorder %s44_s1, %s6511_s18  ;;  %p6516_p6 = scmp.lt.s32.totalorder %s44_s1, %s44_s1 }
  0xc0   :  { %p6517_p7 = scmp.lt.s32.totalorder %s6515_s10, %s6511_s18 }
  0xc2   :  { %p6518_p8 = por %p6517_p7, %p6516_p6 }
  0xc4   :  { %p6519_p9 = pnand %p6518_p8, %p6512_p5 }
  0xc6   :  { %6522 = shalt.err (!%p6519_p9)
}
  0xc7   :  { %46 = dma.hbm_to_vmem [thread:$0]  %s7440_s27, 16, %s44_s1, [#allocation3]  }
  0xc8   :  { %s7441_s16 = sld [smem:[#allocation44_spill]] }
  0xce   :  { %s6523_s30 = scalar_lea.hbm %s7441_s16, 16 }
  0xcf   :  { %p6524_p10 = scmp.ne.s32.totalorder %s7441_s16, %s6523_s30  ;;  %p6527_p11 = scmp.lt.u32.totalorder %s6523_s30, %s7441_s16 }
  0xd1   :  { %p6529_p12 = pnand %p6527_p11, %p6524_p10 }
  0xd3   :  { %6532 = shalt.err (!%p6529_p12)
}
  0xd4   :  { %s6533_s26 = scalar_lea.vmem %s64_s21, 16  ;;  %s6537_s4 = scalar_lea.vmem %s64_s21, 32 }
  0xd5   :  { %p6534_p13 = scmp.ne.s32.totalorder %s64_s21, %s6533_s26  ;;  %p6538_p0 = scmp.lt.s32.totalorder %s64_s21, %s64_s21 }
  0xd6   :  { %p6539_p1 = scmp.lt.s32.totalorder %s6537_s4, %s6533_s26 }
  0xd8   :  { %p6540_p2 = por %p6539_p1, %p6538_p0 }
  0xda   :  { %p6541_p3 = pnand %p6540_p2, %p6534_p13 }
  0xdc   :  { %6544 = shalt.err (!%p6541_p3)
}
  0xdd   :  { %66 = dma.hbm_to_vmem [thread:$0]  %s7441_s16, 16, %s64_s21, [#allocation5]  }
  0xde   :  { %s6758_s29 = smov [#allocation9]   ;;  %s6759_s3 = smov [#allocation12]  }
  0xdf   :  { %s82_s12 = sshll.u32 %s6758_s29, 4  ;;  %s107_s18 = sshll.u32 %s6759_s3, 4  ;;  %s83_s12 = int_to_ptr.vmem [resolvable:$true] %s82_s12  ;;  %s108_s18 = int_to_ptr.vmem [resolvable:$true] %s107_s18 }
  0xe0   :  { %s6545_s0 = scalar_lea.hbm %s7409_s5, 512 }
  0xe1   :  { %p6546_p4 = scmp.ne.s32.totalorder %s7409_s5, %s6545_s0  ;;  %p6549_p5 = scmp.lt.u32.totalorder %s6545_s0, %s7409_s5 }
  0xe3   :  { %p6551_p6 = pnand %p6549_p5, %p6546_p4 }
  0xe5   :  { %6554 = shalt.err (!%p6551_p6)
}
  0xe6   :  { %s6555_s21 = scalar_lea.vmem %s83_s12, 512  ;;  %p6560_p8 = scmp.lt.s32.totalorder %s83_s12, %s83_s12 }
  0xe7   :  { %p6556_p7 = scmp.ne.s32.totalorder %s83_s12, %s6555_s21  ;;  %p6561_p9 = scmp.lt.s32.totalorder %s6555_s21, %s6555_s21 }
  0xe9   :  { %p6562_p10 = por %p6561_p9, %p6560_p8 }
  0xeb   :  { %p6563_p11 = pnand %p6562_p10, %p6556_p7 }
  0xed   :  { %6566 = shalt.err (!%p6563_p11)
}
  0xee   :  { %88 = dma.hbm_to_vmem [thread:$0]  %s7409_s5, 512, %s83_s12, [#allocation8], %s7439_s23, %s7439_s23, %s6746_s22  }
  0xef   :  { %s6567_s26 = scalar_lea.hbm %s7411_s7, 16 }
  0xf0   :  { %p6568_p12 = scmp.ne.s32.totalorder %s7411_s7, %s6567_s26  ;;  %p6571_p13 = scmp.lt.u32.totalorder %s6567_s26, %s7411_s7 }
  0xf2   :  { %p6573_p0 = pnand %p6571_p13, %p6568_p12 }
  0xf4   :  { %6576 = shalt.err (!%p6573_p0)
}
  0xf5   :  { %s6577_s3 = scalar_lea.vmem %s108_s18, 16  ;;  %s6581_s10 = scalar_lea.vmem %s108_s18, 32 }
  0xf6   :  { %p6578_p1 = scmp.ne.s32.totalorder %s108_s18, %s6577_s3  ;;  %p6582_p2 = scmp.lt.s32.totalorder %s108_s18, %s108_s18 }
  0xf7   :  { %p6583_p3 = scmp.lt.s32.totalorder %s6581_s10, %s6577_s3 }
  0xf9   :  { %p6584_p4 = por %p6583_p3, %p6582_p2 }
  0xfb   :  { %p6585_p5 = pnand %p6584_p4, %p6578_p1 }
  0xfd   :  { %6588 = shalt.err (!%p6585_p5)
}
  0xfe   :  { %110 = dma.hbm_to_vmem [thread:$0]  %s7411_s7, 16, %s108_s18, [#allocation11]  }
  0xff   :  { %s6760_s23 = smov [#allocation15]   ;;  %s6761_s25 = smov [#allocation18]  }
 0x100   :  { %s129_s12 = sshll.u32 %s6760_s23, 4  ;;  %s151_s0 = sshll.u32 %s6761_s25, 4  ;;  %s130_s12 = int_to_ptr.vmem [resolvable:$true] %s129_s12  ;;  %s152_s0 = int_to_ptr.vmem [resolvable:$true] %s151_s0 }
 0x101   :  { %s6589_s30 = scalar_lea.hbm %s7413_s9, 64 }
 0x102   :  { %p6590_p6 = scmp.ne.s32.totalorder %s7413_s9, %s6589_s30  ;;  %p6593_p7 = scmp.lt.u32.totalorder %s6589_s30, %s7413_s9 }
 0x104   :  { %p6595_p8 = pnand %p6593_p7, %p6590_p6 }
 0x106   :  { %6598 = shalt.err (!%p6595_p8)
}
 0x107   :  { %s6599_s7 = scalar_lea.vmem %s130_s12, 64  ;;  %p6604_p10 = scmp.lt.s32.totalorder %s130_s12, %s130_s12 }
 0x108   :  { %p6600_p9 = scmp.ne.s32.totalorder %s130_s12, %s6599_s7  ;;  %p6605_p11 = scmp.lt.s32.totalorder %s6599_s7, %s6599_s7 }
 0x10a   :  { %p6606_p12 = por %p6605_p11, %p6604_p10 }
 0x10c   :  { %p6607_p13 = pnand %p6606_p12, %p6600_p9 }
 0x10e   :  { %6610 = shalt.err (!%p6607_p13)
}
 0x10f   :  { %132 = dma.hbm_to_vmem [thread:$0]  %s7413_s9, 64, %s130_s12, [#allocation14]  }
 0x110   :  { %s6611_s4 = scalar_lea.hbm %s7415_s11, 160 }
 0x111   :  { %p6612_p0 = scmp.ne.s32.totalorder %s7415_s11, %s6611_s4  ;;  %p6615_p1 = scmp.lt.u32.totalorder %s6611_s4, %s7415_s11 }
 0x113   :  { %p6617_p2 = pnand %p6615_p1, %p6612_p0 }
 0x115   :  { %6620 = shalt.err (!%p6617_p2)
}
 0x116   :  { %s6621_s10 = scalar_lea.vmem %s152_s0, 160  ;;  %p6626_p4 = scmp.lt.s32.totalorder %s152_s0, %s152_s0 }
 0x117   :  { %p6622_p3 = scmp.ne.s32.totalorder %s152_s0, %s6621_s10  ;;  %p6627_p5 = scmp.lt.s32.totalorder %s6621_s10, %s6621_s10 }
 0x119   :  { %p6628_p6 = por %p6627_p5, %p6626_p4 }
 0x11b   :  { %p6629_p7 = pnand %p6628_p6, %p6622_p3 }
 0x11d   :  { %6632 = shalt.err (!%p6629_p7)
}
 0x11e   :  { %154 = dma.hbm_to_vmem [thread:$0]  %s7415_s11, 160, %s152_s0, [#allocation17]  }
 0x11f   :  { %s6762_s22 = smov [#allocation21]   ;;  %s6763_s12 = smov [#allocation24]  }
 0x120   :  { %s173_s23 = sshll.u32 %s6762_s22, 4  ;;  %s195_s25 = sshll.u32 %s6763_s12, 4  ;;  %s174_s23 = int_to_ptr.vmem [resolvable:$true] %s173_s23  ;;  %s196_s25 = int_to_ptr.vmem [resolvable:$true] %s195_s25 }
 0x121   :  { %s6633_s30 = scalar_lea.hbm %s7417_s13, 128 }
 0x122   :  { %p6634_p8 = scmp.ne.s32.totalorder %s7417_s13, %s6633_s30  ;;  %p6637_p9 = scmp.lt.u32.totalorder %s6633_s30, %s7417_s13 }
 0x124   :  { %p6639_p10 = pnand %p6637_p9, %p6634_p8 }
 0x126   :  { %6642 = shalt.err (!%p6639_p10)
}
 0x127   :  { %s6643_s11 = scalar_lea.vmem %s174_s23, 128  ;;  %p6648_p12 = scmp.lt.s32.totalorder %s174_s23, %s174_s23 }
 0x128   :  { %p6644_p11 = scmp.ne.s32.totalorder %s174_s23, %s6643_s11  ;;  %p6649_p13 = scmp.lt.s32.totalorder %s6643_s11, %s6643_s11 }
 0x12a   :  { %p6650_p0 = por %p6649_p13, %p6648_p12 }
 0x12c   :  { %p6651_p1 = pnand %p6650_p0, %p6644_p11 }
 0x12e   :  { %6654 = shalt.err (!%p6651_p1)
}
 0x12f   :  { %176 = dma.hbm_to_vmem [thread:$0]  %s7417_s13, 128, %s174_s23, [#allocation20]  }
 0x130   :  { %s6655_s14 = scalar_lea.hbm %s7419_s15, 128 }
 0x131   :  { %p6656_p2 = scmp.ne.s32.totalorder %s7419_s15, %s6655_s14  ;;  %p6659_p3 = scmp.lt.u32.totalorder %s6655_s14, %s7419_s15 }
 0x133   :  { %p6661_p4 = pnand %p6659_p3, %p6656_p2 }
 0x135   :  { %6664 = shalt.err (!%p6661_p4)
}
 0x136   :  { %s6665_s29 = scalar_lea.vmem %s196_s25, 128  ;;  %p6670_p6 = scmp.lt.s32.totalorder %s196_s25, %s196_s25 }
 0x137   :  { %p6666_p5 = scmp.ne.s32.totalorder %s196_s25, %s6665_s29  ;;  %p6671_p7 = scmp.lt.s32.totalorder %s6665_s29, %s6665_s29 }
 0x139   :  { %p6672_p8 = por %p6671_p7, %p6670_p6 }
 0x13b   :  { %p6673_p9 = pnand %p6672_p8, %p6666_p5 }
 0x13d   :  { %6676 = shalt.err (!%p6673_p9)
}
 0x13e   :  { %198 = dma.hbm_to_vmem [thread:$0]  %s7419_s15, 128, %s196_s25, [#allocation23]  }
 0x13f   :  { %s6764_s10 = smov [#allocation27]   ;;  %s6765_s5 = smov [#allocation30]  }
 0x140   :  { %s215_s9 = sshll.u32 %s6764_s10, 4  ;;  %s237_s22 = sshll.u32 %s6765_s5, 4  ;;  %s216_s9 = int_to_ptr.vmem [resolvable:$true] %s215_s9  ;;  %s238_s22 = int_to_ptr.vmem [resolvable:$true] %s237_s22 }
 0x141   :  { %s6677_s8 = scalar_lea.hbm %s7421_s17, 128 }
 0x142   :  { %p6678_p10 = scmp.ne.s32.totalorder %s7421_s17, %s6677_s8  ;;  %p6681_p11 = scmp.lt.u32.totalorder %s6677_s8, %s7421_s17 }
 0x144   :  { %p6683_p12 = pnand %p6681_p11, %p6678_p10 }
 0x146   :  { %6686 = shalt.err (!%p6683_p12)
}
 0x147   :  { %s6687_s15 = scalar_lea.vmem %s216_s9, 128  ;;  %p6692_p0 = scmp.lt.s32.totalorder %s216_s9, %s216_s9 }
 0x148   :  { %p6688_p13 = scmp.ne.s32.totalorder %s216_s9, %s6687_s15  ;;  %p6693_p1 = scmp.lt.s32.totalorder %s6687_s15, %s6687_s15 }
 0x14a   :  { %p6694_p2 = por %p6693_p1, %p6692_p0 }
 0x14c   :  { %p6695_p3 = pnand %p6694_p2, %p6688_p13 }
 0x14e   :  { %6698 = shalt.err (!%p6695_p3)
}
 0x14f   :  { %218 = dma.hbm_to_vmem [thread:$0]  %s7421_s17, 128, %s216_s9, [#allocation26]  }
 0x150   :  { %s6699_s0 = scalar_lea.hbm %s7423_s19, 16 }
 0x151   :  { %p6700_p4 = scmp.ne.s32.totalorder %s7423_s19, %s6699_s0  ;;  %p6703_p5 = scmp.lt.u32.totalorder %s6699_s0, %s7423_s19 }
 0x153   :  { %p6705_p6 = pnand %p6703_p5, %p6700_p4 }
 0x155   :  { %6708 = shalt.err (!%p6705_p6)
}
 0x156   :  { %s6709_s26 = scalar_lea.vmem %s238_s22, 16  ;;  %s6713_s4 = scalar_lea.vmem %s238_s22, 32 }
 0x157   :  { %p6710_p7 = scmp.ne.s32.totalorder %s238_s22, %s6709_s26  ;;  %p6714_p8 = scmp.lt.s32.totalorder %s238_s22, %s238_s22 }
 0x158   :  { %p6715_p9 = scmp.lt.s32.totalorder %s6713_s4, %s6709_s26 }
 0x15a   :  { %p6716_p10 = por %p6715_p9, %p6714_p8 }
 0x15c   :  { %p6717_p11 = pnand %p6716_p10, %p6710_p7 }
 0x15e   :  { %6720 = shalt.err (!%p6717_p11)
}
 0x15f   :  { %240 = dma.hbm_to_vmem [thread:$0]  %s7423_s19, 16, %s238_s22, [#allocation29]  }
 0x160   :  { %6721 = dma.done.wait [#allocation3], 16  }
 0x161   :  { %6722 = vsyncadd [#allocation3], 4294967280 }
 0x162   :  { %6723 = dma.done.wait [#allocation5], 32  }
 0x163   :  { %6724 = vsyncadd [#allocation5], 4294967264 }
 0x164   :  { %6725 = dma.done.wait [#allocation8], 528  }
 0x165   :  { %6726 = vsyncadd [#allocation8], 4294966768 }
 0x166   :  { %6727 = dma.done.wait [#allocation11], 528  }
 0x167   :  { %6728 = vsyncadd [#allocation11], 4294966768 }
 0x168   :  { %6729 = dma.done.wait [#allocation14], 4160  }
 0x169   :  { %6730 = vsyncadd [#allocation14], 4294963136 }
 0x16a   :  { %6731 = dma.done.wait [#allocation17], 41120  }
 0x16b   :  { %6732 = vsyncadd [#allocation17], 4294926176 }
 0x16c   :  { %6733 = dma.done.wait [#allocation20], 5248  }
 0x16d   :  { %6734 = vsyncadd [#allocation20], 4294962048 }
 0x16e   :  { %6735 = dma.done.wait [#allocation23], 5248  }
 0x16f   :  { %6736 = vsyncadd [#allocation23], 4294962048 }
 0x170   :  { %6737 = dma.done.wait [#allocation26], 256  }
 0x171   :  { %6738 = vsyncadd [#allocation26], 4294967040 }
 0x172   :  { %6739 = dma.done.wait [#allocation29], 1040  }
 0x173   :  { %6740 = vsyncadd [#allocation29], 4294966256  ;;  %v6766_v0 = vmov 2   ;;  %s7442_s29 = sld [smem:[#allocation41_spill]]  ;;  %v5664_v3 = vld [vmem:[#allocation10] sm:$0xff]   ;;  %v6767_v4 = vmov 0.0  }
 0x174   :  { %5660 = vset.pattern.permute.xlu0 %v6766_v0  ;;  %5376 = vmatprep.subr.bf16.mxu1 %v6767_v4  ;;  %v5665_v5 = vld [vmem:[#allocation10 + $0x8] sm:$0xff]   ;;  %vm6768_vm0 = vmmov 0   ;;  %v5666_v6 = vld [vmem:[#allocation10 + $0x10] sm:$0xff]   ;;  %v5667_v7 = vld [vmem:[#allocation10 + $0x18] sm:$0xff]   ;;  %v6769_v26 = vmov 683565275  }
 0x175   :  { %5384 = vmatprep.mubr.msk.bf16.mxu1 %vm6768_vm0, %v6767_v4  ;;  %5377 = vmatpush3.bf16.msra.mxu1 %v5664_v3  ;;  %v5672_v8 = vld [vmem:[#allocation13 + $0x4] ss:$16 sps:$4 sm:$0xff]   ;;  %v5677_v9 = vld [vmem:[#allocation13] ss:$16 sps:$4 sm:$0xff]   ;;  %v6770_v28 = vmov 2475754826  }
 0x176   :  { %5378 = vmatprep.subr.bf16.mxu1 %v6767_v4  ;;  %v5678_v10 = vld [vmem:[#allocation13 + $0x24] ss:$16 sps:$4 sm:$0xff]   ;;  %898 = vmatprep.subr.bf16.mxu0 %v5672_v8  ;;  %v5683_v11 = vld [vmem:[#allocation13 + $0x20] ss:$16 sps:$4 sm:$0xff]   ;;  %v6771_v31 = vmov 2131351028  }
 0x177   :  { %899 = vmatpush1.bf16.msra.mxu0 %v5677_v9  ;;  %v4783_v12 = vld [vmem:[#allocation2] ss:$0 sm:$0xff]  ;;  %v6772_v33 = vmov 2102212464   ;;  %v6773_v38 = vmov 920167782  }
 0x178   :  { %900 = vmatprep.subr.bf16.mxu0 %v5678_v10  ;;  %v6774_v41 = vmov 1326507024   ;;  %vm563_vm14 = vcmask 523264  }
 0x179   :  { %v299_v1 = vld [vmem:[%s7442_s29] sm:$0xff]  ;;  %5379 = vmatpush3.bf16.msra.mxu1 %v5665_v5 }
 0x17a   :  { %v300_v2 = vmul.f32 1000.0, %v299_v1  ;;  %5380 = vmatprep.subr.bf16.mxu1 %v6767_v4 }
 0x17b   :  { %901 = vmatpush1.bf16.msra.mxu0 %v5683_v11 }
 0x17c   :  { %304 = vperm.xlu0 %5660, %v300_v2  }
 0x17d   :  { %5381 = vmatpush3.bf16.msra.mxu1 %v5666_v6 }
 0x17e   :  { %5382 = vmatprep.subr.bf16.mxu1 %v6767_v4 }
 0x181   :  { %5383 = vmatpush3.bf16.msra.mxu1 %v5667_v7 }
 0x182   :  { %5388 = vmatprep.subr.bf16.mxu1 %v6767_v4 }
 0x1fb   :  { %v305_v13 = vpop.permute.xlu0 %304 }
 0x1fc   :  { %v7142_v14 = vmul.f32 %v4783_v12, %v305_v13 }
 0x1fe   :  { %v314_v15 = vand.u32 2147483647, %v7142_v14  ;;  %v317_v16 = vand.u32 2139095040, %v7142_v14  ;;  %vm316_vm8 = vcmp.lt.s32.totalorder %v7142_v14, 0  ;;  %vm406_vm13 = vweird.f32 %v7142_v14 }
 0x200   :  { %v318_v17 = vshrl.u32 %v317_v16, 23  ;;  %v321_v18 = vand.u32 8388607, %v314_v15  ;;  %vm315_vm9 = vcmp.le.f32.partialorder %v314_v15, 0.7853982 }
 0x202   :  { %v4784_v19 = vadd.s32 4294967169, %v318_v17  ;;  %v322_v21 = vor.u32 8388608, %v321_v18 }
 0x204   :  { %v324_v20 = vadd.s32 1, %v4784_v19  ;;  %v362_v30 = vshll.u32 %v322_v21, 8 }
 0x206   :  { %vm325_vm1 = vcmp.gt.s32.totalorder %v324_v20, 0 }
 0x207   :  { %v326_v22 = vsel %vm325_vm1, %v324_v20, 0 }
 0x208   :  { %v327_v23 = vshrl.u32 %v326_v22, 5  ;;  %v328_v24 = vand.u32 31, %v326_v22 }
 0x20a   :  { %v329_v25 = vsub.s32 32, %v328_v24  ;;  %v331_v27 = vshll.u32 %v6769_v26, %v328_v24  ;;  %v334_v29 = vshll.u32 %v6770_v28, %v328_v24  ;;  %v337_v32 = vshll.u32 %v6771_v31, %v328_v24 }
 0x20b   :  { %v340_v34 = vshll.u32 %v6772_v33, %v328_v24  ;;  %vm346_vm2 = vcmp.lt.s32.totalorder %v327_v23, 1  ;;  %vm347_vm3 = vcmp.lt.s32.totalorder %v327_v23, 2  ;;  %v343_v39 = vshll.u32 %v6773_v38, %v328_v24 }
 0x20c   :  { %v332_v35 = vshrl.u32 %v6770_v28, %v329_v25  ;;  %v335_v36 = vshrl.u32 %v6771_v31, %v329_v25  ;;  %v338_v37 = vshrl.u32 %v6772_v33, %v329_v25  ;;  %v341_v40 = vshrl.u32 %v6773_v38, %v329_v25 }
 0x20d   :  { %v344_v42 = vshrl.u32 %v6774_v41, %v329_v25  ;;  %vm348_vm4 = vcmp.lt.s32.totalorder %v327_v23, 3  ;;  %vm349_vm5 = vcmp.lt.s32.totalorder %v327_v23, 4  ;;  %v330_v51 = vshrl.u32 %v6769_v26, %v329_v25 }
 0x20e   :  { %v333_v43 = vor.u32 %v332_v35, %v331_v27  ;;  %v336_v44 = vor.u32 %v335_v36, %v334_v29  ;;  %v339_v45 = vor.u32 %v338_v37, %v337_v32  ;;  %v342_v46 = vor.u32 %v341_v40, %v340_v34 }
 0x20f   :  { %v345_v47 = vor.u32 %v344_v42, %v343_v39 }
 0x210   :  { %v351_v48 = vsel %vm349_vm5, %v339_v45, 2102212464  ;;  %v354_v49 = vsel %vm346_vm2, %v333_v43, %v336_v44  ;;  %v358_v50 = vsel %vm346_vm2, %v336_v44, %v339_v45  ;;  %v355_v52 = vsel %vm349_vm5, %v342_v46, 920167782 }
 0x211   :  { %v359_v53 = vsel %vm349_vm5, %v345_v47, 1326507024  ;;  %v356_v54 = vsel %vm348_vm4, %v339_v45, %v355_v52  ;;  %v350_v56 = vsel %vm346_vm2, %v330_v51, %v333_v43  ;;  %v352_v57 = vsel %vm348_vm4, %v336_v44, %v351_v48  ;;  %v5668_v44 = vld [vmem:[#allocation9] sm:$0xff]   ;;  %v5669_v47 = vld [vmem:[#allocation9 + $0x8] sm:$0xff]   ;;  %v5671_v52 = vld [vmem:[#allocation9 + $0x18] sm:$0xff]  }
 0x212   :  { %v360_v55 = vsel %vm348_vm4, %v342_v46, %v359_v53  ;;  %v357_v58 = vsel %vm347_vm3, %v354_v49, %v356_v54  ;;  %v353_v0 = vsel %vm347_vm3, %v350_v56, %v352_v57  ;;  %v5676_v53 = vld [vmem:[#allocation13 + $0xc] ss:$16 sps:$4 sm:$0xff]  }
 0x213   :  { %v361_v59 = vsel %vm347_vm3, %v358_v50, %v360_v55  ;;  %v7159_v62 = vmul.u32.u64.low %v362_v30, %v357_v58  ;;  %v7160_v63 = vmul.u32.u64.high %v362_v30, %v357_v58, %v7159_v62  ;;  %v369_v2 = vmul.u32 %v362_v30, %v353_v0  ;;  %v5670_v50 = vld [vmem:[#allocation9 + $0x10] sm:$0xff]   ;;  %v5674_v55 = vld [vmem:[#allocation13 + $0x8] ss:$16 sps:$4 sm:$0xff]  }
 0x214   :  { %v7156_v60 = vmul.u32.u64.low %v362_v30, %v361_v59  ;;  %v7157_v61 = vmul.u32.u64.high %v362_v30, %v361_v59, %v7156_v60  ;;  %v5682_v57 = vld [vmem:[#allocation13 + $0x2c] ss:$16 sps:$4 sm:$0xff]   ;;  %v5680_v58 = vld [vmem:[#allocation13 + $0x28] ss:$16 sps:$4 sm:$0xff]   ;;  %v5684_v59 = vld [vmem:[#allocation13 + $0x44] ss:$16 sps:$4 sm:$0xff]  }
 0x215   :  { %v372_v1 = vadd.s32 1, %v7160_v63  ;;  %v5688_v60 = vld [vmem:[#allocation13 + $0x4c] ss:$16 sps:$4 sm:$0xff]   ;;  %902 = vmatprep.subr.bf16.mxu0 %v5684_v59  ;;  %v5758_v59 = vld [vmem:[#allocation16 + $0x1e4] ss:$40 sps:$4 sm:$0xff]  }
 0x216   :  { %vm371_vm6 = vc.u32 %v7157_v61, %v7159_v62  ;;  %v370_v17 = vadd.s32 %v7159_v62, %v7157_v61  ;;  %v5686_v61 = vld [vmem:[#allocation13 + $0x48] ss:$16 sps:$4 sm:$0xff]   ;;  %v5689_v62 = vld [vmem:[#allocation13 + $0x40] ss:$16 sps:$4 sm:$0xff]   ;;  %v5694_v0 = vld [vmem:[#allocation13 + $0x6c] ss:$16 sps:$4 sm:$0xff]  }
 0x217   :  { %v373_v3 = vsel %vm371_vm6, %v372_v1, %v7160_v63  ;;  %903 = vmatpush1.bf16.msra.mxu0 %v5689_v62  ;;  %v5692_v63 = vld [vmem:[#allocation13 + $0x68] ss:$16 sps:$4 sm:$0xff]   ;;  %v5695_v1 = vld [vmem:[#allocation13 + $0x60] ss:$16 sps:$4 sm:$0xff]   ;;  %v5759_v62 = vld [vmem:[#allocation16 + $0x6e0] ss:$40 sps:$4 sm:$0xff]  }
 0x218   :  { %v374_v5 = vadd.s32 %v373_v3, %v369_v2  ;;  %v5696_v2 = vld [vmem:[#allocation13 + $0x84] ss:$16 sps:$4 sm:$0xff]   ;;  %v5700_v3 = vld [vmem:[#allocation13 + $0x8c] ss:$16 sps:$4 sm:$0xff]  }
 0x21a   :  { %v375_v6 = vadd.s32 536870912, %v374_v5 }
 0x21c   :  { %v376_v7 = vshrl.u32 %v375_v6, 30  ;;  %v5701_v6 = vld [vmem:[#allocation13 + $0x80] ss:$16 sps:$4 sm:$0xff]  }
 0x21e   :  { %v377_v8 = vshll.u32 %v376_v7, 30  ;;  %v400_v30 = vsub.s32 4, %v376_v7 }
 0x220   :  { %v378_v9 = vsub.s32 %v374_v5, %v377_v8  ;;  %v401_v33 = vsel %vm316_vm8, %v400_v30, %v376_v7  ;;  %v5698_v5 = vld [vmem:[#allocation13 + $0x88] ss:$16 sps:$4 sm:$0xff]   ;;  %v5702_v7 = vld [vmem:[#allocation13 + $0xa4] ss:$16 sps:$4 sm:$0xff]   ;;  %v5706_v8 = vld [vmem:[#allocation13 + $0xac] ss:$16 sps:$4 sm:$0xff]  }
 0x221   :  { %v403_v34 = vsel %vm315_vm9, 0, %v401_v33  ;;  %v4802_v30 = vld [vmem:[#allocation12] ss:$0 sm:$0xff] }
 0x222   :  { %v380_v10 = vsub.s32 0, %v378_v9  ;;  %v512_v35 = vand.u32 3, %v403_v34  ;;  %v407_v41 = vadd.s32 3, %v403_v34 }
 0x224   :  { %v4785_v11 = vmin.u32 %v380_v10, %v378_v9  ;;  %vm517_vm10 = vcmp.eq.s32.totalorder %v512_v35, 2  ;;  %vm514_vm11 = vcmp.eq.s32.totalorder %v512_v35, 0  ;;  %vm513_vm12 = vcmp.lt.s32.totalorder %v512_v35, 2  ;;  %v5707_v10 = vld [vmem:[#allocation13 + $0xa0] ss:$16 sps:$4 sm:$0xff]  }
 0x225   :  { %v408_v46 = vand.u32 3, %v407_v41  ;;  %v5726_v41 = vld [vmem:[#allocation16 + $0x50] ss:$40 sps:$4 sm:$0xff]  }
 0x226   :  { %v382_v12 = vclz %v4785_v11  ;;  %v5708_v11 = vld [vmem:[#allocation13 + $0xc4] ss:$16 sps:$4 sm:$0xff]  }
 0x227   :  { %vm410_vm15 = vcmp.eq.s32.totalorder %v408_v46, 0  ;;  %vm413_vm1 = vcmp.eq.s32.totalorder %v408_v46, 2  ;;  %vm409_vm2 = vcmp.lt.s32.totalorder %v408_v46, 2  ;;  %v5735_v46 = vld [vmem:[#allocation16 + $0x5a0] ss:$40 sps:$4 sm:$0xff]  }
 0x228   :  { %v4786_v13 = vadd.s32 4294967294, %v382_v12  ;;  %v5712_v12 = vld [vmem:[#allocation13 + $0xcc] ss:$16 sps:$4 sm:$0xff]  }
 0x22a   :  { %vm4787_vm7 = vcmp.lt.s32.totalorder %v4786_v13, 0 }
 0x22b   :  { %v385_v16 = vsel %vm4787_vm7, 0, %v4786_v13  ;;  %v5710_v13 = vld [vmem:[#allocation13 + $0xc8] ss:$16 sps:$4 sm:$0xff]  }
 0x22c   :  { %v386_v18 = vsub.s32 32, %v385_v16  ;;  %v390_v19 = vsub.s32 4294967266, %v385_v16  ;;  %v387_v20 = vshll.u32 %v378_v9, %v385_v16  ;;  %v5704_v9 = vld [vmem:[#allocation13 + $0xa8] ss:$16 sps:$4 sm:$0xff]   ;;  %v5713_v16 = vld [vmem:[#allocation13 + $0xc0] ss:$16 sps:$4 sm:$0xff]  }
 0x22e   :  { %v388_v21 = vshrl.u32 %v370_v17, %v386_v18  ;;  %v391_v22 = vadd.s32 127, %v390_v19  ;;  %v5714_v17 = vld [vmem:[#allocation13 + $0xe4] ss:$16 sps:$4 sm:$0xff]   ;;  %v5718_v18 = vld [vmem:[#allocation13 + $0xec] ss:$16 sps:$4 sm:$0xff]  }
 0x22f   :  { %v5716_v19 = vld [vmem:[#allocation13 + $0xe8] ss:$16 sps:$4 sm:$0xff]  }
 0x230   :  { %v389_v23 = vor.u32 %v388_v21, %v387_v20  ;;  %v392_v24 = vshll.u32 %v391_v22, 23  ;;  %v5719_v20 = vld [vmem:[#allocation13 + $0xe0] ss:$16 sps:$4 sm:$0xff]   ;;  %v6775_v21 = vmov 0  }
 0x231   :  { %930 = vmatprep.mubr.bf16.mxu0 %v6775_v21  ;;  %v5722_v22 = vld [vmem:[#allocation16 + $0x4] ss:$40 sps:$4 sm:$0xff]   ;;  %5661 = vset.pattern.permute.xlu0 %v6775_v21 }
 0x232   :  { %v393_v25 = vor.u32 4788187, %v392_v24  ;;  %v396_v27 = vcvt.s32.f32 %v389_v23  ;;  %v5725_v23 = vld [vmem:[#allocation16 + $0x504] ss:$40 sps:$4 sm:$0xff]   ;;  %v7186_v24 = vld [vmem:[%s7442_s29] sm:$0xff] }
 0x233   :  { %3371 = vperm.xlu0 %5661, %v7186_v24  }
 0x234   :  { %v394_v26 = vand.u32 2147483647, %v393_v25 }
 0x236   :  { %v397_v28 = vmul.f32 %v396_v27, %v394_v26 }
 0x238   :  { %v398_v29 = vxor.u32 2147483648, %v397_v28 }
 0x23a   :  { %v399_v31 = vsel %vm316_vm8, %v398_v29, %v397_v28 }
 0x23b   :  { %v402_v32 = vsel %vm315_vm9, %v7142_v14, %v399_v31  ;;  %v5690_v14 = vld [vmem:[#allocation13 + $0x64] ss:$16 sps:$4 sm:$0xff]  }
 0x23c   :  { %6288 = vcosq.f32 %v402_v32  ;;  %904 = vmatprep.subr.bf16.mxu0 %v5690_v14  ;;  %v5764_v14 = vld [vmem:[#allocation16 + $0x234] ss:$40 sps:$4 sm:$0xff]  }
 0x23d   :  { %6290 = vsinq.f32 %v402_v32  ;;  %905 = vmatpush1.bf16.msra.mxu0 %v5695_v1  ;;  %v5765_v1 = vld [vmem:[#allocation16 + $0x730] ss:$40 sps:$4 sm:$0xff]  }
 0x23e   :  { %906 = vmatprep.subr.bf16.mxu0 %v5696_v2  ;;  %v5770_v2 = vld [vmem:[#allocation16 + $0x284] ss:$40 sps:$4 sm:$0xff]  }
 0x241   :  { %907 = vmatpush1.bf16.msra.mxu0 %v5701_v6  ;;  %v5771_v6 = vld [vmem:[#allocation16 + $0x780] ss:$40 sps:$4 sm:$0xff]  }
 0x242   :  { %908 = vmatprep.subr.bf16.mxu0 %v5702_v7  ;;  %v5776_v7 = vld [vmem:[#allocation16 + $0x2d4] ss:$40 sps:$4 sm:$0xff]  }
 0x245   :  { %909 = vmatpush1.bf16.msra.mxu0 %v5707_v10  ;;  %v5777_v10 = vld [vmem:[#allocation16 + $0x7d0] ss:$40 sps:$4 sm:$0xff]  }
 0x246   :  { %v6289_v36 = vpop.eup %6288  ;;  %910 = vmatprep.subr.bf16.mxu0 %v5708_v11  ;;  %v5782_v11 = vld [vmem:[#allocation16 + $0x324] ss:$40 sps:$4 sm:$0xff]  }
 0x247   :  { %v6291_v37 = vpop.eup %6290  ;;  %v414_v38 = vxor.u32 2147483648, %v6289_v36 }
 0x248   :  { %v411_v39 = vxor.u32 2147483648, %v6291_v37 }
 0x249   :  { %v519_v15 = vsel %vm517_vm10, %v414_v38, %v6291_v37  ;;  %v415_v49 = vsel %vm413_vm1, %v414_v38, %v6291_v37  ;;  %911 = vmatpush1.bf16.msra.mxu0 %v5713_v16  ;;  %v5720_v37 = vld [vmem:[#allocation16] ss:$40 sps:$4 sm:$0xff]  }
 0x24a   :  { %v516_v40 = vsel %vm514_vm11, %v6289_v36, %v411_v39  ;;  %v412_v48 = vsel %vm410_vm15, %v6289_v36, %v411_v39  ;;  %912 = vmatprep.subr.bf16.mxu0 %v5714_v17  ;;  %v5723_v38 = vld [vmem:[#allocation16 + $0x500] ss:$40 sps:$4 sm:$0xff]   ;;  %v5788_v17 = vld [vmem:[#allocation16 + $0x374] ss:$40 sps:$4 sm:$0xff]  }
 0x24b   :  { %v520_v42 = vsel %vm513_vm12, %v516_v40, %v519_v15  ;;  %v416_v51 = vsel %vm409_vm2, %v412_v48, %v415_v49  ;;  %v5728_v15 = vld [vmem:[#allocation16 + $0x54] ss:$40 sps:$4 sm:$0xff]   ;;  %v5738_v49 = vld [vmem:[#allocation16 + $0xf0] ss:$40 sps:$4 sm:$0xff]   ;;  %v5783_v16 = vld [vmem:[#allocation16 + $0x820] ss:$40 sps:$4 sm:$0xff]  }
 0x24c   :  { %v521_v43 = vsel %vm406_vm13, nan, %v520_v42  ;;  %v417_v54 = vsel %vm406_vm13, nan, %v416_v51  ;;  %v5731_v40 = vld [vmem:[#allocation16 + $0x554] ss:$40 sps:$4 sm:$0xff]   ;;  %v5729_v42 = vld [vmem:[#allocation16 + $0x550] ss:$40 sps:$4 sm:$0xff]  }
 0x24d   :  { %v522_v45 = vpack.c.bf16 %v521_v43, %v521_v43  ;;  %v418_v56 = vpack.c.bf16 %v417_v54, %v417_v54  ;;  %913 = vmatpush1.bf16.msra.mxu0 %v5719_v20  ;;  %v5734_v43 = vld [vmem:[#allocation16 + $0xa4] ss:$40 sps:$4 sm:$0xff]   ;;  %v5743_v48 = vld [vmem:[#allocation16 + $0x5f4] ss:$40 sps:$4 sm:$0xff]   ;;  %v5747_v54 = vld [vmem:[#allocation16 + $0x640] ss:$40 sps:$4 sm:$0xff]  }
 0x24e   :  { %2958 = vmatprep.subr.bf16.mxu0 %v5722_v22  ;;  %v5746_v51 = vld [vmem:[#allocation16 + $0x144] ss:$40 sps:$4 sm:$0xff]   ;;  %v5789_v20 = vld [vmem:[#allocation16 + $0x870] ss:$40 sps:$4 sm:$0xff]  }
 0x24f   :  { %5385 = vmatmul.mubr.msk.bf16.vlgmr.msra.gmra.mrb[0].mxu1 %vm563_vm14, %v522_v45  ;;  %v5732_v45 = vld [vmem:[#allocation16 + $0xa0] ss:$40 sps:$4 sm:$0xff]   ;;  %v5797_v22 = vld [vmem:[#allocation16 + $0x8c4] ss:$40 sps:$4 sm:$0xff]  }
 0x250   :  { %5389 = vmatpush3.bf16.msra.mxu1 %v5668_v44  ;;  %5396 = vmatprep.mubr.msk.bf16.mxu1 %vm6768_vm0, %v6767_v4  ;;  %v5737_v44 = vld [vmem:[#allocation16 + $0x5a4] ss:$40 sps:$4 sm:$0xff]  }
 0x251   :  { %5390 = vmatprep.subr.bf16.mxu1 %v6767_v4 }
 0x254   :  { %5391 = vmatpush3.bf16.msra.mxu1 %v5669_v47  ;;  %v5740_v47 = vld [vmem:[#allocation16 + $0xf4] ss:$40 sps:$4 sm:$0xff]  }
 0x255   :  { %5392 = vmatprep.subr.bf16.mxu1 %v6767_v4 }
 0x258   :  { %5393 = vmatpush3.bf16.msra.mxu1 %v5670_v50  ;;  %v5741_v50 = vld [vmem:[#allocation16 + $0x5f0] ss:$40 sps:$4 sm:$0xff]  }
 0x259   :  { %5394 = vmatprep.subr.bf16.mxu1 %v6767_v4 }
 0x25c   :  { %5395 = vmatpush3.bf16.msra.mxu1 %v5671_v52  ;;  %v5749_v52 = vld [vmem:[#allocation16 + $0x644] ss:$40 sps:$4 sm:$0xff]  }
 0x25d   :  { %939 = vmatprep.subr.bf16.mxu1 %v5676_v53  ;;  %v5744_v53 = vld [vmem:[#allocation16 + $0x140] ss:$40 sps:$4 sm:$0xff]  }
 0x25f   :  { %5397 = vmatmul.mubr.msk.bf16.vlgmr.msra.gmra.mrb[4].mxu1 %vm563_vm14, %v418_v56  ;;  %v5755_v56 = vld [vmem:[#allocation16 + $0x694] ss:$40 sps:$4 sm:$0xff]  }
 0x260   :  { %940 = vmatpush1.bf16.msra.mxu1 %v5674_v55  ;;  %971 = vmatprep.mubr.bf16.mxu1 %v6775_v21  ;;  %v5752_v55 = vld [vmem:[#allocation16 + $0x194] ss:$40 sps:$4 sm:$0xff]   ;;  %v5794_v21 = vld [vmem:[#allocation16 + $0x3c4] ss:$40 sps:$4 sm:$0xff]  }
 0x261   :  { %941 = vmatprep.subr.bf16.mxu1 %v5682_v57  ;;  %v5750_v57 = vld [vmem:[#allocation16 + $0x190] ss:$40 sps:$4 sm:$0xff]  }
 0x264   :  { %942 = vmatpush1.bf16.msra.mxu1 %v5680_v58  ;;  %v5753_v58 = vld [vmem:[#allocation16 + $0x690] ss:$40 sps:$4 sm:$0xff]  }
 0x265   :  { %943 = vmatprep.subr.bf16.mxu1 %v5688_v60  ;;  %v5761_v60 = vld [vmem:[#allocation16 + $0x6e4] ss:$40 sps:$4 sm:$0xff]  }
 0x268   :  { %944 = vmatpush1.bf16.msra.mxu1 %v5686_v61  ;;  %v5756_v61 = vld [vmem:[#allocation16 + $0x1e0] ss:$40 sps:$4 sm:$0xff]  }
 0x269   :  { %945 = vmatprep.subr.bf16.mxu1 %v5694_v0  ;;  %v5762_v0 = vld [vmem:[#allocation16 + $0x230] ss:$40 sps:$4 sm:$0xff]  }
 0x26c   :  { %946 = vmatpush1.bf16.msra.mxu1 %v5692_v63  ;;  %v5767_v63 = vld [vmem:[#allocation16 + $0x734] ss:$40 sps:$4 sm:$0xff]  }
 0x26d   :  { %947 = vmatprep.subr.bf16.mxu1 %v5700_v3  ;;  %v5773_v3 = vld [vmem:[#allocation16 + $0x784] ss:$40 sps:$4 sm:$0xff]  }
 0x270   :  { %948 = vmatpush1.bf16.msra.mxu1 %v5698_v5  ;;  %v5768_v5 = vld [vmem:[#allocation16 + $0x280] ss:$40 sps:$4 sm:$0xff]  }
 0x271   :  { %949 = vmatprep.subr.bf16.mxu1 %v5706_v8  ;;  %v5779_v8 = vld [vmem:[#allocation16 + $0x7d4] ss:$40 sps:$4 sm:$0xff]  }
 0x274   :  { %950 = vmatpush1.bf16.msra.mxu1 %v5704_v9  ;;  %v5774_v9 = vld [vmem:[#allocation16 + $0x2d0] ss:$40 sps:$4 sm:$0xff]  }
 0x275   :  { %951 = vmatprep.subr.bf16.mxu1 %v5712_v12  ;;  %v5785_v12 = vld [vmem:[#allocation16 + $0x824] ss:$40 sps:$4 sm:$0xff]  }
 0x278   :  { %952 = vmatpush1.bf16.msra.mxu1 %v5710_v13  ;;  %v5780_v13 = vld [vmem:[#allocation16 + $0x320] ss:$40 sps:$4 sm:$0xff]  }
 0x279   :  { %953 = vmatprep.subr.bf16.mxu1 %v5718_v18  ;;  %v5791_v18 = vld [vmem:[#allocation16 + $0x874] ss:$40 sps:$4 sm:$0xff]  }
 0x27c   :  { %954 = vmatpush1.bf16.msra.mxu1 %v5716_v19  ;;  %v5786_v19 = vld [vmem:[#allocation16 + $0x370] ss:$40 sps:$4 sm:$0xff]  }
 0x27d   :  { %2999 = vmatprep.subr.bf16.mxu1 %v5725_v23  ;;  %v5792_v23 = vld [vmem:[#allocation16 + $0x3c0] ss:$40 sps:$4 sm:$0xff]  }
 0x322   :  { %v601_v25 = vpop.f32.mrb[0].mxu1 }
 0x323   :  { %v5386_v26 = vpop.f32.mrb[1].mxu1 }
 0x324   :  { %v604_v27 = vpop.f32.mrb[2].mxu1  ;;  %v5800_v26 = vld [vmem:[#allocation16 + $0x414] ss:$40 sps:$4 sm:$0xff]  }
 0x325   :  { %v5387_v28 = vpop.f32.mrb[3].mxu1  ;;  %v5803_v27 = vld [vmem:[#allocation16 + $0x914] ss:$40 sps:$4 sm:$0xff]  }
 0x326   :  { %v5798_v28 = vld [vmem:[#allocation16 + $0x410] ss:$40 sps:$4 sm:$0xff]  }
 0x332   :  { %v668_v29 = vpop.f32.mrb[4].mxu1 }
 0x333   :  { %v669_v31 = vadd.f32 %v668_v29, %v601_v25  ;;  %v5398_v32 = vpop.f32.mrb[5].mxu1  ;;  %v5795_v25 = vld [vmem:[#allocation16 + $0x8c0] ss:$40 sps:$4 sm:$0xff]   ;;  %v5801_v29 = vld [vmem:[#allocation16 + $0x910] ss:$40 sps:$4 sm:$0xff]  }
 0x334   :  { %v671_v33 = vpop.f32.mrb[6].mxu1  ;;  %v5804_v32 = vld [vmem:[#allocation16 + $0x460] ss:$40 sps:$4 sm:$0xff]  }
 0x335   :  { %v681_v34 = vadd.f32 %v4802_v30, %v669_v31  ;;  %v5399_v35 = vpop.f32.mrb[7].mxu1  ;;  %v5806_v30 = vld [vmem:[#allocation16 + $0x464] ss:$40 sps:$4 sm:$0xff]   ;;  %v5807_v33 = vld [vmem:[#allocation16 + $0x960] ss:$40 sps:$4 sm:$0xff]  }
 0x336   :  { %v5809_v31 = vld [vmem:[#allocation16 + $0x964] ss:$40 sps:$4 sm:$0xff]   ;;  %v5815_v35 = vld [vmem:[#allocation16 + $0x9b4] ss:$40 sps:$4 sm:$0xff]  }
 0x337   :  { %v682_v36 = vmax.f32 %v681_v34, 0.0  ;;  %v5812_v34 = vld [vmem:[#allocation16 + $0x4b4] ss:$40 sps:$4 sm:$0xff]  }
 0x339   :  { %v683_v39 = vpack.c.bf16 %v682_v36, %v682_v36  ;;  %v5810_v36 = vld [vmem:[#allocation16 + $0x4b0] ss:$40 sps:$4 sm:$0xff]  }
 0x33b   :  { %931 = vmatmul.mubr.bf16.vlgmr.msra.gmra.mrb[0].mxu0 %v683_v39  ;;  %972 = vmatmul.mubr.bf16.vlgmr.msra.gmra.mrb[8].mxu1 %v683_v39  ;;  %v5821_v39 = vld [vmem:[#allocation16 + $0x50c] ss:$40 sps:$4 sm:$0xff]  }
 0x33c   :  { %2959 = vmatpush1.bf16.msra.mxu0 %v5720_v37  ;;  %3000 = vmatpush1.bf16.msra.mxu1 %v5723_v38  ;;  %v5813_v37 = vld [vmem:[#allocation16 + $0x9b0] ss:$40 sps:$4 sm:$0xff]   ;;  %v5818_v38 = vld [vmem:[#allocation16 + $0xc] ss:$40 sps:$4 sm:$0xff]  }
 0x33d   :  { %2960 = vmatprep.subr.bf16.mxu0 %v5728_v15  ;;  %3001 = vmatprep.subr.bf16.mxu1 %v5731_v40  ;;  %v718_v15 = vlaneseq }
 0x33f   :  { %v7189_v40 = vshrl.u32 %v718_v15, 7  ;;  %v5872_v15 = vld [vmem:[#allocation16 + $0x2dc] ss:$40 sps:$4 sm:$0xff]  }
 0x340   :  { %2961 = vmatpush1.bf16.msra.mxu0 %v5726_v41  ;;  %3002 = vmatpush1.bf16.msra.mxu1 %v5729_v42 }
 0x341   :  { %2962 = vmatprep.subr.bf16.mxu0 %v5734_v43  ;;  %3003 = vmatprep.subr.bf16.mxu1 %v5737_v44  ;;  %v7192_v41 = vsub.s32 0, %v7189_v40  ;;  %v728_v42 = vsub.s32 2, %v7189_v40  ;;  %v716_v43 = vld [vmem:[#allocation15] sm:$0xf]  ;;  %v7196_v44 = vsub.s32 1, %v7189_v40 }
 0x344   :  { %2963 = vmatpush1.bf16.msra.mxu0 %v5732_v45  ;;  %3004 = vmatpush1.bf16.msra.mxu1 %v5735_v46  ;;  %v732_v45 = vsub.s32 3, %v7189_v40  ;;  %v721_v46 = vrot.slane %v716_v43, %v7192_v41 }
 0x345   :  { %2964 = vmatprep.subr.bf16.mxu0 %v5740_v47  ;;  %3005 = vmatprep.subr.bf16.mxu1 %v5743_v48  ;;  %v729_v47 = vrot.slane %v716_v43, %v728_v42  ;;  %v725_v48 = vrot.slane %v716_v43, %v7196_v44 }
 0x348   :  { %2965 = vmatpush1.bf16.msra.mxu0 %v5738_v49  ;;  %3006 = vmatpush1.bf16.msra.mxu1 %v5741_v50  ;;  %v733_v49 = vrot.slane %v716_v43, %v732_v45  ;;  %v5875_v43 = vld [vmem:[#allocation16 + $0x7dc] ss:$40 sps:$4 sm:$0xff]  }
 0x349   :  { %2966 = vmatprep.subr.bf16.mxu0 %v5746_v51  ;;  %3007 = vmatprep.subr.bf16.mxu1 %v5749_v52 }
 0x34c   :  { %2967 = vmatpush1.bf16.msra.mxu0 %v5744_v53  ;;  %3008 = vmatpush1.bf16.msra.mxu1 %v5747_v54 }
 0x34d   :  { %2968 = vmatprep.subr.bf16.mxu0 %v5752_v55  ;;  %3009 = vmatprep.subr.bf16.mxu1 %v5755_v56 }
 0x350   :  { %2969 = vmatpush1.bf16.msra.mxu0 %v5750_v57  ;;  %3010 = vmatpush1.bf16.msra.mxu1 %v5753_v58 }
 0x351   :  { %2970 = vmatprep.subr.bf16.mxu0 %v5758_v59  ;;  %3011 = vmatprep.subr.bf16.mxu1 %v5761_v60 }
 0x354   :  { %2971 = vmatpush1.bf16.msra.mxu0 %v5756_v61  ;;  %3012 = vmatpush1.bf16.msra.mxu1 %v5759_v62 }
 0x355   :  { %2972 = vmatprep.subr.bf16.mxu0 %v5764_v14  ;;  %3013 = vmatprep.subr.bf16.mxu1 %v5767_v63  ;;  %v5816_v63 = vld [vmem:[#allocation16 + $0x8] ss:$40 sps:$4 sm:$0xff]  }
 0x358   :  { %2973 = vmatpush1.bf16.msra.mxu0 %v5762_v0  ;;  %3014 = vmatpush1.bf16.msra.mxu1 %v5765_v1  ;;  %v5819_v0 = vld [vmem:[#allocation16 + $0x508] ss:$40 sps:$4 sm:$0xff]  }
 0x359   :  { %2974 = vmatprep.subr.bf16.mxu0 %v5770_v2  ;;  %3015 = vmatprep.subr.bf16.mxu1 %v5773_v3  ;;  %v5824_v3 = vld [vmem:[#allocation16 + $0x5c] ss:$40 sps:$4 sm:$0xff]  }
 0x35c   :  { %2975 = vmatpush1.bf16.msra.mxu0 %v5768_v5  ;;  %3016 = vmatpush1.bf16.msra.mxu1 %v5771_v6  ;;  %v5827_v5 = vld [vmem:[#allocation16 + $0x55c] ss:$40 sps:$4 sm:$0xff]   ;;  %v5822_v6 = vld [vmem:[#allocation16 + $0x58] ss:$40 sps:$4 sm:$0xff]  }
 0x35d   :  { %2976 = vmatprep.subr.bf16.mxu0 %v5776_v7  ;;  %3017 = vmatprep.subr.bf16.mxu1 %v5779_v8  ;;  %v5825_v7 = vld [vmem:[#allocation16 + $0x558] ss:$40 sps:$4 sm:$0xff]   ;;  %v5830_v8 = vld [vmem:[#allocation16 + $0xac] ss:$40 sps:$4 sm:$0xff]  }
 0x360   :  { %2977 = vmatpush1.bf16.msra.mxu0 %v5774_v9  ;;  %3018 = vmatpush1.bf16.msra.mxu1 %v5777_v10  ;;  %v5833_v9 = vld [vmem:[#allocation16 + $0x5ac] ss:$40 sps:$4 sm:$0xff]   ;;  %v5828_v10 = vld [vmem:[#allocation16 + $0xa8] ss:$40 sps:$4 sm:$0xff]  }
 0x361   :  { %2978 = vmatprep.subr.bf16.mxu0 %v5782_v11  ;;  %3019 = vmatprep.subr.bf16.mxu1 %v5785_v12  ;;  %v5831_v11 = vld [vmem:[#allocation16 + $0x5a8] ss:$40 sps:$4 sm:$0xff]   ;;  %v5836_v12 = vld [vmem:[#allocation16 + $0xfc] ss:$40 sps:$4 sm:$0xff]  }
 0x364   :  { %2979 = vmatpush1.bf16.msra.mxu0 %v5780_v13  ;;  %3020 = vmatpush1.bf16.msra.mxu1 %v5783_v16  ;;  %v5839_v13 = vld [vmem:[#allocation16 + $0x5fc] ss:$40 sps:$4 sm:$0xff]   ;;  %v5834_v16 = vld [vmem:[#allocation16 + $0xf8] ss:$40 sps:$4 sm:$0xff]  }
 0x365   :  { %2980 = vmatprep.subr.bf16.mxu0 %v5788_v17  ;;  %3021 = vmatprep.subr.bf16.mxu1 %v5791_v18  ;;  %v5837_v17 = vld [vmem:[#allocation16 + $0x5f8] ss:$40 sps:$4 sm:$0xff]   ;;  %v5842_v18 = vld [vmem:[#allocation16 + $0x14c] ss:$40 sps:$4 sm:$0xff]  }
 0x368   :  { %2981 = vmatpush1.bf16.msra.mxu0 %v5786_v19  ;;  %3022 = vmatpush1.bf16.msra.mxu1 %v5789_v20  ;;  %v5845_v19 = vld [vmem:[#allocation16 + $0x64c] ss:$40 sps:$4 sm:$0xff]   ;;  %v5840_v20 = vld [vmem:[#allocation16 + $0x148] ss:$40 sps:$4 sm:$0xff]  }
 0x369   :  { %2982 = vmatprep.subr.bf16.mxu0 %v5794_v21  ;;  %3023 = vmatprep.subr.bf16.mxu1 %v5797_v22  ;;  %v5843_v21 = vld [vmem:[#allocation16 + $0x648] ss:$40 sps:$4 sm:$0xff]   ;;  %v5848_v22 = vld [vmem:[#allocation16 + $0x19c] ss:$40 sps:$4 sm:$0xff]  }
 0x36c   :  { %2983 = vmatpush1.bf16.msra.mxu0 %v5792_v23  ;;  %3024 = vmatpush1.bf16.msra.mxu1 %v5795_v25  ;;  %v5851_v23 = vld [vmem:[#allocation16 + $0x69c] ss:$40 sps:$4 sm:$0xff]   ;;  %v5846_v25 = vld [vmem:[#allocation16 + $0x198] ss:$40 sps:$4 sm:$0xff]  }
 0x36d   :  { %2984 = vmatprep.subr.bf16.mxu0 %v5800_v26  ;;  %3025 = vmatprep.subr.bf16.mxu1 %v5803_v27  ;;  %v5849_v26 = vld [vmem:[#allocation16 + $0x698] ss:$40 sps:$4 sm:$0xff]   ;;  %v5854_v27 = vld [vmem:[#allocation16 + $0x1ec] ss:$40 sps:$4 sm:$0xff]  }
 0x370   :  { %2985 = vmatpush1.bf16.msra.mxu0 %v5798_v28  ;;  %3026 = vmatpush1.bf16.msra.mxu1 %v5801_v29  ;;  %v5857_v28 = vld [vmem:[#allocation16 + $0x6ec] ss:$40 sps:$4 sm:$0xff]   ;;  %v5852_v29 = vld [vmem:[#allocation16 + $0x1e8] ss:$40 sps:$4 sm:$0xff]  }
 0x371   :  { %2986 = vmatprep.subr.bf16.mxu0 %v5806_v30  ;;  %3027 = vmatprep.subr.bf16.mxu1 %v5809_v31  ;;  %v5855_v30 = vld [vmem:[#allocation16 + $0x6e8] ss:$40 sps:$4 sm:$0xff]   ;;  %v5860_v31 = vld [vmem:[#allocation16 + $0x23c] ss:$40 sps:$4 sm:$0xff]  }
 0x374   :  { %2987 = vmatpush1.bf16.msra.mxu0 %v5804_v32  ;;  %3028 = vmatpush1.bf16.msra.mxu1 %v5807_v33  ;;  %v5863_v32 = vld [vmem:[#allocation16 + $0x73c] ss:$40 sps:$4 sm:$0xff]   ;;  %v6776_v33 = vmov 1  }
 0x375   :  { %2988 = vmatprep.subr.bf16.mxu0 %v5812_v34  ;;  %3029 = vmatprep.subr.bf16.mxu1 %v5815_v35  ;;  %v5858_v34 = vld [vmem:[#allocation16 + $0x238] ss:$40 sps:$4 sm:$0xff]  }
 0x376   :  { %5662 = vset.pattern.permute.xlu1 %v6776_v33  ;;  %5663 = vset.pattern.permute.xlu0 %v6776_v33  ;;  %v5861_v35 = vld [vmem:[#allocation16 + $0x738] ss:$40 sps:$4 sm:$0xff]  }
 0x377   :  { %3383 = vperm.xlu1 %5662, %v7186_v24   ;;  %v5873_v24 = vld [vmem:[#allocation16 + $0x7d8] ss:$40 sps:$4 sm:$0xff]  }
 0x378   :  { %2989 = vmatpush1.bf16.msra.mxu0 %v5810_v36  ;;  %3030 = vmatpush1.bf16.msra.mxu1 %v5813_v37  ;;  %v5866_v36 = vld [vmem:[#allocation16 + $0x28c] ss:$40 sps:$4 sm:$0xff]   ;;  %v5939_v33 = vld [vmem:[#allocation16 + $0x650] ss:$40 sps:$4 sm:$0xff]  }
 0x379   :  { %3040 = vmatprep.subr.bf16.mxu0 %v5818_v38  ;;  %3081 = vmatprep.subr.bf16.mxu1 %v5821_v39  ;;  %v5869_v37 = vld [vmem:[#allocation16 + $0x78c] ss:$40 sps:$4 sm:$0xff]   ;;  %v5864_v38 = vld [vmem:[#allocation16 + $0x288] ss:$40 sps:$4 sm:$0xff]  }
 0x37a   :  { %v5867_v39 = vld [vmem:[#allocation16 + $0x788] ss:$40 sps:$4 sm:$0xff]  }
 0x40e   :  { %v932_v50 = vpop.f32.mrb[0].mxu0  ;;  %v973_v51 = vpop.f32.mrb[8].mxu1 }
 0x40f   :  { %v933_v52 = vadd.f32 %v932_v50, %v721_v46  ;;  %v974_v53 = vadd.f32 %v973_v51, %v729_v47  ;;  %v934_v54 = vpop.f32.mrb[1].mxu0  ;;  %v975_v55 = vpop.f32.mrb[9].mxu1  ;;  %v5870_v46 = vld [vmem:[#allocation16 + $0x2d8] ss:$40 sps:$4 sm:$0xff]   ;;  %v5878_v47 = vld [vmem:[#allocation16 + $0x32c] ss:$40 sps:$4 sm:$0xff]  }
 0x410   :  { %v935_v56 = vadd.f32 %v934_v54, %v725_v48  ;;  %v976_v57 = vadd.f32 %v975_v55, %v733_v49  ;;  %v936_v58 = vpop.f32.mrb[2].mxu0  ;;  %v977_v59 = vpop.f32.mrb[10].mxu1  ;;  %v5881_v48 = vld [vmem:[#allocation16 + $0x82c] ss:$40 sps:$4 sm:$0xff]   ;;  %v5876_v49 = vld [vmem:[#allocation16 + $0x328] ss:$40 sps:$4 sm:$0xff]  }
 0x411   :  { %v937_v60 = vpop.f32.mrb[3].mxu0  ;;  %v978_v61 = vpop.f32.mrb[11].mxu1  ;;  %v7209_v1 = vpack.c.bf16 %v933_v52, %v933_v52  ;;  %v7211_v2 = vpack.c.bf16 %v974_v53, %v974_v53  ;;  %v5879_v50 = vld [vmem:[#allocation16 + $0x828] ss:$40 sps:$4 sm:$0xff]   ;;  %v5884_v51 = vld [vmem:[#allocation16 + $0x37c] ss:$40 sps:$4 sm:$0xff]  }
 0x412   :  { %v7205_v62 = vpack.c.bf16 %v935_v56, %v935_v56  ;;  %v7207_v14 = vpack.c.bf16 %v976_v57, %v976_v57  ;;  %v5887_v52 = vld [vmem:[#allocation16 + $0x87c] ss:$40 sps:$4 sm:$0xff]   ;;  %v5882_v53 = vld [vmem:[#allocation16 + $0x378] ss:$40 sps:$4 sm:$0xff]   ;;  %v5890_v55 = vld [vmem:[#allocation16 + $0x3cc] ss:$40 sps:$4 sm:$0xff]  }
 0x413   :  { %v5885_v54 = vld [vmem:[#allocation16 + $0x878] ss:$40 sps:$4 sm:$0xff]   ;;  %v5893_v56 = vld [vmem:[#allocation16 + $0x8cc] ss:$40 sps:$4 sm:$0xff]   ;;  %v5888_v57 = vld [vmem:[#allocation16 + $0x3c8] ss:$40 sps:$4 sm:$0xff]  }
 0x414   :  { %2990 = vmatprep.mubr.bf16.mxu0 %v7205_v62  ;;  %3031 = vmatprep.mubr.bf16.mxu1 %v7207_v14  ;;  %v5891_v58 = vld [vmem:[#allocation16 + $0x8c8] ss:$40 sps:$4 sm:$0xff]   ;;  %v5896_v59 = vld [vmem:[#allocation16 + $0x41c] ss:$40 sps:$4 sm:$0xff]   ;;  %v5894_v61 = vld [vmem:[#allocation16 + $0x418] ss:$40 sps:$4 sm:$0xff]  }
 0x415   :  { %2991 = vmatmul.mubr.bf16.vlgmr.msra.gmra.mrb[4].mxu0 %v7209_v1  ;;  %3032 = vmatmul.mubr.bf16.vlgmr.msra.gmra.mrb[12].mxu1 %v7211_v2  ;;  %v5899_v60 = vld [vmem:[#allocation16 + $0x91c] ss:$40 sps:$4 sm:$0xff]  }
 0x416   :  { %3041 = vmatpush1.bf16.msra.mxu0 %v5816_v63  ;;  %3082 = vmatpush1.bf16.msra.mxu1 %v5819_v0  ;;  %v5897_v63 = vld [vmem:[#allocation16 + $0x918] ss:$40 sps:$4 sm:$0xff]   ;;  %v5902_v0 = vld [vmem:[#allocation16 + $0x46c] ss:$40 sps:$4 sm:$0xff]  }
 0x417   :  { %3072 = vmatprep.mubr.bf16.mxu0 %v7205_v62  ;;  %3113 = vmatprep.mubr.bf16.mxu1 %v7207_v14 }
 0x418   :  { %3042 = vmatprep.subr.bf16.mxu0 %v5824_v3  ;;  %3083 = vmatprep.subr.bf16.mxu1 %v5827_v5  ;;  %v5905_v3 = vld [vmem:[#allocation16 + $0x96c] ss:$40 sps:$4 sm:$0xff]   ;;  %v5900_v5 = vld [vmem:[#allocation16 + $0x468] ss:$40 sps:$4 sm:$0xff]  }
 0x41a   :  { %3043 = vmatpush1.bf16.msra.mxu0 %v5822_v6  ;;  %3084 = vmatpush1.bf16.msra.mxu1 %v5825_v7  ;;  %v5903_v6 = vld [vmem:[#allocation16 + $0x968] ss:$40 sps:$4 sm:$0xff]   ;;  %v5908_v7 = vld [vmem:[#allocation16 + $0x4bc] ss:$40 sps:$4 sm:$0xff]  }
 0x41b   :  { %3044 = vmatprep.subr.bf16.mxu0 %v5830_v8  ;;  %3085 = vmatprep.subr.bf16.mxu1 %v5833_v9  ;;  %v5911_v8 = vld [vmem:[#allocation16 + $0x9bc] ss:$40 sps:$4 sm:$0xff]   ;;  %v5906_v9 = vld [vmem:[#allocation16 + $0x4b8] ss:$40 sps:$4 sm:$0xff]  }
 0x41e   :  { %3045 = vmatpush1.bf16.msra.mxu0 %v5828_v10  ;;  %3086 = vmatpush1.bf16.msra.mxu1 %v5831_v11  ;;  %v5909_v10 = vld [vmem:[#allocation16 + $0x9b8] ss:$40 sps:$4 sm:$0xff]   ;;  %v5914_v11 = vld [vmem:[#allocation16 + $0x14] ss:$40 sps:$4 sm:$0xff]  }
 0x41f   :  { %3046 = vmatprep.subr.bf16.mxu0 %v5836_v12  ;;  %3087 = vmatprep.subr.bf16.mxu1 %v5839_v13  ;;  %v5917_v12 = vld [vmem:[#allocation16 + $0x514] ss:$40 sps:$4 sm:$0xff]   ;;  %v5912_v13 = vld [vmem:[#allocation16 + $0x10] ss:$40 sps:$4 sm:$0xff]  }
 0x422   :  { %3047 = vmatpush1.bf16.msra.mxu0 %v5834_v16  ;;  %3088 = vmatpush1.bf16.msra.mxu1 %v5837_v17  ;;  %v5915_v16 = vld [vmem:[#allocation16 + $0x510] ss:$40 sps:$4 sm:$0xff]   ;;  %v5920_v17 = vld [vmem:[#allocation16 + $0x64] ss:$40 sps:$4 sm:$0xff]  }
 0x423   :  { %3048 = vmatprep.subr.bf16.mxu0 %v5842_v18  ;;  %3089 = vmatprep.subr.bf16.mxu1 %v5845_v19  ;;  %v5923_v18 = vld [vmem:[#allocation16 + $0x564] ss:$40 sps:$4 sm:$0xff]   ;;  %v5918_v19 = vld [vmem:[#allocation16 + $0x60] ss:$40 sps:$4 sm:$0xff]  }
 0x426   :  { %3049 = vmatpush1.bf16.msra.mxu0 %v5840_v20  ;;  %3090 = vmatpush1.bf16.msra.mxu1 %v5843_v21  ;;  %v5921_v20 = vld [vmem:[#allocation16 + $0x560] ss:$40 sps:$4 sm:$0xff]   ;;  %v5926_v21 = vld [vmem:[#allocation16 + $0xb4] ss:$40 sps:$4 sm:$0xff]  }
 0x427   :  { %3050 = vmatprep.subr.bf16.mxu0 %v5848_v22  ;;  %3091 = vmatprep.subr.bf16.mxu1 %v5851_v23  ;;  %v5929_v22 = vld [vmem:[#allocation16 + $0x5b4] ss:$40 sps:$4 sm:$0xff]   ;;  %v5924_v23 = vld [vmem:[#allocation16 + $0xb0] ss:$40 sps:$4 sm:$0xff]  }
 0x42a   :  { %3051 = vmatpush1.bf16.msra.mxu0 %v5846_v25  ;;  %3092 = vmatpush1.bf16.msra.mxu1 %v5849_v26  ;;  %v5927_v25 = vld [vmem:[#allocation16 + $0x5b0] ss:$40 sps:$4 sm:$0xff]   ;;  %v5932_v26 = vld [vmem:[#allocation16 + $0x104] ss:$40 sps:$4 sm:$0xff]  }
 0x42b   :  { %3052 = vmatprep.subr.bf16.mxu0 %v5854_v27  ;;  %3093 = vmatprep.subr.bf16.mxu1 %v5857_v28  ;;  %v5935_v27 = vld [vmem:[#allocation16 + $0x604] ss:$40 sps:$4 sm:$0xff]   ;;  %v5930_v28 = vld [vmem:[#allocation16 + $0x100] ss:$40 sps:$4 sm:$0xff]  }
 0x42e   :  { %3053 = vmatpush1.bf16.msra.mxu0 %v5852_v29  ;;  %3094 = vmatpush1.bf16.msra.mxu1 %v5855_v30  ;;  %v5933_v29 = vld [vmem:[#allocation16 + $0x600] ss:$40 sps:$4 sm:$0xff]   ;;  %v5938_v30 = vld [vmem:[#allocation16 + $0x154] ss:$40 sps:$4 sm:$0xff]  }
 0x42f   :  { %3054 = vmatprep.subr.bf16.mxu0 %v5860_v31  ;;  %3095 = vmatprep.subr.bf16.mxu1 %v5863_v32  ;;  %v5941_v31 = vld [vmem:[#allocation16 + $0x654] ss:$40 sps:$4 sm:$0xff]   ;;  %v5936_v32 = vld [vmem:[#allocation16 + $0x150] ss:$40 sps:$4 sm:$0xff]  }
 0x432   :  { %3055 = vmatpush1.bf16.msra.mxu0 %v5858_v34  ;;  %3096 = vmatpush1.bf16.msra.mxu1 %v5861_v35  ;;  %v5944_v34 = vld [vmem:[#allocation16 + $0x1a4] ss:$40 sps:$4 sm:$0xff]  }
 0x433   :  { %3056 = vmatprep.subr.bf16.mxu0 %v5866_v36  ;;  %3097 = vmatprep.subr.bf16.mxu1 %v5869_v37  ;;  %v5947_v35 = vld [vmem:[#allocation16 + $0x6a4] ss:$40 sps:$4 sm:$0xff]   ;;  %v5942_v36 = vld [vmem:[#allocation16 + $0x1a0] ss:$40 sps:$4 sm:$0xff]  }
 0x434   :  { %v5945_v37 = vld [vmem:[#allocation16 + $0x6a0] ss:$40 sps:$4 sm:$0xff]  }
 0x436   :  { %3057 = vmatpush1.bf16.msra.mxu0 %v5864_v38  ;;  %3098 = vmatpush1.bf16.msra.mxu1 %v5867_v39  ;;  %v5950_v38 = vld [vmem:[#allocation16 + $0x1f4] ss:$40 sps:$4 sm:$0xff]  }
 0x437   :  { %3058 = vmatprep.subr.bf16.mxu0 %v5872_v15  ;;  %3099 = vmatprep.subr.bf16.mxu1 %v5875_v43  ;;  %v5953_v39 = vld [vmem:[#allocation16 + $0x6f4] ss:$40 sps:$4 sm:$0xff]   ;;  %v5948_v15 = vld [vmem:[#allocation16 + $0x1f0] ss:$40 sps:$4 sm:$0xff]  }
 0x438   :  { %v5951_v43 = vld [vmem:[#allocation16 + $0x6f0] ss:$40 sps:$4 sm:$0xff]  }
 0x43a   :  { %3059 = vmatpush1.bf16.msra.mxu0 %v5870_v46  ;;  %3100 = vmatpush1.bf16.msra.mxu1 %v5873_v24  ;;  %v5956_v46 = vld [vmem:[#allocation16 + $0x244] ss:$40 sps:$4 sm:$0xff]  }
 0x43b   :  { %3060 = vmatprep.subr.bf16.mxu0 %v5878_v47  ;;  %3101 = vmatprep.subr.bf16.mxu1 %v5881_v48  ;;  %v5959_v24 = vld [vmem:[#allocation16 + $0x744] ss:$40 sps:$4 sm:$0xff]   ;;  %v5954_v47 = vld [vmem:[#allocation16 + $0x240] ss:$40 sps:$4 sm:$0xff]  }
 0x43c   :  { %v5957_v48 = vld [vmem:[#allocation16 + $0x740] ss:$40 sps:$4 sm:$0xff]  }
 0x43e   :  { %3061 = vmatpush1.bf16.msra.mxu0 %v5876_v49  ;;  %3102 = vmatpush1.bf16.msra.mxu1 %v5879_v50  ;;  %v5962_v49 = vld [vmem:[#allocation16 + $0x294] ss:$40 sps:$4 sm:$0xff]  }
 0x43f   :  { %3062 = vmatprep.subr.bf16.mxu0 %v5884_v51  ;;  %3103 = vmatprep.subr.bf16.mxu1 %v5887_v52  ;;  %v5965_v50 = vld [vmem:[#allocation16 + $0x794] ss:$40 sps:$4 sm:$0xff]   ;;  %v5960_v51 = vld [vmem:[#allocation16 + $0x290] ss:$40 sps:$4 sm:$0xff]  }
 0x440   :  { %v5963_v52 = vld [vmem:[#allocation16 + $0x790] ss:$40 sps:$4 sm:$0xff]  }
 0x442   :  { %3063 = vmatpush1.bf16.msra.mxu0 %v5882_v53  ;;  %3104 = vmatpush1.bf16.msra.mxu1 %v5885_v54  ;;  %v5968_v53 = vld [vmem:[#allocation16 + $0x2e4] ss:$40 sps:$4 sm:$0xff]  }
 0x443   :  { %3064 = vmatprep.subr.bf16.mxu0 %v5890_v55  ;;  %3105 = vmatprep.subr.bf16.mxu1 %v5893_v56  ;;  %v5971_v54 = vld [vmem:[#allocation16 + $0x7e4] ss:$40 sps:$4 sm:$0xff]   ;;  %v5966_v55 = vld [vmem:[#allocation16 + $0x2e0] ss:$40 sps:$4 sm:$0xff]  }
 0x444   :  { %v5969_v56 = vld [vmem:[#allocation16 + $0x7e0] ss:$40 sps:$4 sm:$0xff]  }
 0x446   :  { %3065 = vmatpush1.bf16.msra.mxu0 %v5888_v57  ;;  %3106 = vmatpush1.bf16.msra.mxu1 %v5891_v58  ;;  %v5974_v57 = vld [vmem:[#allocation16 + $0x334] ss:$40 sps:$4 sm:$0xff]  }
 0x447   :  { %3066 = vmatprep.subr.bf16.mxu0 %v5896_v59  ;;  %3107 = vmatprep.subr.bf16.mxu1 %v5899_v60  ;;  %v5977_v58 = vld [vmem:[#allocation16 + $0x834] ss:$40 sps:$4 sm:$0xff]   ;;  %v5972_v59 = vld [vmem:[#allocation16 + $0x330] ss:$40 sps:$4 sm:$0xff]  }
 0x448   :  { %v5975_v60 = vld [vmem:[#allocation16 + $0x830] ss:$40 sps:$4 sm:$0xff]  }
 0x44a   :  { %3067 = vmatpush1.bf16.msra.mxu0 %v5894_v61  ;;  %3108 = vmatpush1.bf16.msra.mxu1 %v5897_v63  ;;  %v5980_v61 = vld [vmem:[#allocation16 + $0x384] ss:$40 sps:$4 sm:$0xff]  }
 0x44b   :  { %3068 = vmatprep.subr.bf16.mxu0 %v5902_v0  ;;  %3109 = vmatprep.subr.bf16.mxu1 %v5905_v3  ;;  %v5983_v63 = vld [vmem:[#allocation16 + $0x884] ss:$40 sps:$4 sm:$0xff]   ;;  %v5978_v0 = vld [vmem:[#allocation16 + $0x380] ss:$40 sps:$4 sm:$0xff]  }
 0x44c   :  { %v5981_v3 = vld [vmem:[#allocation16 + $0x880] ss:$40 sps:$4 sm:$0xff]  }
 0x44e   :  { %3069 = vmatpush1.bf16.msra.mxu0 %v5900_v5  ;;  %3110 = vmatpush1.bf16.msra.mxu1 %v5903_v6  ;;  %v5986_v5 = vld [vmem:[#allocation16 + $0x3d4] ss:$40 sps:$4 sm:$0xff]  }
 0x44f   :  { %3070 = vmatprep.subr.bf16.mxu0 %v5908_v7  ;;  %3111 = vmatprep.subr.bf16.mxu1 %v5911_v8  ;;  %v5989_v6 = vld [vmem:[#allocation16 + $0x8d4] ss:$40 sps:$4 sm:$0xff]   ;;  %v5984_v7 = vld [vmem:[#allocation16 + $0x3d0] ss:$40 sps:$4 sm:$0xff]  }
 0x450   :  { %v5987_v8 = vld [vmem:[#allocation16 + $0x8d0] ss:$40 sps:$4 sm:$0xff]  }
 0x452   :  { %3071 = vmatpush1.bf16.msra.mxu0 %v5906_v9  ;;  %3112 = vmatpush1.bf16.msra.mxu1 %v5909_v10  ;;  %v5992_v9 = vld [vmem:[#allocation16 + $0x424] ss:$40 sps:$4 sm:$0xff]  }
 0x453   :  { %3122 = vmatprep.subr.bf16.mxu0 %v5914_v11  ;;  %3163 = vmatprep.subr.bf16.mxu1 %v5917_v12  ;;  %v5995_v10 = vld [vmem:[#allocation16 + $0x924] ss:$40 sps:$4 sm:$0xff]   ;;  %v5990_v11 = vld [vmem:[#allocation16 + $0x420] ss:$40 sps:$4 sm:$0xff]  }
 0x454   :  { %v5993_v12 = vld [vmem:[#allocation16 + $0x920] ss:$40 sps:$4 sm:$0xff]  }
 0x455   :  { %3073 = vmatmul.mubr.bf16.vlgmr.msra.gmra.mrb[8].mxu0 %v7209_v1  ;;  %3114 = vmatmul.mubr.bf16.vlgmr.msra.gmra.mrb[16].mxu1 %v7211_v2 }
 0x456   :  { %3123 = vmatpush1.bf16.msra.mxu0 %v5912_v13  ;;  %3154 = vmatprep.mubr.bf16.mxu0 %v7205_v62  ;;  %v5998_v13 = vld [vmem:[#allocation16 + $0x474] ss:$40 sps:$4 sm:$0xff]  }
 0x457   :  { %3164 = vmatpush1.bf16.msra.mxu1 %v5915_v16  ;;  %3195 = vmatprep.mubr.bf16.mxu1 %v7207_v14  ;;  %v6001_v16 = vld [vmem:[#allocation16 + $0x974] ss:$40 sps:$4 sm:$0xff]  }
 0x458   :  { %3124 = vmatprep.subr.bf16.mxu0 %v5920_v17  ;;  %3165 = vmatprep.subr.bf16.mxu1 %v5923_v18  ;;  %v5996_v17 = vld [vmem:[#allocation16 + $0x470] ss:$40 sps:$4 sm:$0xff]  }
 0x459   :  { %v5999_v18 = vld [vmem:[#allocation16 + $0x970] ss:$40 sps:$4 sm:$0xff]  }
 0x45a   :  { %3125 = vmatpush1.bf16.msra.mxu0 %v5918_v19  ;;  %v6004_v19 = vld [vmem:[#allocation16 + $0x4c4] ss:$40 sps:$4 sm:$0xff]  }
 0x45b   :  { %3166 = vmatpush1.bf16.msra.mxu1 %v5921_v20  ;;  %3126 = vmatprep.subr.bf16.mxu0 %v5926_v21  ;;  %v6007_v20 = vld [vmem:[#allocation16 + $0x9c4] ss:$40 sps:$4 sm:$0xff]   ;;  %v6002_v21 = vld [vmem:[#allocation16 + $0x4c0] ss:$40 sps:$4 sm:$0xff]  }
 0x45c   :  { %3167 = vmatprep.subr.bf16.mxu1 %v5929_v22  ;;  %v6005_v22 = vld [vmem:[#allocation16 + $0x9c0] ss:$40 sps:$4 sm:$0xff]  }
 0x45e   :  { %3127 = vmatpush1.bf16.msra.mxu0 %v5924_v23  ;;  %v6010_v23 = vld [vmem:[#allocation16 + $0x1c] ss:$40 sps:$4 sm:$0xff]  }
 0x45f   :  { %3168 = vmatpush1.bf16.msra.mxu1 %v5927_v25  ;;  %3128 = vmatprep.subr.bf16.mxu0 %v5932_v26  ;;  %v6013_v25 = vld [vmem:[#allocation16 + $0x51c] ss:$40 sps:$4 sm:$0xff]   ;;  %v6008_v26 = vld [vmem:[#allocation16 + $0x18] ss:$40 sps:$4 sm:$0xff]  }
 0x460   :  { %3169 = vmatprep.subr.bf16.mxu1 %v5935_v27  ;;  %v6011_v27 = vld [vmem:[#allocation16 + $0x518] ss:$40 sps:$4 sm:$0xff]  }
 0x462   :  { %3129 = vmatpush1.bf16.msra.mxu0 %v5930_v28  ;;  %v6016_v28 = vld [vmem:[#allocation16 + $0x6c] ss:$40 sps:$4 sm:$0xff]  }
 0x463   :  { %3170 = vmatpush1.bf16.msra.mxu1 %v5933_v29  ;;  %3130 = vmatprep.subr.bf16.mxu0 %v5938_v30  ;;  %v6019_v29 = vld [vmem:[#allocation16 + $0x56c] ss:$40 sps:$4 sm:$0xff]   ;;  %v6014_v30 = vld [vmem:[#allocation16 + $0x68] ss:$40 sps:$4 sm:$0xff]  }
 0x464   :  { %3171 = vmatprep.subr.bf16.mxu1 %v5941_v31  ;;  %v6017_v31 = vld [vmem:[#allocation16 + $0x568] ss:$40 sps:$4 sm:$0xff]  }
 0x466   :  { %3131 = vmatpush1.bf16.msra.mxu0 %v5936_v32  ;;  %v6022_v32 = vld [vmem:[#allocation16 + $0xbc] ss:$40 sps:$4 sm:$0xff]  }
 0x467   :  { %3172 = vmatpush1.bf16.msra.mxu1 %v5939_v33  ;;  %3132 = vmatprep.subr.bf16.mxu0 %v5944_v34  ;;  %v6025_v33 = vld [vmem:[#allocation16 + $0x5bc] ss:$40 sps:$4 sm:$0xff]   ;;  %v6020_v34 = vld [vmem:[#allocation16 + $0xb8] ss:$40 sps:$4 sm:$0xff]  }
 0x468   :  { %3173 = vmatprep.subr.bf16.mxu1 %v5947_v35  ;;  %v6023_v35 = vld [vmem:[#allocation16 + $0x5b8] ss:$40 sps:$4 sm:$0xff]  }
 0x46a   :  { %3133 = vmatpush1.bf16.msra.mxu0 %v5942_v36  ;;  %v6028_v36 = vld [vmem:[#allocation16 + $0x10c] ss:$40 sps:$4 sm:$0xff]  }
 0x46b   :  { %3174 = vmatpush1.bf16.msra.mxu1 %v5945_v37  ;;  %3134 = vmatprep.subr.bf16.mxu0 %v5950_v38  ;;  %v6031_v37 = vld [vmem:[#allocation16 + $0x60c] ss:$40 sps:$4 sm:$0xff]   ;;  %v6026_v38 = vld [vmem:[#allocation16 + $0x108] ss:$40 sps:$4 sm:$0xff]  }
 0x46c   :  { %3175 = vmatprep.subr.bf16.mxu1 %v5953_v39  ;;  %v6029_v39 = vld [vmem:[#allocation16 + $0x608] ss:$40 sps:$4 sm:$0xff]  }
 0x46e   :  { %3135 = vmatpush1.bf16.msra.mxu0 %v5948_v15  ;;  %v6034_v15 = vld [vmem:[#allocation16 + $0x15c] ss:$40 sps:$4 sm:$0xff]  }
 0x46f   :  { %3176 = vmatpush1.bf16.msra.mxu1 %v5951_v43  ;;  %3136 = vmatprep.subr.bf16.mxu0 %v5956_v46  ;;  %v6037_v43 = vld [vmem:[#allocation16 + $0x65c] ss:$40 sps:$4 sm:$0xff]   ;;  %v6032_v46 = vld [vmem:[#allocation16 + $0x158] ss:$40 sps:$4 sm:$0xff]  }
 0x470   :  { %3177 = vmatprep.subr.bf16.mxu1 %v5959_v24  ;;  %v6035_v24 = vld [vmem:[#allocation16 + $0x658] ss:$40 sps:$4 sm:$0xff]  }
 0x472   :  { %3137 = vmatpush1.bf16.msra.mxu0 %v5954_v47  ;;  %v6040_v47 = vld [vmem:[#allocation16 + $0x1ac] ss:$40 sps:$4 sm:$0xff]  }
 0x473   :  { %3178 = vmatpush1.bf16.msra.mxu1 %v5957_v48  ;;  %3138 = vmatprep.subr.bf16.mxu0 %v5962_v49  ;;  %v6043_v48 = vld [vmem:[#allocation16 + $0x6ac] ss:$40 sps:$4 sm:$0xff]   ;;  %v6038_v49 = vld [vmem:[#allocation16 + $0x1a8] ss:$40 sps:$4 sm:$0xff]  }
 0x474   :  { %3179 = vmatprep.subr.bf16.mxu1 %v5965_v50  ;;  %v6041_v50 = vld [vmem:[#allocation16 + $0x6a8] ss:$40 sps:$4 sm:$0xff]  }
 0x476   :  { %3139 = vmatpush1.bf16.msra.mxu0 %v5960_v51  ;;  %v6046_v51 = vld [vmem:[#allocation16 + $0x1fc] ss:$40 sps:$4 sm:$0xff]  }
 0x477   :  { %3180 = vmatpush1.bf16.msra.mxu1 %v5963_v52  ;;  %3140 = vmatprep.subr.bf16.mxu0 %v5968_v53  ;;  %v6049_v52 = vld [vmem:[#allocation16 + $0x6fc] ss:$40 sps:$4 sm:$0xff]   ;;  %v6044_v53 = vld [vmem:[#allocation16 + $0x1f8] ss:$40 sps:$4 sm:$0xff]  }
 0x478   :  { %3181 = vmatprep.subr.bf16.mxu1 %v5971_v54  ;;  %v6047_v54 = vld [vmem:[#allocation16 + $0x6f8] ss:$40 sps:$4 sm:$0xff]  }
 0x47a   :  { %3141 = vmatpush1.bf16.msra.mxu0 %v5966_v55  ;;  %v6052_v55 = vld [vmem:[#allocation16 + $0x24c] ss:$40 sps:$4 sm:$0xff]  }
 0x47b   :  { %3182 = vmatpush1.bf16.msra.mxu1 %v5969_v56  ;;  %3142 = vmatprep.subr.bf16.mxu0 %v5974_v57  ;;  %v6055_v56 = vld [vmem:[#allocation16 + $0x74c] ss:$40 sps:$4 sm:$0xff]   ;;  %v6050_v57 = vld [vmem:[#allocation16 + $0x248] ss:$40 sps:$4 sm:$0xff]  }
 0x47c   :  { %3183 = vmatprep.subr.bf16.mxu1 %v5977_v58  ;;  %v6053_v58 = vld [vmem:[#allocation16 + $0x748] ss:$40 sps:$4 sm:$0xff]  }
 0x47e   :  { %3143 = vmatpush1.bf16.msra.mxu0 %v5972_v59  ;;  %v6058_v59 = vld [vmem:[#allocation16 + $0x29c] ss:$40 sps:$4 sm:$0xff]  }
 0x47f   :  { %3184 = vmatpush1.bf16.msra.mxu1 %v5975_v60  ;;  %3144 = vmatprep.subr.bf16.mxu0 %v5980_v61  ;;  %v6061_v60 = vld [vmem:[#allocation16 + $0x79c] ss:$40 sps:$4 sm:$0xff]   ;;  %v6056_v61 = vld [vmem:[#allocation16 + $0x298] ss:$40 sps:$4 sm:$0xff]  }
 0x480   :  { %3185 = vmatprep.subr.bf16.mxu1 %v5983_v63  ;;  %v6059_v63 = vld [vmem:[#allocation16 + $0x798] ss:$40 sps:$4 sm:$0xff]  }
 0x482   :  { %3145 = vmatpush1.bf16.msra.mxu0 %v5978_v0  ;;  %v6064_v0 = vld [vmem:[#allocation16 + $0x2ec] ss:$40 sps:$4 sm:$0xff]  }
 0x483   :  { %3186 = vmatpush1.bf16.msra.mxu1 %v5981_v3  ;;  %3146 = vmatprep.subr.bf16.mxu0 %v5986_v5  ;;  %v6067_v3 = vld [vmem:[#allocation16 + $0x7ec] ss:$40 sps:$4 sm:$0xff]   ;;  %v6062_v5 = vld [vmem:[#allocation16 + $0x2e8] ss:$40 sps:$4 sm:$0xff]  }
 0x484   :  { %3187 = vmatprep.subr.bf16.mxu1 %v5989_v6  ;;  %v6065_v6 = vld [vmem:[#allocation16 + $0x7e8] ss:$40 sps:$4 sm:$0xff]  }
 0x486   :  { %3147 = vmatpush1.bf16.msra.mxu0 %v5984_v7  ;;  %v6070_v7 = vld [vmem:[#allocation16 + $0x33c] ss:$40 sps:$4 sm:$0xff]  }
 0x487   :  { %3188 = vmatpush1.bf16.msra.mxu1 %v5987_v8  ;;  %3148 = vmatprep.subr.bf16.mxu0 %v5992_v9  ;;  %v6073_v8 = vld [vmem:[#allocation16 + $0x83c] ss:$40 sps:$4 sm:$0xff]   ;;  %v6068_v9 = vld [vmem:[#allocation16 + $0x338] ss:$40 sps:$4 sm:$0xff]  }
 0x488   :  { %3189 = vmatprep.subr.bf16.mxu1 %v5995_v10  ;;  %v6071_v10 = vld [vmem:[#allocation16 + $0x838] ss:$40 sps:$4 sm:$0xff]  }
 0x48a   :  { %3149 = vmatpush1.bf16.msra.mxu0 %v5990_v11  ;;  %v6076_v11 = vld [vmem:[#allocation16 + $0x38c] ss:$40 sps:$4 sm:$0xff]  }
 0x48b   :  { %3190 = vmatpush1.bf16.msra.mxu1 %v5993_v12  ;;  %3150 = vmatprep.subr.bf16.mxu0 %v5998_v13  ;;  %v6079_v12 = vld [vmem:[#allocation16 + $0x88c] ss:$40 sps:$4 sm:$0xff]   ;;  %v6074_v13 = vld [vmem:[#allocation16 + $0x388] ss:$40 sps:$4 sm:$0xff]  }
 0x48c   :  { %3191 = vmatprep.subr.bf16.mxu1 %v6001_v16  ;;  %v6077_v16 = vld [vmem:[#allocation16 + $0x888] ss:$40 sps:$4 sm:$0xff]  }
 0x48e   :  { %3151 = vmatpush1.bf16.msra.mxu0 %v5996_v17  ;;  %v6082_v17 = vld [vmem:[#allocation16 + $0x3dc] ss:$40 sps:$4 sm:$0xff]  }
 0x48f   :  { %3192 = vmatpush1.bf16.msra.mxu1 %v5999_v18  ;;  %3152 = vmatprep.subr.bf16.mxu0 %v6004_v19  ;;  %v6085_v18 = vld [vmem:[#allocation16 + $0x8dc] ss:$40 sps:$4 sm:$0xff]   ;;  %v6080_v19 = vld [vmem:[#allocation16 + $0x3d8] ss:$40 sps:$4 sm:$0xff]  }
 0x490   :  { %3193 = vmatprep.subr.bf16.mxu1 %v6007_v20  ;;  %v6083_v20 = vld [vmem:[#allocation16 + $0x8d8] ss:$40 sps:$4 sm:$0xff]  }
 0x492   :  { %3153 = vmatpush1.bf16.msra.mxu0 %v6002_v21  ;;  %v6088_v21 = vld [vmem:[#allocation16 + $0x42c] ss:$40 sps:$4 sm:$0xff]  }
 0x493   :  { %3194 = vmatpush1.bf16.msra.mxu1 %v6005_v22  ;;  %3204 = vmatprep.subr.bf16.mxu0 %v6010_v23  ;;  %v6091_v22 = vld [vmem:[#allocation16 + $0x92c] ss:$40 sps:$4 sm:$0xff]   ;;  %v6086_v23 = vld [vmem:[#allocation16 + $0x428] ss:$40 sps:$4 sm:$0xff]  }
 0x494   :  { %3245 = vmatprep.subr.bf16.mxu1 %v6013_v25  ;;  %v6089_v25 = vld [vmem:[#allocation16 + $0x928] ss:$40 sps:$4 sm:$0xff]  }
 0x495   :  { %3155 = vmatmul.mubr.bf16.vlgmr.msra.gmra.mrb[12].mxu0 %v7209_v1 }
 0x496   :  { %3196 = vmatmul.mubr.bf16.vlgmr.msra.gmra.mrb[20].mxu1 %v7211_v2  ;;  %3205 = vmatpush1.bf16.msra.mxu0 %v6008_v26  ;;  %v6094_v26 = vld [vmem:[#allocation16 + $0x47c] ss:$40 sps:$4 sm:$0xff]  }
 0x497   :  { %3236 = vmatprep.mubr.bf16.mxu0 %v7205_v62  ;;  %3246 = vmatpush1.bf16.msra.mxu1 %v6011_v27  ;;  %v6097_v27 = vld [vmem:[#allocation16 + $0x97c] ss:$40 sps:$4 sm:$0xff]  }
 0x498   :  { %3277 = vmatprep.mubr.bf16.mxu1 %v7207_v14  ;;  %3206 = vmatprep.subr.bf16.mxu0 %v6016_v28  ;;  %v6092_v28 = vld [vmem:[#allocation16 + $0x478] ss:$40 sps:$4 sm:$0xff]  }
 0x499   :  { %3247 = vmatprep.subr.bf16.mxu1 %v6019_v29  ;;  %v6095_v29 = vld [vmem:[#allocation16 + $0x978] ss:$40 sps:$4 sm:$0xff]  }
 0x49a   :  { %3207 = vmatpush1.bf16.msra.mxu0 %v6014_v30  ;;  %v6100_v30 = vld [vmem:[#allocation16 + $0x4cc] ss:$40 sps:$4 sm:$0xff]  }
 0x49b   :  { %3248 = vmatpush1.bf16.msra.mxu1 %v6017_v31  ;;  %3208 = vmatprep.subr.bf16.mxu0 %v6022_v32  ;;  %v6103_v31 = vld [vmem:[#allocation16 + $0x9cc] ss:$40 sps:$4 sm:$0xff]   ;;  %v6098_v32 = vld [vmem:[#allocation16 + $0x4c8] ss:$40 sps:$4 sm:$0xff]  }
 0x49c   :  { %3249 = vmatprep.subr.bf16.mxu1 %v6025_v33  ;;  %v6101_v33 = vld [vmem:[#allocation16 + $0x9c8] ss:$40 sps:$4 sm:$0xff]  }
 0x49e   :  { %3209 = vmatpush1.bf16.msra.mxu0 %v6020_v34  ;;  %v6106_v34 = vld [vmem:[#allocation16 + $0x24] ss:$40 sps:$4 sm:$0xff]  }
 0x49f   :  { %3250 = vmatpush1.bf16.msra.mxu1 %v6023_v35  ;;  %3210 = vmatprep.subr.bf16.mxu0 %v6028_v36  ;;  %v6109_v35 = vld [vmem:[#allocation16 + $0x524] ss:$40 sps:$4 sm:$0xff]   ;;  %v6104_v36 = vld [vmem:[#allocation16 + $0x20] ss:$40 sps:$4 sm:$0xff]  }
 0x4a0   :  { %3251 = vmatprep.subr.bf16.mxu1 %v6031_v37  ;;  %v6107_v37 = vld [vmem:[#allocation16 + $0x520] ss:$40 sps:$4 sm:$0xff]  }
 0x4a2   :  { %3211 = vmatpush1.bf16.msra.mxu0 %v6026_v38  ;;  %v6112_v38 = vld [vmem:[#allocation16 + $0x74] ss:$40 sps:$4 sm:$0xff]  }
 0x4a3   :  { %3252 = vmatpush1.bf16.msra.mxu1 %v6029_v39  ;;  %3212 = vmatprep.subr.bf16.mxu0 %v6034_v15  ;;  %v6115_v39 = vld [vmem:[#allocation16 + $0x574] ss:$40 sps:$4 sm:$0xff]   ;;  %v6110_v15 = vld [vmem:[#allocation16 + $0x70] ss:$40 sps:$4 sm:$0xff]  }
 0x4a4   :  { %3253 = vmatprep.subr.bf16.mxu1 %v6037_v43  ;;  %v6113_v43 = vld [vmem:[#allocation16 + $0x570] ss:$40 sps:$4 sm:$0xff]  }
 0x4a6   :  { %3213 = vmatpush1.bf16.msra.mxu0 %v6032_v46  ;;  %v6118_v46 = vld [vmem:[#allocation16 + $0xc4] ss:$40 sps:$4 sm:$0xff]  }
 0x4a7   :  { %3254 = vmatpush1.bf16.msra.mxu1 %v6035_v24  ;;  %3214 = vmatprep.subr.bf16.mxu0 %v6040_v47  ;;  %v6121_v24 = vld [vmem:[#allocation16 + $0x5c4] ss:$40 sps:$4 sm:$0xff]   ;;  %v6116_v47 = vld [vmem:[#allocation16 + $0xc0] ss:$40 sps:$4 sm:$0xff]  }
 0x4a8   :  { %3255 = vmatprep.subr.bf16.mxu1 %v6043_v48  ;;  %v6119_v48 = vld [vmem:[#allocation16 + $0x5c0] ss:$40 sps:$4 sm:$0xff]  }
 0x4aa   :  { %3215 = vmatpush1.bf16.msra.mxu0 %v6038_v49  ;;  %v6124_v49 = vld [vmem:[#allocation16 + $0x114] ss:$40 sps:$4 sm:$0xff]  }
 0x4ab   :  { %3256 = vmatpush1.bf16.msra.mxu1 %v6041_v50  ;;  %3216 = vmatprep.subr.bf16.mxu0 %v6046_v51  ;;  %v6127_v50 = vld [vmem:[#allocation16 + $0x614] ss:$40 sps:$4 sm:$0xff]   ;;  %v6122_v51 = vld [vmem:[#allocation16 + $0x110] ss:$40 sps:$4 sm:$0xff]  }
 0x4ac   :  { %3257 = vmatprep.subr.bf16.mxu1 %v6049_v52  ;;  %v6130_v52 = vld [vmem:[#allocation16 + $0x164] ss:$40 sps:$4 sm:$0xff]  }
 0x4ae   :  { %3217 = vmatpush1.bf16.msra.mxu0 %v6044_v53  ;;  %v6133_v53 = vld [vmem:[#allocation16 + $0x664] ss:$40 sps:$4 sm:$0xff]  }
 0x4af   :  { %3258 = vmatpush1.bf16.msra.mxu1 %v6047_v54  ;;  %3218 = vmatprep.subr.bf16.mxu0 %v6052_v55  ;;  %v7232_v54 = vld [vmem:[#allocation18] sm:$0xff] }
 0x4b0   :  { %3259 = vmatprep.subr.bf16.mxu1 %v6055_v56  ;;  %v6131_v55 = vld [vmem:[#allocation16 + $0x660] ss:$40 sps:$4 sm:$0xff]   ;;  %v6136_v56 = vld [vmem:[#allocation16 + $0x1b4] ss:$40 sps:$4 sm:$0xff]  }
 0x4b2   :  { %3219 = vmatpush1.bf16.msra.mxu0 %v6050_v57  ;;  %v6139_v57 = vld [vmem:[#allocation16 + $0x6b4] ss:$40 sps:$4 sm:$0xff]  }
 0x4b3   :  { %3260 = vmatpush1.bf16.msra.mxu1 %v6053_v58  ;;  %3220 = vmatprep.subr.bf16.mxu0 %v6058_v59  ;;  %v1311_v58 = vrot.slane %v7232_v54, %v7192_v41  ;;  %v6134_v59 = vld [vmem:[#allocation16 + $0x1b0] ss:$40 sps:$4 sm:$0xff]  }
 0x4b4   :  { %3261 = vmatprep.subr.bf16.mxu1 %v6061_v60  ;;  %v1315_v60 = vrot.slane %v7232_v54, %v7196_v44 }
 0x4b6   :  { %3221 = vmatpush1.bf16.msra.mxu0 %v6056_v61  ;;  %v6137_v61 = vld [vmem:[#allocation16 + $0x6b0] ss:$40 sps:$4 sm:$0xff]  }
 0x4b7   :  { %3262 = vmatpush1.bf16.msra.mxu1 %v6059_v63  ;;  %3222 = vmatprep.subr.bf16.mxu0 %v6064_v0  ;;  %v6142_v63 = vld [vmem:[#allocation16 + $0x204] ss:$40 sps:$4 sm:$0xff]  }
 0x4b8   :  { %3263 = vmatprep.subr.bf16.mxu1 %v6067_v3 }
 0x4ba   :  { %3223 = vmatpush1.bf16.msra.mxu0 %v6062_v5  ;;  %v6145_v5 = vld [vmem:[#allocation16 + $0x704] ss:$40 sps:$4 sm:$0xff]  }
 0x4bb   :  { %3264 = vmatpush1.bf16.msra.mxu1 %v6065_v6  ;;  %3224 = vmatprep.subr.bf16.mxu0 %v6070_v7 }
 0x4bc   :  { %3265 = vmatprep.subr.bf16.mxu1 %v6073_v8 }
 0x4be   :  { %3225 = vmatpush1.bf16.msra.mxu0 %v6068_v9 }
 0x4bf   :  { %3266 = vmatpush1.bf16.msra.mxu1 %v6071_v10  ;;  %3226 = vmatprep.subr.bf16.mxu0 %v6076_v11 }
 0x4c0   :  { %3267 = vmatprep.subr.bf16.mxu1 %v6079_v12  ;;  %v6140_v12 = vld [vmem:[#allocation16 + $0x200] ss:$40 sps:$4 sm:$0xff]  }
 0x4c2   :  { %3227 = vmatpush1.bf16.msra.mxu0 %v6074_v13 }
 0x4c3   :  { %3268 = vmatpush1.bf16.msra.mxu1 %v6077_v16  ;;  %3228 = vmatprep.subr.bf16.mxu0 %v6082_v17 }
 0x4c4   :  { %3269 = vmatprep.subr.bf16.mxu1 %v6085_v18  ;;  %v6143_v18 = vld [vmem:[#allocation16 + $0x700] ss:$40 sps:$4 sm:$0xff]  }
 0x4c6   :  { %3229 = vmatpush1.bf16.msra.mxu0 %v6080_v19  ;;  %v6148_v19 = vld [vmem:[#allocation16 + $0x254] ss:$40 sps:$4 sm:$0xff]  }
 0x4c7   :  { %3270 = vmatpush1.bf16.msra.mxu1 %v6083_v20  ;;  %3230 = vmatprep.subr.bf16.mxu0 %v6088_v21  ;;  %v6151_v21 = vld [vmem:[#allocation16 + $0x754] ss:$40 sps:$4 sm:$0xff]  }
 0x4c8   :  { %3271 = vmatprep.subr.bf16.mxu1 %v6091_v22  ;;  %v6146_v22 = vld [vmem:[#allocation16 + $0x250] ss:$40 sps:$4 sm:$0xff]  }
 0x4ca   :  { %3231 = vmatpush1.bf16.msra.mxu0 %v6086_v23  ;;  %v6149_v23 = vld [vmem:[#allocation16 + $0x750] ss:$40 sps:$4 sm:$0xff]  }
 0x4cb   :  { %3272 = vmatpush1.bf16.msra.mxu1 %v6089_v25  ;;  %3232 = vmatprep.subr.bf16.mxu0 %v6094_v26  ;;  %v6154_v25 = vld [vmem:[#allocation16 + $0x2a4] ss:$40 sps:$4 sm:$0xff]  }
 0x4cc   :  { %3273 = vmatprep.subr.bf16.mxu1 %v6097_v27  ;;  %v6157_v26 = vld [vmem:[#allocation16 + $0x7a4] ss:$40 sps:$4 sm:$0xff]   ;;  %v6152_v27 = vld [vmem:[#allocation16 + $0x2a0] ss:$40 sps:$4 sm:$0xff]  }
 0x4ce   :  { %3233 = vmatpush1.bf16.msra.mxu0 %v6092_v28  ;;  %v6155_v28 = vld [vmem:[#allocation16 + $0x7a0] ss:$40 sps:$4 sm:$0xff]  }
 0x4cf   :  { %3274 = vmatpush1.bf16.msra.mxu1 %v6095_v29  ;;  %3234 = vmatprep.subr.bf16.mxu0 %v6100_v30  ;;  %v6160_v29 = vld [vmem:[#allocation16 + $0x2f4] ss:$40 sps:$4 sm:$0xff]  }
 0x4d0   :  { %3275 = vmatprep.subr.bf16.mxu1 %v6103_v31  ;;  %v6163_v30 = vld [vmem:[#allocation16 + $0x7f4] ss:$40 sps:$4 sm:$0xff]   ;;  %v6158_v31 = vld [vmem:[#allocation16 + $0x2f0] ss:$40 sps:$4 sm:$0xff]  }
 0x4d2   :  { %3235 = vmatpush1.bf16.msra.mxu0 %v6098_v32  ;;  %v6161_v32 = vld [vmem:[#allocation16 + $0x7f0] ss:$40 sps:$4 sm:$0xff]  }
 0x4d3   :  { %3276 = vmatpush1.bf16.msra.mxu1 %v6101_v33  ;;  %3286 = vmatprep.subr.bf16.mxu0 %v6106_v34  ;;  %v6166_v33 = vld [vmem:[#allocation16 + $0x344] ss:$40 sps:$4 sm:$0xff]  }
 0x4d4   :  { %3327 = vmatprep.subr.bf16.mxu1 %v6109_v35  ;;  %v6169_v34 = vld [vmem:[#allocation16 + $0x844] ss:$40 sps:$4 sm:$0xff]   ;;  %v6164_v35 = vld [vmem:[#allocation16 + $0x340] ss:$40 sps:$4 sm:$0xff]  }
 0x4d5   :  { %3237 = vmatmul.mubr.bf16.vlgmr.msra.gmra.mrb[16].mxu0 %v7209_v1 }
 0x4d6   :  { %3278 = vmatmul.mubr.bf16.vlgmr.msra.gmra.mrb[24].mxu1 %v7211_v2  ;;  %3287 = vmatpush1.bf16.msra.mxu0 %v6104_v36  ;;  %v6167_v36 = vld [vmem:[#allocation16 + $0x840] ss:$40 sps:$4 sm:$0xff]  }
 0x4d7   :  { %3318 = vmatprep.mubr.bf16.mxu0 %v7205_v62  ;;  %3328 = vmatpush1.bf16.msra.mxu1 %v6107_v37  ;;  %v6125_v62 = vld [vmem:[#allocation16 + $0x610] ss:$40 sps:$4 sm:$0xff]   ;;  %v6172_v37 = vld [vmem:[#allocation16 + $0x394] ss:$40 sps:$4 sm:$0xff]  }
 0x4d8   :  { %3359 = vmatprep.mubr.bf16.mxu1 %v7207_v14  ;;  %3288 = vmatprep.subr.bf16.mxu0 %v6112_v38  ;;  %v6128_v14 = vld [vmem:[#allocation16 + $0x160] ss:$40 sps:$4 sm:$0xff]   ;;  %v6175_v38 = vld [vmem:[#allocation16 + $0x894] ss:$40 sps:$4 sm:$0xff]  }
 0x4d9   :  { %3329 = vmatprep.subr.bf16.mxu1 %v6115_v39  ;;  %v6170_v39 = vld [vmem:[#allocation16 + $0x390] ss:$40 sps:$4 sm:$0xff]  }
 0x4da   :  { %3289 = vmatpush1.bf16.msra.mxu0 %v6110_v15  ;;  %v6173_v15 = vld [vmem:[#allocation16 + $0x890] ss:$40 sps:$4 sm:$0xff]  }
 0x4db   :  { %3330 = vmatpush1.bf16.msra.mxu1 %v6113_v43  ;;  %3290 = vmatprep.subr.bf16.mxu0 %v6118_v46  ;;  %v6178_v43 = vld [vmem:[#allocation16 + $0x3e4] ss:$40 sps:$4 sm:$0xff]  }
 0x4dc   :  { %3331 = vmatprep.subr.bf16.mxu1 %v6121_v24  ;;  %v6181_v46 = vld [vmem:[#allocation16 + $0x8e4] ss:$40 sps:$4 sm:$0xff]   ;;  %v6176_v24 = vld [vmem:[#allocation16 + $0x3e0] ss:$40 sps:$4 sm:$0xff]  }
 0x4de   :  { %3291 = vmatpush1.bf16.msra.mxu0 %v6116_v47  ;;  %v6179_v47 = vld [vmem:[#allocation16 + $0x8e0] ss:$40 sps:$4 sm:$0xff]  }
 0x4df   :  { %3332 = vmatpush1.bf16.msra.mxu1 %v6119_v48  ;;  %3292 = vmatprep.subr.bf16.mxu0 %v6124_v49  ;;  %v6184_v48 = vld [vmem:[#allocation16 + $0x434] ss:$40 sps:$4 sm:$0xff]  }
 0x4e0   :  { %3333 = vmatprep.subr.bf16.mxu1 %v6127_v50  ;;  %v6187_v49 = vld [vmem:[#allocation16 + $0x934] ss:$40 sps:$4 sm:$0xff]   ;;  %v6182_v50 = vld [vmem:[#allocation16 + $0x430] ss:$40 sps:$4 sm:$0xff]  }
 0x4e2   :  { %3293 = vmatpush1.bf16.msra.mxu0 %v6122_v51  ;;  %v6185_v51 = vld [vmem:[#allocation16 + $0x930] ss:$40 sps:$4 sm:$0xff]  }
 0x4e3   :  { %3334 = vmatpush1.bf16.msra.mxu1 %v6125_v62  ;;  %3294 = vmatprep.subr.bf16.mxu0 %v6130_v52  ;;  %v6190_v62 = vld [vmem:[#allocation16 + $0x484] ss:$40 sps:$4 sm:$0xff]  }
 0x4e4   :  { %3335 = vmatprep.subr.bf16.mxu1 %v6133_v53  ;;  %v6193_v52 = vld [vmem:[#allocation16 + $0x984] ss:$40 sps:$4 sm:$0xff]   ;;  %v6188_v53 = vld [vmem:[#allocation16 + $0x480] ss:$40 sps:$4 sm:$0xff]  }
 0x4e6   :  { %3295 = vmatpush1.bf16.msra.mxu0 %v6128_v14  ;;  %v6191_v14 = vld [vmem:[#allocation16 + $0x980] ss:$40 sps:$4 sm:$0xff]  }
 0x4e7   :  { %3336 = vmatpush1.bf16.msra.mxu1 %v6131_v55  ;;  %3296 = vmatprep.subr.bf16.mxu0 %v6136_v56  ;;  %v6196_v55 = vld [vmem:[#allocation16 + $0x4d4] ss:$40 sps:$4 sm:$0xff]  }
 0x4e8   :  { %v2992_v0 = vpop.f32.mrb[4].mxu0  ;;  %v3033_v3 = vpop.f32.mrb[12].mxu1  ;;  %3337 = vmatprep.subr.bf16.mxu1 %v6139_v57  ;;  %v6199_v56 = vld [vmem:[#allocation16 + $0x9d4] ss:$40 sps:$4 sm:$0xff]   ;;  %v6194_v57 = vld [vmem:[#allocation16 + $0x4d0] ss:$40 sps:$4 sm:$0xff]  }
 0x4e9   :  { %v2993_v6 = vadd.f32 %v2992_v0, %v1311_v58  ;;  %v2994_v7 = vpop.f32.mrb[5].mxu0  ;;  %v3035_v8 = vpop.f32.mrb[13].mxu1  ;;  %v6197_v58 = vld [vmem:[#allocation16 + $0x9d0] ss:$40 sps:$4 sm:$0xff]  }
 0x4ea   :  { %v2995_v9 = vadd.f32 %v2994_v7, %v1315_v60  ;;  %3297 = vmatpush1.bf16.msra.mxu0 %v6134_v59  ;;  %v2996_v10 = vpop.f32.mrb[6].mxu0  ;;  %v3037_v11 = vpop.f32.mrb[14].mxu1  ;;  %v6200_v59 = vld [vmem:[#allocation19] sm:$0xff]   ;;  %v6201_v60 = vld [vmem:[#allocation19 + $0x8] sm:$0xff]  }
 0x4eb   :  { %v7238_v13 = vadd.f32 %v3033_v3, %v2993_v6  ;;  %3338 = vmatpush1.bf16.msra.mxu1 %v6137_v61  ;;  %v2997_v16 = vpop.f32.mrb[7].mxu0  ;;  %v3038_v17 = vpop.f32.mrb[15].mxu1  ;;  %3298 = vmatprep.subr.bf16.mxu0 %v6142_v63  ;;  %v6202_v61 = vld [vmem:[#allocation19 + $0x10] sm:$0xff]   ;;  %v6203_v63 = vld [vmem:[#allocation19 + $0x18] sm:$0xff]   ;;  %v5155_v3 = vld [vmem:[#allocation4] ss:$0 sm:$0xff]  ;;  %v1319_v6 = vrot.slane %v7232_v54, %v728_v42 }
 0x4ec   :  { %v7240_v20 = vadd.f32 %v3035_v8, %v2995_v9  ;;  %3339 = vmatprep.subr.bf16.mxu1 %v6145_v5  ;;  %v3384_v0 = vpop.permute.xlu1 %3383  ;;  %v3372_v5 = vpop.permute.xlu0 %3371  ;;  %v1323_v9 = vrot.slane %v7232_v54, %v732_v45  ;;  %v6205_v10 = vld [vmem:[#allocation19 + $0x28] sm:$0xff]  }
 0x4ed   :  { %v3380_v8 = vmul.f32 %v5155_v3, %v3372_v5  ;;  %v5157_v42 = vld [vmem:[#allocation7] ss:$0 sm:$0xff] }
 0x4ee   :  { %3299 = vmatpush1.bf16.msra.mxu0 %v6140_v12 }
 0x4ef   :  { %3340 = vmatpush1.bf16.msra.mxu1 %v6143_v18  ;;  %3300 = vmatprep.subr.bf16.mxu0 %v6148_v19 }
 0x4f0   :  { %3341 = vmatprep.subr.bf16.mxu1 %v6151_v21 }
 0x4f2   :  { %3301 = vmatpush1.bf16.msra.mxu0 %v6146_v22 }
 0x4f3   :  { %3342 = vmatpush1.bf16.msra.mxu1 %v6149_v23  ;;  %3302 = vmatprep.subr.bf16.mxu0 %v6154_v25  ;;  %v6206_v25 = vld [vmem:[#allocation19 + $0x30] sm:$0xff]  }
 0x4f4   :  { %3343 = vmatprep.subr.bf16.mxu1 %v6157_v26 }
 0x4f6   :  { %3303 = vmatpush1.bf16.msra.mxu0 %v6152_v27 }
 0x4f7   :  { %3344 = vmatpush1.bf16.msra.mxu1 %v6155_v28  ;;  %3304 = vmatprep.subr.bf16.mxu0 %v6160_v29 }
 0x4f8   :  { %3345 = vmatprep.subr.bf16.mxu1 %v6163_v30  ;;  %v6207_v30 = vld [vmem:[#allocation19 + $0x38] sm:$0xff]  }
 0x4fa   :  { %3305 = vmatpush1.bf16.msra.mxu0 %v6158_v31 }
 0x4fb   :  { %3346 = vmatpush1.bf16.msra.mxu1 %v6161_v32  ;;  %3306 = vmatprep.subr.bf16.mxu0 %v6166_v33  ;;  %v1326_v32 = vsub.s32 4, %v7189_v40  ;;  %v1330_v33 = vsub.s32 5, %v7189_v40 }
 0x4fc   :  { %3347 = vmatprep.subr.bf16.mxu1 %v6169_v34 }
 0x4fd   :  { %v1327_v34 = vrot.slane %v7232_v54, %v1326_v32 }
 0x4fe   :  { %3307 = vmatpush1.bf16.msra.mxu0 %v6164_v35  ;;  %v1331_v35 = vrot.slane %v7232_v54, %v1330_v33 }
 0x4ff   :  { %3348 = vmatpush1.bf16.msra.mxu1 %v6167_v36  ;;  %3308 = vmatprep.subr.bf16.mxu0 %v6172_v37 }
 0x500   :  { %3349 = vmatprep.subr.bf16.mxu1 %v6175_v38 }
 0x502   :  { %3309 = vmatpush1.bf16.msra.mxu0 %v6170_v39 }
 0x503   :  { %3350 = vmatpush1.bf16.msra.mxu1 %v6173_v15  ;;  %3310 = vmatprep.subr.bf16.mxu0 %v6178_v43 }
 0x504   :  { %3351 = vmatprep.subr.bf16.mxu1 %v6181_v46 }
 0x506   :  { %3311 = vmatpush1.bf16.msra.mxu0 %v6176_v24 }
 0x507   :  { %3352 = vmatpush1.bf16.msra.mxu1 %v6179_v47  ;;  %3312 = vmatprep.subr.bf16.mxu0 %v6184_v48 }
 0x508   :  { %3353 = vmatprep.subr.bf16.mxu1 %v6187_v49 }
 0x50a   :  { %3313 = vmatpush1.bf16.msra.mxu0 %v6182_v50 }
 0x50b   :  { %3354 = vmatpush1.bf16.msra.mxu1 %v6185_v51  ;;  %3314 = vmatprep.subr.bf16.mxu0 %v6190_v62  ;;  %v6208_v51 = vld [vmem:[#allocation22] sm:$0xff]   ;;  %v6209_v62 = vld [vmem:[#allocation22 + $0x8] sm:$0xff]  }
 0x50c   :  { %3355 = vmatprep.subr.bf16.mxu1 %v6193_v52  ;;  %v6210_v52 = vld [vmem:[#allocation22 + $0x10] sm:$0xff]  }
 0x50e   :  { %3315 = vmatpush1.bf16.msra.mxu0 %v6188_v53  ;;  %v6211_v53 = vld [vmem:[#allocation22 + $0x18] sm:$0xff]  }
 0x50f   :  { %3356 = vmatpush1.bf16.msra.mxu1 %v6191_v14  ;;  %3316 = vmatprep.subr.bf16.mxu0 %v6196_v55  ;;  %v6212_v14 = vld [vmem:[#allocation22 + $0x20] sm:$0xff]   ;;  %v6213_v55 = vld [vmem:[#allocation22 + $0x28] sm:$0xff]  }
 0x510   :  { %3357 = vmatprep.subr.bf16.mxu1 %v6199_v56  ;;  %v6214_v56 = vld [vmem:[#allocation22 + $0x30] sm:$0xff]  }
 0x512   :  { %3317 = vmatpush1.bf16.msra.mxu0 %v6194_v57  ;;  %v6215_v57 = vld [vmem:[#allocation22 + $0x38] sm:$0xff]  }
 0x513   :  { %3358 = vmatpush1.bf16.msra.mxu1 %v6197_v58  ;;  %5400 = vmatprep.subr.bf16.mxu0 %v6767_v4  ;;  %v1334_v58 = vsub.s32 6, %v7189_v40 }
 0x514   :  { %5420 = vmatprep.subr.bf16.mxu1 %v6767_v4 }
 0x515   :  { %3319 = vmatmul.mubr.bf16.vlgmr.msra.gmra.mrb[20].mxu0 %v7209_v1  ;;  %v6204_v1 = vld [vmem:[#allocation19 + $0x20] sm:$0xff]  }
 0x516   :  { %3360 = vmatmul.mubr.bf16.vlgmr.msra.gmra.mrb[28].mxu1 %v7211_v2  ;;  %5401 = vmatpush3.bf16.msra.mxu0 %v6200_v59  ;;  %v5156_v2 = vld [vmem:[#allocation6] ss:$0 sm:$0xff]  ;;  %v1338_v59 = vsub.s32 7, %v7189_v40 }
 0x517   :  { %5402 = vmatprep.subr.bf16.mxu0 %v6767_v4  ;;  %5416 = vmatprep.mubr.msk.bf16.mxu0 %vm6768_vm0, %v6767_v4  ;;  %v3392_v7 = vmul.f32 %v5156_v2, %v3384_v0 }
 0x518   :  { %5436 = vmatprep.mubr.msk.bf16.mxu1 %vm6768_vm0, %v6767_v4  ;;  %5421 = vmatpush3.bf16.msra.mxu1 %v6208_v51  ;;  %v6217_v51 = vld [vmem:[#allocation19 + $0x48] sm:$0xff]  }
 0x519   :  { %v3393_v19 = vadd.f32 %v3392_v7, %v3380_v8  ;;  %5422 = vmatprep.subr.bf16.mxu1 %v6767_v4 }
 0x51a   :  { %5403 = vmatpush3.bf16.msra.mxu0 %v6201_v60  ;;  %v1335_v60 = vrot.slane %v7232_v54, %v1334_v58  ;;  %v6226_v58 = vld [vmem:[#allocation22 + $0x50] sm:$0xff]  }
 0x51b   :  { %5404 = vmatprep.subr.bf16.mxu0 %v6767_v4  ;;  %v7266_v29 = vadd.f32 %v5157_v42, %v3393_v19 }
 0x51c   :  { %5423 = vmatpush3.bf16.msra.mxu1 %v6209_v62  ;;  %v6218_v62 = vld [vmem:[#allocation19 + $0x50] sm:$0xff]  }
 0x51d   :  { %v3402_v31 = vpack.c.bf16 %v7266_v29, %v7266_v29  ;;  %5424 = vmatprep.subr.bf16.mxu1 %v6767_v4 }
 0x51e   :  { %5405 = vmatpush3.bf16.msra.mxu0 %v6202_v61  ;;  %v1339_v61 = vrot.slane %v7232_v54, %v1338_v59  ;;  %v6227_v59 = vld [vmem:[#allocation22 + $0x58] sm:$0xff]  }
 0x51f   :  { %5406 = vmatprep.subr.bf16.mxu0 %v6767_v4 }
 0x520   :  { %5425 = vmatpush3.bf16.msra.mxu1 %v6210_v52  ;;  %v6219_v52 = vld [vmem:[#allocation19 + $0x58] sm:$0xff]  }
 0x521   :  { %5426 = vmatprep.subr.bf16.mxu1 %v6767_v4 }
 0x522   :  { %5407 = vmatpush3.bf16.msra.mxu0 %v6203_v63 }
 0x523   :  { %5408 = vmatprep.subr.bf16.mxu0 %v6767_v4 }
 0x524   :  { %5427 = vmatpush3.bf16.msra.mxu1 %v6211_v53  ;;  %v6221_v53 = vld [vmem:[#allocation19 + $0x68] sm:$0xff]  }
 0x525   :  { %5428 = vmatprep.subr.bf16.mxu1 %v6767_v4 }
 0x526   :  { %5409 = vmatpush3.bf16.msra.mxu0 %v6204_v1 }
 0x527   :  { %5410 = vmatprep.subr.bf16.mxu0 %v6767_v4 }
 0x528   :  { %v3074_v11 = vpop.f32.mrb[8].mxu0  ;;  %v3115_v12 = vpop.f32.mrb[16].mxu1  ;;  %5429 = vmatpush3.bf16.msra.mxu1 %v6212_v14  ;;  %v6222_v14 = vld [vmem:[#allocation19 + $0x70] sm:$0xff]  }
 0x529   :  { %v3075_v16 = vadd.f32 %v3074_v11, %v1319_v6  ;;  %v3076_v17 = vpop.f32.mrb[9].mxu0  ;;  %v3117_v18 = vpop.f32.mrb[17].mxu1  ;;  %5430 = vmatprep.subr.bf16.mxu1 %v6767_v4 }
 0x52a   :  { %v3077_v21 = vadd.f32 %v3076_v17, %v1323_v9  ;;  %v3078_v22 = vpop.f32.mrb[10].mxu0  ;;  %v3119_v23 = vpop.f32.mrb[18].mxu1  ;;  %5411 = vmatpush3.bf16.msra.mxu0 %v6205_v10 }
 0x52b   :  { %v7261_v26 = vadd.f32 %v3115_v12, %v3075_v16  ;;  %v3079_v27 = vpop.f32.mrb[11].mxu0  ;;  %v3120_v28 = vpop.f32.mrb[19].mxu1  ;;  %5412 = vmatprep.subr.bf16.mxu0 %v6767_v4  ;;  %v1305_v12 = vld [vmem:[#allocation18 + $0x8] sm:$0x3] }
 0x52c   :  { %v7264_v45 = vadd.f32 %v3117_v18, %v3077_v21  ;;  %5431 = vmatpush3.bf16.msra.mxu1 %v6213_v55  ;;  %v1343_v40 = vrot.slane %v1305_v12, %v7192_v41  ;;  %v1347_v16 = vrot.slane %v1305_v12, %v7196_v44  ;;  %v6223_v55 = vld [vmem:[#allocation19 + $0x78] sm:$0xff]  }
 0x52d   :  { %5432 = vmatprep.subr.bf16.mxu1 %v6767_v4 }
 0x52e   :  { %5413 = vmatpush3.bf16.msra.mxu0 %v6206_v25 }
 0x52f   :  { %5414 = vmatprep.subr.bf16.mxu0 %v6767_v4 }
 0x530   :  { %5433 = vmatpush3.bf16.msra.mxu1 %v6214_v56  ;;  %v6224_v56 = vld [vmem:[#allocation22 + $0x40] sm:$0xff]  }
 0x531   :  { %5434 = vmatprep.subr.bf16.mxu1 %v6767_v4 }
 0x532   :  { %5415 = vmatpush3.bf16.msra.mxu0 %v6207_v30 }
 0x533   :  { %5440 = vmatprep.subr.bf16.mxu0 %v6767_v4 }
 0x534   :  { %5435 = vmatpush3.bf16.msra.mxu1 %v6215_v57  ;;  %v6225_v57 = vld [vmem:[#allocation22 + $0x48] sm:$0xff]  }
 0x535   :  { %5417 = vmatmul.mubr.bf16.vlgmr.msra.gmra.mrb[24].mxu0 %v3402_v31  ;;  %5460 = vmatprep.subr.bf16.mxu1 %v6767_v4  ;;  %v5158_v31 = vld [vmem:[#allocation21] ss:$0 sm:$0xff] }
 0x536   :  { %5456 = vmatprep.mubr.msk.bf16.mxu0 %vm6768_vm0, %v6767_v4 }
 0x568   :  { %v3156_v36 = vpop.f32.mrb[12].mxu0 }
 0x569   :  { %v3157_v37 = vadd.f32 %v3156_v36, %v1327_v34  ;;  %v3197_v38 = vpop.f32.mrb[20].mxu1  ;;  %v3158_v39 = vpop.f32.mrb[13].mxu0 }
 0x56a   :  { %v3159_v15 = vadd.f32 %v3158_v39, %v1331_v35  ;;  %v3199_v43 = vpop.f32.mrb[21].mxu1  ;;  %v3160_v46 = vpop.f32.mrb[14].mxu0 }
 0x56b   :  { %v7278_v24 = vadd.f32 %v3197_v38, %v3157_v37  ;;  %v3201_v47 = vpop.f32.mrb[22].mxu1  ;;  %v3161_v48 = vpop.f32.mrb[15].mxu0  ;;  %v5167_v37 = vld [vmem:[#allocation24] ss:$0 sm:$0xff] }
 0x56c   :  { %v7280_v49 = vadd.f32 %v3199_v43, %v3159_v15  ;;  %v3202_v50 = vpop.f32.mrb[23].mxu1 }
 0x56d   :  { %v6216_v50 = vld [vmem:[#allocation19 + $0x40] sm:$0xff]  }
 0x56e   :  { %5441 = vmatpush3.bf16.msra.mxu0 %v6216_v50  ;;  %v6238_v50 = vld [vmem:[#allocation19 + $0xb0] sm:$0xff]  }
 0x56f   :  { %5442 = vmatprep.subr.bf16.mxu0 %v6767_v4 }
 0x572   :  { %5443 = vmatpush3.bf16.msra.mxu0 %v6217_v51  ;;  %v6239_v51 = vld [vmem:[#allocation19 + $0xb8] sm:$0xff]  }
 0x573   :  { %5444 = vmatprep.subr.bf16.mxu0 %v6767_v4 }
 0x576   :  { %5445 = vmatpush3.bf16.msra.mxu0 %v6218_v62  ;;  %v6240_v62 = vld [vmem:[#allocation22 + $0x80] sm:$0xff]  }
 0x577   :  { %5446 = vmatprep.subr.bf16.mxu0 %v6767_v4 }
 0x57a   :  { %5447 = vmatpush3.bf16.msra.mxu0 %v6219_v52  ;;  %v6241_v52 = vld [vmem:[#allocation22 + $0x88] sm:$0xff]  }
 0x57b   :  { %5448 = vmatprep.subr.bf16.mxu0 %v6767_v4 }
 0x5a8   :  { %v3238_v63 = vpop.f32.mrb[16].mxu0 }
 0x5a9   :  { %v3239_v1 = vadd.f32 %v3238_v63, %v1335_v60  ;;  %v3279_v2 = vpop.f32.mrb[24].mxu1  ;;  %v3240_v0 = vpop.f32.mrb[17].mxu0  ;;  %v6228_v60 = vld [vmem:[#allocation22 + $0x60] sm:$0xff]  }
 0x5aa   :  { %v3241_v3 = vadd.f32 %v3240_v0, %v1339_v61  ;;  %v3281_v5 = vpop.f32.mrb[25].mxu1  ;;  %v3242_v6 = vpop.f32.mrb[18].mxu0  ;;  %v6229_v61 = vld [vmem:[#allocation22 + $0x68] sm:$0xff]  }
 0x5ab   :  { %v7294_v7 = vadd.f32 %v3279_v2, %v3239_v1  ;;  %v3283_v8 = vpop.f32.mrb[26].mxu1  ;;  %v3243_v9 = vpop.f32.mrb[19].mxu0 }
 0x5ac   :  { %v7296_v10 = vadd.f32 %v3281_v5, %v3241_v3  ;;  %v3284_v11 = vpop.f32.mrb[27].mxu1 }
 0x5ad   :  { %v5176_v11 = vld [vmem:[#allocation25] ss:$0 sm:$0xff] }
 0x5e8   :  { %v3320_v54 = vpop.f32.mrb[20].mxu0 }
 0x5e9   :  { %v3321_v17 = vadd.f32 %v3320_v54, %v1343_v40  ;;  %v3361_v18 = vpop.f32.mrb[28].mxu1  ;;  %v3322_v19 = vpop.f32.mrb[21].mxu0  ;;  %v5177_v40 = vld [vmem:[#allocation27] ss:$0 sm:$0xff] }
 0x5ea   :  { %v3323_v21 = vadd.f32 %v3322_v19, %v1347_v16  ;;  %v3363_v22 = vpop.f32.mrb[29].mxu1  ;;  %v3324_v23 = vpop.f32.mrb[22].mxu0 }
 0x5eb   :  { %v7300_v42 = vadd.f32 %v3361_v18, %v3321_v17  ;;  %v3365_v25 = vpop.f32.mrb[30].mxu1  ;;  %v3325_v27 = vpop.f32.mrb[23].mxu0  ;;  %v5178_v23 = vld [vmem:[#allocation21 + $0x1] ss:$0 sm:$0xff] }
 0x5ec   :  { %v7302_v28 = vadd.f32 %v3363_v22, %v3323_v21  ;;  %v3366_v30 = vpop.f32.mrb[31].mxu1  ;;  %v6230_v21 = vld [vmem:[#allocation22 + $0x70] sm:$0xff]   ;;  %v6231_v22 = vld [vmem:[#allocation22 + $0x78] sm:$0xff]  }
 0x608   :  { %v3506_v32 = vpop.f32.mrb[24].mxu0 }
 0x609   :  { %v3507_v33 = vadd.f32 %v5158_v31, %v3506_v32  ;;  %v5418_v41 = vpop.f32.mrb[25].mxu0 }
 0x60a   :  { %v3509_v34 = vpop.f32.mrb[26].mxu0 }
 0x60b   :  { %v3512_v44 = vmax.f32 %v3507_v33, 0.0  ;;  %v5419_v35 = vpop.f32.mrb[27].mxu0  ;;  %v5187_v33 = vld [vmem:[#allocation24 + $0x1] ss:$0 sm:$0xff] }
 0x60d   :  { %v3513_v36 = vpack.c.bf16 %v3512_v44, %v3512_v44 }
 0x60f   :  { %5437 = vmatmul.mubr.bf16.vlgmr.msra.gmra.mrb[32].mxu1 %v3513_v36 }
 0x610   :  { %5476 = vmatprep.mubr.msk.bf16.mxu1 %vm6768_vm0, %v6767_v4  ;;  %5461 = vmatpush3.bf16.msra.mxu1 %v6224_v56 }
 0x611   :  { %5462 = vmatprep.subr.bf16.mxu1 %v6767_v4 }
 0x614   :  { %5463 = vmatpush3.bf16.msra.mxu1 %v6225_v57 }
 0x615   :  { %5464 = vmatprep.subr.bf16.mxu1 %v6767_v4 }
 0x618   :  { %5465 = vmatpush3.bf16.msra.mxu1 %v6226_v58 }
 0x619   :  { %5466 = vmatprep.subr.bf16.mxu1 %v6767_v4 }
 0x61c   :  { %5467 = vmatpush3.bf16.msra.mxu1 %v6227_v59 }
 0x61d   :  { %5468 = vmatprep.subr.bf16.mxu1 %v6767_v4 }
 0x620   :  { %5469 = vmatpush3.bf16.msra.mxu1 %v6228_v60 }
 0x621   :  { %5470 = vmatprep.subr.bf16.mxu1 %v6767_v4 }
 0x624   :  { %5471 = vmatpush3.bf16.msra.mxu1 %v6229_v61 }
 0x625   :  { %5472 = vmatprep.subr.bf16.mxu1 %v6767_v4 }
 0x628   :  { %5473 = vmatpush3.bf16.msra.mxu1 %v6230_v21 }
 0x629   :  { %5474 = vmatprep.subr.bf16.mxu1 %v6767_v4 }
 0x62c   :  { %5475 = vmatpush3.bf16.msra.mxu1 %v6231_v22 }
 0x62d   :  { %5500 = vmatprep.subr.bf16.mxu1 %v6767_v4 }
 0x6e2   :  { %v3617_v38 = vpop.f32.mrb[32].mxu1 }
 0x6e3   :  { %v3618_v39 = vadd.f32 %v5167_v37, %v3617_v38  ;;  %v5438_v15 = vpop.f32.mrb[33].mxu1 }
 0x6e4   :  { %v3620_v43 = vpop.f32.mrb[34].mxu1  ;;  %v6233_v15 = vld [vmem:[#allocation19 + $0x88] sm:$0xff]  }
 0x6e5   :  { %v3623_v46 = vadd.f32 %v3618_v39, %v7266_v29  ;;  %v5439_v47 = vpop.f32.mrb[35].mxu1  ;;  %v6220_v29 = vld [vmem:[#allocation19 + $0x60] sm:$0xff]   ;;  %v6234_v43 = vld [vmem:[#allocation19 + $0x90] sm:$0xff]  }
 0x6e6   :  { %5449 = vmatpush3.bf16.msra.mxu0 %v6220_v29  ;;  %v6232_v39 = vld [vmem:[#allocation19 + $0x80] sm:$0xff]   ;;  %v6242_v29 = vld [vmem:[#allocation22 + $0x90] sm:$0xff]  }
 0x6e7   :  { %3624 = vadd.xlane.f32.xlu1 %v3623_v46  ;;  %v3626_v48 = vmul.f32 %v3623_v46, %v3623_v46  ;;  %5450 = vmatprep.subr.bf16.mxu0 %v6767_v4  ;;  %v6236_v47 = vld [vmem:[#allocation19 + $0xa0] sm:$0xff]  }
 0x6e9   :  { %3627 = vadd.xlane.f32.xlu0 %v3626_v48  ;;  %v6237_v48 = vld [vmem:[#allocation19 + $0xa8] sm:$0xff]  }
 0x6ea   :  { %5451 = vmatpush3.bf16.msra.mxu0 %v6221_v53  ;;  %v6243_v53 = vld [vmem:[#allocation22 + $0x98] sm:$0xff]  }
 0x6eb   :  { %5452 = vmatprep.subr.bf16.mxu0 %v6767_v4 }
 0x6ee   :  { %5453 = vmatpush3.bf16.msra.mxu0 %v6222_v14  ;;  %v6244_v14 = vld [vmem:[#allocation22 + $0xa0] sm:$0xff]  }
 0x6ef   :  { %5454 = vmatprep.subr.bf16.mxu0 %v6767_v4 }
 0x6f2   :  { %5455 = vmatpush3.bf16.msra.mxu0 %v6223_v55  ;;  %v6245_v55 = vld [vmem:[#allocation22 + $0xa8] sm:$0xff]  }
 0x6f3   :  { %5480 = vmatprep.subr.bf16.mxu0 %v6767_v4 }
 0x774   :  { %v3625_v63 = vpop.xlane.xlu1 %3624 }
 0x775   :  { %v3629_v1 = vmul.f32 0.008064516, %v3625_v63 }
 0x776   :  { %v3628_v2 = vpop.xlane.xlu0 %3627 }
 0x777   :  { %v3631_v0 = vmul.f32 %v3629_v1, %v3629_v1  ;;  %v3630_v3 = vmul.f32 0.008064516, %v3628_v2  ;;  %v3633_v8 = vsub.f32 %v3623_v46, %v3629_v1  ;;  %v6235_v46 = vld [vmem:[#allocation19 + $0x98] sm:$0xff]  }
 0x779   :  { %v3632_v5 = vsub.f32 %v3630_v3, %v3631_v0  ;;  %v5196_v0 = vld [vmem:[#allocation25 + $0x1] ss:$0 sm:$0xff] }
 0x77b   :  { %v3634_v6 = vadd.f32 1e-05, %v3632_v5  ;;  %v5197_v5 = vld [vmem:[#allocation27 + $0x1] ss:$0 sm:$0xff] }
 0x77d   :  { %6292 = vrsqrt.f32 %v3634_v6 }
 0x787   :  { %v6293_v9 = vpop.eup %6292 }
 0x788   :  { %v3636_v12 = vmul.f32 %v6293_v9, %v3633_v8 }
 0x78a   :  { %v3642_v16 = vmul.f32 %v5176_v11, %v3636_v12 }
 0x78c   :  { %v3648_v54 = vadd.f32 %v5177_v40, %v3642_v16  ;;  %v6246_v40 = vld [vmem:[#allocation22 + $0xb0] sm:$0xff]   ;;  %v6247_v16 = vld [vmem:[#allocation22 + $0xb8] sm:$0xff]  }
 0x78e   :  { %v3649_v17 = vmul.f32 %v3648_v54, %v7238_v13  ;;  %v5198_v54 = vld [vmem:[#allocation21 + $0x2] ss:$0 sm:$0xff] }
 0x790   :  { %v3650_v18 = vadd.f32 %v3649_v17, %v7240_v20 }
 0x792   :  { %v3651_v19 = vpack.c.bf16 %v3650_v18, %v3650_v18 }
 0x794   :  { %5457 = vmatmul.mubr.bf16.vlgmr.msra.gmra.mrb[28].mxu0 %v3651_v19 }
 0x795   :  { %5496 = vmatprep.mubr.msk.bf16.mxu0 %vm6768_vm0, %v6767_v4  ;;  %5481 = vmatpush3.bf16.msra.mxu0 %v6232_v39  ;;  %v6256_v39 = vld [vmem:[#allocation22 + $0xc0] sm:$0xff]  }
 0x796   :  { %5482 = vmatprep.subr.bf16.mxu0 %v6767_v4 }
 0x799   :  { %5483 = vmatpush3.bf16.msra.mxu0 %v6233_v15  ;;  %v6257_v15 = vld [vmem:[#allocation22 + $0xc8] sm:$0xff]  }
 0x79a   :  { %5484 = vmatprep.subr.bf16.mxu0 %v6767_v4 }
 0x79d   :  { %5485 = vmatpush3.bf16.msra.mxu0 %v6234_v43  ;;  %v6258_v43 = vld [vmem:[#allocation22 + $0xd0] sm:$0xff]  }
 0x79e   :  { %5486 = vmatprep.subr.bf16.mxu0 %v6767_v4 }
 0x7a1   :  { %5487 = vmatpush3.bf16.msra.mxu0 %v6235_v46  ;;  %v6259_v46 = vld [vmem:[#allocation22 + $0xd8] sm:$0xff]  }
 0x7a2   :  { %5488 = vmatprep.subr.bf16.mxu0 %v6767_v4 }
 0x7a5   :  { %5489 = vmatpush3.bf16.msra.mxu0 %v6236_v47  ;;  %v6260_v47 = vld [vmem:[#allocation22 + $0xe0] sm:$0xff]  }
 0x7a6   :  { %5490 = vmatprep.subr.bf16.mxu0 %v6767_v4 }
 0x7a9   :  { %5491 = vmatpush3.bf16.msra.mxu0 %v6237_v48  ;;  %v6261_v48 = vld [vmem:[#allocation22 + $0xe8] sm:$0xff]  }
 0x7aa   :  { %5492 = vmatprep.subr.bf16.mxu0 %v6767_v4 }
 0x7ad   :  { %5493 = vmatpush3.bf16.msra.mxu0 %v6238_v50 }
 0x7ae   :  { %5494 = vmatprep.subr.bf16.mxu0 %v6767_v4 }
 0x7b1   :  { %5495 = vmatpush3.bf16.msra.mxu0 %v6239_v51 }
 0x7b2   :  { %5520 = vmatprep.subr.bf16.mxu0 %v6767_v4 }
 0x867   :  { %v3756_v25 = vpop.f32.mrb[28].mxu0 }
 0x868   :  { %v3757_v27 = vadd.f32 %v5178_v23, %v3756_v25  ;;  %v5458_v30 = vpop.f32.mrb[29].mxu0  ;;  %v5207_v23 = vld [vmem:[#allocation24 + $0x2] ss:$0 sm:$0xff] }
 0x869   :  { %v3759_v13 = vpop.f32.mrb[30].mxu0 }
 0x86a   :  { %v3762_v31 = vmax.f32 %v3757_v27, 0.0  ;;  %v5459_v20 = vpop.f32.mrb[31].mxu0 }
 0x86c   :  { %v3763_v32 = vpack.c.bf16 %v3762_v31, %v3762_v31 }
 0x86e   :  { %5477 = vmatmul.mubr.bf16.vlgmr.msra.gmra.mrb[36].mxu1 %v3763_v32 }
 0x86f   :  { %5516 = vmatprep.mubr.msk.bf16.mxu1 %vm6768_vm0, %v6767_v4  ;;  %5501 = vmatpush3.bf16.msra.mxu1 %v6240_v62 }
 0x870   :  { %5502 = vmatprep.subr.bf16.mxu1 %v6767_v4 }
 0x873   :  { %5503 = vmatpush3.bf16.msra.mxu1 %v6241_v52 }
 0x874   :  { %5504 = vmatprep.subr.bf16.mxu1 %v6767_v4 }
 0x877   :  { %5505 = vmatpush3.bf16.msra.mxu1 %v6242_v29 }
 0x878   :  { %5506 = vmatprep.subr.bf16.mxu1 %v6767_v4 }
 0x87b   :  { %5507 = vmatpush3.bf16.msra.mxu1 %v6243_v53 }
 0x87c   :  { %5508 = vmatprep.subr.bf16.mxu1 %v6767_v4 }
 0x87f   :  { %5509 = vmatpush3.bf16.msra.mxu1 %v6244_v14 }
 0x880   :  { %5510 = vmatprep.subr.bf16.mxu1 %v6767_v4 }
 0x883   :  { %5511 = vmatpush3.bf16.msra.mxu1 %v6245_v55 }
 0x884   :  { %5512 = vmatprep.subr.bf16.mxu1 %v6767_v4 }
 0x887   :  { %5513 = vmatpush3.bf16.msra.mxu1 %v6246_v40  ;;  %v5227_v40 = vld [vmem:[#allocation24 + $0x3] ss:$0 sm:$0xff] }
 0x888   :  { %5514 = vmatprep.subr.bf16.mxu1 %v6767_v4 }
 0x88b   :  { %5515 = vmatpush3.bf16.msra.mxu1 %v6247_v16 }
 0x88c   :  { %5540 = vmatprep.subr.bf16.mxu1 %v6767_v4 }
 0x941   :  { %v3868_v41 = vpop.f32.mrb[36].mxu1 }
 0x942   :  { %v3869_v34 = vadd.f32 %v5187_v33, %v3868_v41  ;;  %v5478_v44 = vpop.f32.mrb[37].mxu1  ;;  %v6248_v33 = vld [vmem:[#allocation19 + $0xc0] sm:$0xff]   ;;  %v6249_v41 = vld [vmem:[#allocation19 + $0xc8] sm:$0xff]  }
 0x943   :  { %v3871_v35 = vpop.f32.mrb[38].mxu1  ;;  %v6251_v44 = vld [vmem:[#allocation19 + $0xd8] sm:$0xff]  }
 0x944   :  { %v3874_v36 = vadd.f32 %v3869_v34, %v3650_v18  ;;  %v5479_v37 = vpop.f32.mrb[39].mxu1  ;;  %v6250_v34 = vld [vmem:[#allocation19 + $0xd0] sm:$0xff]   ;;  %v6252_v35 = vld [vmem:[#allocation19 + $0xe0] sm:$0xff]  }
 0x945   :  { %v6254_v37 = vld [vmem:[#allocation19 + $0xf0] sm:$0xff]  }
 0x946   :  { %3875 = vadd.xlane.f32.xlu1 %v3874_v36  ;;  %v3877_v38 = vmul.f32 %v3874_v36, %v3874_v36 }
 0x948   :  { %3878 = vadd.xlane.f32.xlu0 %v3877_v38  ;;  %v6255_v38 = vld [vmem:[#allocation19 + $0xf8] sm:$0xff]  }
 0x9d3   :  { %v3876_v56 = vpop.xlane.xlu1 %3875 }
 0x9d4   :  { %v3880_v57 = vmul.f32 0.008064516, %v3876_v56 }
 0x9d5   :  { %v3879_v58 = vpop.xlane.xlu0 %3878 }
 0x9d6   :  { %v3882_v59 = vmul.f32 %v3880_v57, %v3880_v57  ;;  %v3881_v60 = vmul.f32 0.008064516, %v3879_v58  ;;  %v3884_v1 = vsub.f32 %v3874_v36, %v3880_v57  ;;  %v6253_v36 = vld [vmem:[#allocation19 + $0xe8] sm:$0xff]   ;;  %v5216_v57 = vld [vmem:[#allocation25 + $0x2] ss:$0 sm:$0xff] }
 0x9d8   :  { %v3883_v61 = vsub.f32 %v3881_v60, %v3882_v59  ;;  %v5217_v59 = vld [vmem:[#allocation27 + $0x2] ss:$0 sm:$0xff] }
 0x9da   :  { %v3885_v63 = vadd.f32 1e-05, %v3883_v61 }
 0x9dc   :  { %6294 = vrsqrt.f32 %v3885_v63 }
 0x9e6   :  { %v6295_v2 = vpop.eup %6294 }
 0x9e7   :  { %v3887_v3 = vmul.f32 %v6295_v2, %v3884_v1 }
 0x9e9   :  { %v3893_v6 = vmul.f32 %v5196_v0, %v3887_v3  ;;  %v6262_v0 = vld [vmem:[#allocation22 + $0xf0] sm:$0xff]   ;;  %v6263_v3 = vld [vmem:[#allocation22 + $0xf8] sm:$0xff]  }
 0x9eb   :  { %v3899_v8 = vadd.f32 %v5197_v5, %v3893_v6  ;;  %v5218_v5 = vld [vmem:[#allocation21 + $0x3] ss:$0 sm:$0xff] }
 0x9ed   :  { %v3900_v9 = vmul.f32 %v3899_v8, %v7261_v26 }
 0x9ef   :  { %v3901_v11 = vadd.f32 %v3900_v9, %v7264_v45 }
 0x9f1   :  { %v3902_v12 = vpack.c.bf16 %v3901_v11, %v3901_v11 }
 0x9f3   :  { %5497 = vmatmul.mubr.bf16.vlgmr.msra.gmra.mrb[32].mxu0 %v3902_v12 }
 0x9f4   :  { %5536 = vmatprep.mubr.msk.bf16.mxu0 %vm6768_vm0, %v6767_v4  ;;  %5521 = vmatpush3.bf16.msra.mxu0 %v6248_v33  ;;  %v6274_v33 = vld [vmem:[#allocation22 + $0x110] sm:$0xff]  }
 0x9f5   :  { %5522 = vmatprep.subr.bf16.mxu0 %v6767_v4 }
 0x9f8   :  { %5523 = vmatpush3.bf16.msra.mxu0 %v6249_v41  ;;  %v6275_v41 = vld [vmem:[#allocation22 + $0x118] sm:$0xff]  }
 0x9f9   :  { %5524 = vmatprep.subr.bf16.mxu0 %v6767_v4 }
 0x9fc   :  { %5525 = vmatpush3.bf16.msra.mxu0 %v6250_v34  ;;  %v6276_v34 = vld [vmem:[#allocation22 + $0x120] sm:$0xff]  }
 0x9fd   :  { %5526 = vmatprep.subr.bf16.mxu0 %v6767_v4 }
 0xa00   :  { %5527 = vmatpush3.bf16.msra.mxu0 %v6251_v44  ;;  %v6277_v44 = vld [vmem:[#allocation22 + $0x128] sm:$0xff]  }
 0xa01   :  { %5528 = vmatprep.subr.bf16.mxu0 %v6767_v4 }
 0xa04   :  { %5529 = vmatpush3.bf16.msra.mxu0 %v6252_v35 }
 0xa05   :  { %5530 = vmatprep.subr.bf16.mxu0 %v6767_v4 }
 0xa08   :  { %5531 = vmatpush3.bf16.msra.mxu0 %v6253_v36 }
 0xa09   :  { %5532 = vmatprep.subr.bf16.mxu0 %v6767_v4 }
 0xa0c   :  { %5533 = vmatpush3.bf16.msra.mxu0 %v6254_v37 }
 0xa0d   :  { %5534 = vmatprep.subr.bf16.mxu0 %v6767_v4 }
 0xa10   :  { %5535 = vmatpush3.bf16.msra.mxu0 %v6255_v38 }
 0xa11   :  { %5560 = vmatprep.subr.bf16.mxu0 %v6767_v4 }
 0xac6   :  { %v4007_v17 = vpop.f32.mrb[32].mxu0 }
 0xac7   :  { %v4008_v18 = vadd.f32 %v5198_v54, %v4007_v17  ;;  %v5498_v19 = vpop.f32.mrb[33].mxu0 }
 0xac8   :  { %v4010_v26 = vpop.f32.mrb[34].mxu0 }
 0xac9   :  { %v4013_v21 = vmax.f32 %v4008_v18, 0.0  ;;  %v5499_v45 = vpop.f32.mrb[35].mxu0 }
 0xaca   :  { %v6264_v45 = vld [vmem:[#allocation19 + $0x100] sm:$0xff]  }
 0xacb   :  { %v4014_v22 = vpack.c.bf16 %v4013_v21, %v4013_v21 }
 0xacd   :  { %5517 = vmatmul.mubr.bf16.vlgmr.msra.gmra.mrb[40].mxu1 %v4014_v22  ;;  %v6265_v22 = vld [vmem:[#allocation19 + $0x108] sm:$0xff]  }
 0xace   :  { %5556 = vmatprep.mubr.msk.bf16.mxu1 %vm6768_vm0, %v6767_v4  ;;  %5541 = vmatpush3.bf16.msra.mxu1 %v6256_v39 }
 0xacf   :  { %5542 = vmatprep.subr.bf16.mxu1 %v6767_v4 }
 0xad2   :  { %5543 = vmatpush3.bf16.msra.mxu1 %v6257_v15 }
 0xad3   :  { %5544 = vmatprep.subr.bf16.mxu1 %v6767_v4 }
 0xad6   :  { %5545 = vmatpush3.bf16.msra.mxu1 %v6258_v43 }
 0xad7   :  { %5546 = vmatprep.subr.bf16.mxu1 %v6767_v4 }
 0xada   :  { %5547 = vmatpush3.bf16.msra.mxu1 %v6259_v46 }
 0xadb   :  { %5548 = vmatprep.subr.bf16.mxu1 %v6767_v4 }
 0xade   :  { %5549 = vmatpush3.bf16.msra.mxu1 %v6260_v47 }
 0xadf   :  { %5550 = vmatprep.subr.bf16.mxu1 %v6767_v4 }
 0xae2   :  { %5551 = vmatpush3.bf16.msra.mxu1 %v6261_v48  ;;  %v5236_v48 = vld [vmem:[#allocation25 + $0x3] ss:$0 sm:$0xff] }
 0xae3   :  { %5552 = vmatprep.subr.bf16.mxu1 %v6767_v4 }
 0xae6   :  { %5553 = vmatpush3.bf16.msra.mxu1 %v6262_v0 }
 0xae7   :  { %5554 = vmatprep.subr.bf16.mxu1 %v6767_v4 }
 0xaea   :  { %5555 = vmatpush3.bf16.msra.mxu1 %v6263_v3 }
 0xaeb   :  { %5580 = vmatprep.subr.bf16.mxu1 %v6767_v4 }
 0xba0   :  { %v4119_v25 = vpop.f32.mrb[40].mxu1 }
 0xba1   :  { %v4120_v27 = vadd.f32 %v5207_v23, %v4119_v25  ;;  %v5518_v30 = vpop.f32.mrb[41].mxu1  ;;  %v6266_v23 = vld [vmem:[#allocation19 + $0x110] sm:$0xff]   ;;  %v6267_v25 = vld [vmem:[#allocation19 + $0x118] sm:$0xff]  }
 0xba2   :  { %v4122_v13 = vpop.f32.mrb[42].mxu1  ;;  %v6269_v30 = vld [vmem:[#allocation19 + $0x128] sm:$0xff]  }
 0xba3   :  { %v4125_v31 = vadd.f32 %v4120_v27, %v3901_v11  ;;  %v5519_v20 = vpop.f32.mrb[43].mxu1  ;;  %v6268_v27 = vld [vmem:[#allocation19 + $0x120] sm:$0xff]   ;;  %v6270_v13 = vld [vmem:[#allocation19 + $0x130] sm:$0xff]  }
 0xba4   :  { %v6272_v20 = vld [vmem:[#allocation22 + $0x100] sm:$0xff]  }
 0xba5   :  { %4126 = vadd.xlane.f32.xlu1 %v4125_v31  ;;  %v4128_v32 = vmul.f32 %v4125_v31, %v4125_v31 }
 0xba7   :  { %4129 = vadd.xlane.f32.xlu0 %v4128_v32  ;;  %v6273_v32 = vld [vmem:[#allocation22 + $0x108] sm:$0xff]  }
 0xc32   :  { %v4127_v50 = vpop.xlane.xlu1 %4126 }
 0xc33   :  { %v4131_v51 = vmul.f32 0.008064516, %v4127_v50 }
 0xc34   :  { %v4130_v62 = vpop.xlane.xlu0 %4129 }
 0xc35   :  { %v4133_v52 = vmul.f32 %v4131_v51, %v4131_v51  ;;  %v4132_v29 = vmul.f32 0.008064516, %v4130_v62  ;;  %v4135_v55 = vsub.f32 %v4125_v31, %v4131_v51  ;;  %v6271_v31 = vld [vmem:[#allocation19 + $0x138] sm:$0xff]  }
 0xc36   :  { %v5237_v51 = vld [vmem:[#allocation27 + $0x3] ss:$0 sm:$0xff] }
 0xc37   :  { %v4134_v53 = vsub.f32 %v4132_v29, %v4133_v52 }
 0xc39   :  { %v4136_v14 = vadd.f32 1e-05, %v4134_v53 }
 0xc3b   :  { %6296 = vrsqrt.f32 %v4136_v14 }
 0xc45   :  { %v6297_v56 = vpop.eup %6296 }
 0xc46   :  { %v4138_v58 = vmul.f32 %v6297_v56, %v4135_v55  ;;  %v6278_v55 = vld [vmem:[#allocation22 + $0x130] sm:$0xff]   ;;  %v6279_v56 = vld [vmem:[#allocation22 + $0x138] sm:$0xff]  }
 0xc48   :  { %v4144_v60 = vmul.f32 %v5216_v57, %v4138_v58  ;;  %v5238_v57 = vld [vmem:[#allocation21 + $0x4] ss:$0 sm:$0xff] }
 0xc4a   :  { %v4150_v61 = vadd.f32 %v5217_v59, %v4144_v60 }
 0xc4c   :  { %v4151_v63 = vmul.f32 %v4150_v61, %v7278_v24 }
 0xc4e   :  { %v4152_v1 = vadd.f32 %v4151_v63, %v7280_v49 }
 0xc50   :  { %v4153_v2 = vpack.c.bf16 %v4152_v1, %v4152_v1 }
 0xc52   :  { %5537 = vmatmul.mubr.bf16.vlgmr.msra.gmra.mrb[36].mxu0 %v4153_v2 }
 0xc53   :  { %5576 = vmatprep.mubr.msk.bf16.mxu0 %vm6768_vm0, %v6767_v4  ;;  %5561 = vmatpush3.bf16.msra.mxu0 %v6264_v45 }
 0xc54   :  { %5562 = vmatprep.subr.bf16.mxu0 %v6767_v4 }
 0xc57   :  { %5563 = vmatpush3.bf16.msra.mxu0 %v6265_v22 }
 0xc58   :  { %5564 = vmatprep.subr.bf16.mxu0 %v6767_v4 }
 0xc5b   :  { %5565 = vmatpush3.bf16.msra.mxu0 %v6266_v23 }
 0xc5c   :  { %5566 = vmatprep.subr.bf16.mxu0 %v6767_v4 }
 0xc5f   :  { %5567 = vmatpush3.bf16.msra.mxu0 %v6267_v25 }
 0xc60   :  { %5568 = vmatprep.subr.bf16.mxu0 %v6767_v4 }
 0xc63   :  { %5569 = vmatpush3.bf16.msra.mxu0 %v6268_v27 }
 0xc64   :  { %5570 = vmatprep.subr.bf16.mxu0 %v6767_v4 }
 0xc67   :  { %5571 = vmatpush3.bf16.msra.mxu0 %v6269_v30  ;;  %v5256_v30 = vld [vmem:[#allocation25 + $0x4] ss:$0 sm:$0xff] }
 0xc68   :  { %5572 = vmatprep.subr.bf16.mxu0 %v6767_v4 }
 0xc6b   :  { %5573 = vmatpush3.bf16.msra.mxu0 %v6270_v13 }
 0xc6c   :  { %5574 = vmatprep.subr.bf16.mxu0 %v6767_v4 }
 0xc6f   :  { %5575 = vmatpush3.bf16.msra.mxu0 %v6271_v31  ;;  %v5257_v31 = vld [vmem:[#allocation27 + $0x4] ss:$0 sm:$0xff] }
 0xc70   :  { %5600 = vmatprep.subr.bf16.mxu0 %v6767_v4 }
 0xd25   :  { %v4258_v6 = vpop.f32.mrb[36].mxu0 }
 0xd26   :  { %v4259_v8 = vadd.f32 %v5218_v5, %v4258_v6  ;;  %v5538_v9 = vpop.f32.mrb[37].mxu0 }
 0xd27   :  { %v4261_v24 = vpop.f32.mrb[38].mxu0 }
 0xd28   :  { %v4264_v11 = vmax.f32 %v4259_v8, 0.0  ;;  %v5539_v49 = vpop.f32.mrb[39].mxu0  ;;  %v6280_v24 = vld [vmem:[#allocation28] sm:$0xff]  }
 0xd29   :  { %v6282_v49 = vld [vmem:[#allocation28 + $0x10] sm:$0xff]  }
 0xd2a   :  { %v4265_v12 = vpack.c.bf16 %v4264_v11, %v4264_v11  ;;  %v6281_v11 = vld [vmem:[#allocation28 + $0x8] sm:$0xff]  }
 0xd2c   :  { %5557 = vmatmul.mubr.bf16.vlgmr.msra.gmra.mrb[44].mxu1 %v4265_v12  ;;  %v6283_v12 = vld [vmem:[#allocation28 + $0x18] sm:$0xff]  }
 0xd2d   :  { %5596 = vmatprep.mubr.msk.bf16.mxu1 %vm6768_vm0, %v6767_v4  ;;  %5581 = vmatpush3.bf16.msra.mxu1 %v6272_v20 }
 0xd2e   :  { %5582 = vmatprep.subr.bf16.mxu1 %v6767_v4 }
 0xd31   :  { %5583 = vmatpush3.bf16.msra.mxu1 %v6273_v32 }
 0xd32   :  { %5584 = vmatprep.subr.bf16.mxu1 %v6767_v4 }
 0xd35   :  { %5585 = vmatpush3.bf16.msra.mxu1 %v6274_v33 }
 0xd36   :  { %5586 = vmatprep.subr.bf16.mxu1 %v6767_v4 }
 0xd39   :  { %5587 = vmatpush3.bf16.msra.mxu1 %v6275_v41 }
 0xd3a   :  { %5588 = vmatprep.subr.bf16.mxu1 %v6767_v4 }
 0xd3d   :  { %5589 = vmatpush3.bf16.msra.mxu1 %v6276_v34  ;;  %v5258_v34 = vld [vmem:[#allocation30] ss:$0 sm:$0xff] }
 0xd3e   :  { %5590 = vmatprep.subr.bf16.mxu1 %v6767_v4 }
 0xd41   :  { %5591 = vmatpush3.bf16.msra.mxu1 %v6277_v44 }
 0xd42   :  { %5592 = vmatprep.subr.bf16.mxu1 %v6767_v4 }
 0xd45   :  { %5593 = vmatpush3.bf16.msra.mxu1 %v6278_v55 }
 0xd46   :  { %5594 = vmatprep.subr.bf16.mxu1 %v6767_v4 }
 0xd49   :  { %5595 = vmatpush3.bf16.msra.mxu1 %v6279_v56 }
 0xdff   :  { %v4370_v16 = vpop.f32.mrb[44].mxu1 }
 0xe00   :  { %v4371_v54 = vadd.f32 %v5227_v40, %v4370_v16  ;;  %v5558_v17 = vpop.f32.mrb[45].mxu1  ;;  %v6284_v40 = vld [vmem:[#allocation28 + $0x20] sm:$0xff]   ;;  %v6285_v16 = vld [vmem:[#allocation28 + $0x28] sm:$0xff]  }
 0xe01   :  { %v4373_v18 = vpop.f32.mrb[46].mxu1  ;;  %v6287_v17 = vld [vmem:[#allocation28 + $0x38] sm:$0xff]  }
 0xe02   :  { %v4376_v19 = vadd.f32 %v4371_v54, %v4152_v1  ;;  %v5559_v26 = vpop.f32.mrb[47].mxu1  ;;  %v6286_v54 = vld [vmem:[#allocation28 + $0x30] sm:$0xff]  }
 0xe04   :  { %4377 = vadd.xlane.f32.xlu1 %v4376_v19  ;;  %v4379_v21 = vmul.f32 %v4376_v19, %v4376_v19 }
 0xe06   :  { %4380 = vadd.xlane.f32.xlu0 %v4379_v21 }
 0xe91   :  { %v4378_v35 = vpop.xlane.xlu1 %4377 }
 0xe92   :  { %v4382_v36 = vmul.f32 0.008064516, %v4378_v35 }
 0xe93   :  { %v4381_v37 = vpop.xlane.xlu0 %4380 }
 0xe94   :  { %v4384_v38 = vmul.f32 %v4382_v36, %v4382_v36  ;;  %v4383_v39 = vmul.f32 0.008064516, %v4381_v37  ;;  %v4386_v46 = vsub.f32 %v4376_v19, %v4382_v36 }
 0xe96   :  { %v4385_v15 = vsub.f32 %v4383_v39, %v4384_v38 }
 0xe98   :  { %v4387_v43 = vadd.f32 1e-05, %v4385_v15 }
 0xe9a   :  { %6298 = vrsqrt.f32 %v4387_v43 }
 0xea4   :  { %v6299_v47 = vpop.eup %6298 }
 0xea5   :  { %v4389_v50 = vmul.f32 %v6299_v47, %v4386_v46 }
 0xea7   :  { %v4395_v62 = vmul.f32 %v5236_v48, %v4389_v50 }
 0xea9   :  { %v4401_v52 = vadd.f32 %v5237_v51, %v4395_v62 }
 0xeab   :  { %v4402_v29 = vmul.f32 %v4401_v52, %v7294_v7 }
 0xead   :  { %v4403_v53 = vadd.f32 %v4402_v29, %v7296_v10  ;;  %v5247_v10 = vld [vmem:[#allocation24 + $0x4] ss:$0 sm:$0xff] }
 0xeaf   :  { %v4404_v14 = vpack.c.bf16 %v4403_v53, %v4403_v53 }
 0xeb1   :  { %5577 = vmatmul.mubr.bf16.vlgmr.msra.gmra.mrb[40].mxu0 %v4404_v14 }
 0xeb2   :  { %5616 = vmatprep.mubr.msk.bf16.mxu0 %vm6768_vm0, %v6767_v4  ;;  %5601 = vmatpush3.bf16.msra.mxu0 %v6280_v24  ;;  %vm4767_vm0 = vcmask 64512  }
 0xeb3   :  { %5602 = vmatprep.subr.bf16.mxu0 %v6767_v4 }
 0xeb6   :  { %5603 = vmatpush3.bf16.msra.mxu0 %v6281_v11 }
 0xeb7   :  { %5604 = vmatprep.subr.bf16.mxu0 %v6767_v4 }
 0xeba   :  { %5605 = vmatpush3.bf16.msra.mxu0 %v6282_v49 }
 0xebb   :  { %5606 = vmatprep.subr.bf16.mxu0 %v6767_v4 }
 0xebe   :  { %5607 = vmatpush3.bf16.msra.mxu0 %v6283_v12 }
 0xebf   :  { %5608 = vmatprep.subr.bf16.mxu0 %v6767_v4 }
 0xec2   :  { %5609 = vmatpush3.bf16.msra.mxu0 %v6284_v40 }
 0xec3   :  { %5610 = vmatprep.subr.bf16.mxu0 %v6767_v4 }
 0xec6   :  { %5611 = vmatpush3.bf16.msra.mxu0 %v6285_v16 }
 0xec7   :  { %5612 = vmatprep.subr.bf16.mxu0 %v6767_v4 }
 0xeca   :  { %5613 = vmatpush3.bf16.msra.mxu0 %v6286_v54 }
 0xecb   :  { %5614 = vmatprep.subr.bf16.mxu0 %v6767_v4 }
 0xece   :  { %5615 = vmatpush3.bf16.msra.mxu0 %v6287_v17 }
 0xf84   :  { %v4509_v58 = vpop.f32.mrb[40].mxu0 }
 0xf85   :  { %v4510_v59 = vadd.f32 %v5238_v57, %v4509_v58  ;;  %v5578_v60 = vpop.f32.mrb[41].mxu0 }
 0xf86   :  { %v4512_v61 = vpop.f32.mrb[42].mxu0 }
 0xf87   :  { %v4515_v63 = vmax.f32 %v4510_v59, 0.0  ;;  %v5579_v7 = vpop.f32.mrb[43].mxu0 }
 0xf89   :  { %v4516_v1 = vpack.c.bf16 %v4515_v63, %v4515_v63 }
 0xf8b   :  { %5597 = vmatmul.mubr.bf16.vlgmr.msra.gmra.mrb[48].mxu1 %v4516_v1 }
0x105e   :  { %v4621_v2 = vpop.f32.mrb[48].mxu1 }
0x105f   :  { %v4622_v0 = vadd.f32 %v5247_v10, %v4621_v2  ;;  %v5598_v3 = vpop.f32.mrb[49].mxu1 }
0x1060   :  { %v4624_v5 = vpop.f32.mrb[50].mxu1 }
0x1061   :  { %v4627_v6 = vadd.f32 %v4622_v0, %v4403_v53  ;;  %v5599_v8 = vpop.f32.mrb[51].mxu1 }
0x1063   :  { %4628 = vadd.xlane.f32.xlu1 %v4627_v6  ;;  %v4630_v9 = vmul.f32 %v4627_v6, %v4627_v6 }
0x1065   :  { %4631 = vadd.xlane.f32.xlu0 %v4630_v9 }
0x10f0   :  { %v4629_v18 = vpop.xlane.xlu1 %4628 }
0x10f1   :  { %v4633_v19 = vmul.f32 0.008064516, %v4629_v18 }
0x10f2   :  { %v4632_v26 = vpop.xlane.xlu0 %4631 }
0x10f3   :  { %v4635_v21 = vmul.f32 %v4633_v19, %v4633_v19  ;;  %v4634_v45 = vmul.f32 0.008064516, %v4632_v26  ;;  %v4637_v25 = vsub.f32 %v4627_v6, %v4633_v19 }
0x10f5   :  { %v4636_v22 = vsub.f32 %v4634_v45, %v4635_v21 }
0x10f7   :  { %v4638_v23 = vadd.f32 1e-05, %v4636_v22 }
0x10f9   :  { %6300 = vrsqrt.f32 %v4638_v23 }
0x1103   :  { %v6301_v27 = vpop.eup %6300 }
0x1104   :  { %v4640_v13 = vmul.f32 %v6301_v27, %v4637_v25 }
0x1106   :  { %v4646_v20 = vmul.f32 %v5256_v30, %v4640_v13 }
0x1108   :  { %v4652_v32 = vadd.f32 %v5257_v31, %v4646_v20 }
0x110a   :  { %v4653_v33 = vmul.f32 %v4652_v32, %v7300_v42 }
0x110c   :  { %v4654_v4 = vadd.f32 %v4653_v33, %v7302_v28 }
0x110e   :  { %v4655_v41 = vpack.c.bf16 %v4654_v4, %v4654_v4 }
0x1110   :  { %5617 = vmatmul.mubr.bf16.vlgmr.msra.gmra.mrb[44].mxu0 %v4655_v41 }
0x11e3   :  { %v4761_v44 = vpop.f32.mrb[44].mxu0 }
0x11e4   :  { %v4762_v35 = vadd.f32 %v5258_v34, %v4761_v44  ;;  %v5618_v36 = vpop.f32.mrb[45].mxu0 }
0x11e5   :  { %v4764_v37 = vpop.f32.mrb[46].mxu0 }
0x11e6   :  { %4768 = vst.msk [vmem:[%s7424_s20] sm:$0xff] %vm4767_vm0, %v4762_v35  ;;  %v5619_v38 = vpop.f32.mrb[47].mxu0 }
0x11e7   :  { %4773 = vsyncpa [#allocation3], 1 }
0x11e8   :  { %4774 = vsyncpa [#allocation5], 1 }
0x11e9   :  { %4775 = vsyncpa [#allocation8], 1 }
0x11ea   :  { %4776 = vsyncpa [#allocation11], 1 }
0x11eb   :  { %4777 = vsyncpa [#allocation14], 1 }
0x11ec   :  { %4778 = vsyncpa [#allocation17], 1 }
0x11ed   :  { %4779 = vsyncpa [#allocation20], 1 }
0x11ee   :  { %4780 = vsyncpa [#allocation23], 1 }
0x11ef   :  { %4781 = vsyncpa [#allocation26], 1 }
0x11f0   :  { %4782 = vsyncpa [#allocation29], 1 }

</bundles_post_ra>
